<compile_context>
chip_gen: v7x
topology: tpu7x:2x2x1
jax: 0.10.0
libtpu: 0.0.40
codegen_flags: <defaults>
</compile_context>

<pallas_src>
import math
from functools import partial

import numpy as np
import jax
import jax.numpy as jnp
from jax import lax
from jax.experimental import pallas as pl
from jax.experimental.pallas import tpu as pltpu


def _cdiv(a, b):
    return (a + b - 1) // b


def _round_up(x, m):
    return _cdiv(x, m) * m


def _spmm_kernel(tile_ref, first_ref, last_ref,            # scalar prefetch (SMEM)
                 lrows_ref, cols_ref, vals_ref, w_ref, b_ref,  # inputs (VMEM)
                 out_ref):                                   # output (VMEM accumulator)
    """One (column-tile j, nnz-chunk i) grid step of CSR SpMM + bias.

    tile_ref:  (n_chunks,) int32  row-tile id of each chunk (index maps only)
    first_ref: (n_chunks,) int32  1 iff chunk is the first of its row tile
    last_ref:  (n_chunks,) int32  1 iff chunk is the last of its row tile
    lrows_ref: (1, TK)  int32     row index LOCAL to the row tile (lane-dense)
    cols_ref:  (TK, 1)  int32     column index of each nonzero
    vals_ref:  (TK, 1)  float32   nonzero values (padding entries are 0)
    w_ref:     (n_pad, TN)        weight column tile (f32 or bf16)
    b_ref:     (1, TN)  float32   bias column tile
    out_ref:   (TM, TN) float32   output block, resident across the chunks of
                                  one row tile (accumulator)
    """
    i = pl.program_id(1)                      # nnz-chunk index ("arbitrary" axis)
    tk = cols_ref.shape[0]
    n_pad = w_ref.shape[0]
    tm = out_ref.shape[0]
    cdt = w_ref.dtype                          # MXU operand dtype (bf16 fast / f32 exact)

    # --- Stage 1: gather rows of W via a one-hot MXU matmul (one-hots exact in bf16).
    # TODO(synk): the iotas are grid-invariant; hoist to VMEM scratch if the bundle
    # shows iota generation competing with the compares on the VALU slots.
    col_iota = lax.broadcasted_iota(jnp.int32, (tk, n_pad), 1)
    col_oh = (cols_ref[...] == col_iota).astype(cdt)                   # (TK, n_pad)
    gathered = jnp.dot(col_oh, w_ref[...],
                       preferred_element_type=jnp.float32)             # (TK, TN) f32
    # Values factored OUT of the one-hots: scale the (TK, TN) gather result in f32.
    gathered = gathered * vals_ref[...]                                # (TK,1) broadcast

    # --- Stage 2: scatter-add via a pre-transposed 0/1 one-hot MXU matmul over the
    # TM-row window of this chunk's row tile only (row ids are pre-offset on host).
    row_iota = lax.broadcasted_iota(jnp.int32, (tm, tk), 0)
    row_oh = (lrows_ref[...] == row_iota).astype(cdt)                  # (TM, TK)
    contrib = jnp.dot(row_oh, gathered.astype(cdt),
                      preferred_element_type=jnp.float32)              # (TM, TN) f32

    # Bias folded into the last chunk of each row tile (no separate finalize pass).
    contrib = contrib + (last_ref[i] == 1).astype(jnp.float32) * b_ref[...]

    @pl.when(first_ref[i] == 1)
    def _():
        # First chunk of this row tile: plain write (no zero-init + RMW pass).
        out_ref[...] = contrib

    @pl.when(first_ref[i] == 0)
    def _():
        out_ref[...] += contrib


def _build_csr_schedule(feature_indices, feature_values, num_nodes, block_m, block_k):
    """Host-side (numpy) CSR packing.

    Sorts the nonzeros by row, splits them into TM-row tiles, pads every tile's
    segment to a multiple of TK and emits per-chunk metadata (row-tile id,
    first/last flags).  Every row tile gets at least one chunk so its output
    block is always written (empty tiles / nnz == 0 yield output == bias).
    """
    rows = np.asarray(jax.device_get(feature_indices[0])).astype(np.int64)
    cols = np.asarray(jax.device_get(feature_indices[1])).astype(np.int64)
    vals = np.asarray(jax.device_get(feature_values)).astype(np.float32)
    nnz = int(vals.shape[0])

    if num_nodes is None:
        # Mirrors `torch.max(feature_indices[0]).item() + 1` (host-side anyway here).
        num_nodes = int(rows.max()) + 1 if nnz else 1
    elif nnz and int(rows.max()) >= num_nodes:
        raise ValueError(
            f"num_nodes={num_nodes} is smaller than max(row)+1={int(rows.max()) + 1}")

    tm = _round_up(min(block_m, max(num_nodes, 1)), 8)      # row-tile height
    tk = _round_up(min(block_k, max(nnz, 1)), 256)          # nnz chunk (MXU-aligned)
    num_tiles = _cdiv(num_nodes, tm)

    order = np.argsort(rows, kind="stable")
    rows, cols, vals = rows[order], cols[order], vals[order]
    tile_of = rows // tm
    counts = np.bincount(tile_of, minlength=num_tiles).astype(np.int64)
    chunks_per_tile = np.maximum(1, _cdiv(counts, tk))
    total_chunks = int(chunks_per_tile.sum())
    packed = total_chunks * tk

    lrows = np.zeros((1, packed), np.int32)
    pcols = np.zeros((packed, 1), np.int32)
    pvals = np.zeros((packed, 1), np.float32)   # padding values are 0 -> contribute nothing
    chunk_tile = np.zeros((total_chunks,), np.int32)
    chunk_first = np.zeros((total_chunks,), np.int32)
    chunk_last = np.zeros((total_chunks,), np.int32)

    seg_start = np.concatenate([[0], np.cumsum(counts)])
    c = 0
    for t in range(num_tiles):
        s, e = int(seg_start[t]), int(seg_start[t + 1])
        nct = int(chunks_per_tile[t])
        base = c * tk
        lrows[0, base:base + (e - s)] = (rows[s:e] - t * tm).astype(np.int32)
        pcols[base:base + (e - s), 0] = cols[s:e].astype(np.int32)
        pvals[base:base + (e - s), 0] = vals[s:e]
        chunk_tile[c:c + nct] = t
        chunk_first[c] = 1
        chunk_last[c + nct - 1] = 1
        c += nct

    sched = dict(
        chunk_tile=jnp.asarray(chunk_tile),
        chunk_first=jnp.asarray(chunk_first),
        chunk_last=jnp.asarray(chunk_last),
        lrows=jnp.asarray(lrows),
        cols=jnp.asarray(pcols),
        vals=jnp.asarray(pvals),
    )
    return sched, num_nodes, tm, tk, num_tiles, total_chunks


@partial(jax.jit, static_argnames=("tm", "tk", "tn", "num_tiles", "total_chunks"))
def _spmm_pallas(chunk_tile, chunk_first, chunk_last, lrows, cols, vals, w, b,
                 *, tm, tk, tn, num_tiles, total_chunks):
    n_pad, out_pad = w.shape
    num_col_tiles = out_pad // tn
    m_pad = num_tiles * tm
    itemsize = w.dtype.itemsize

    # Explicit VMEM budget (double-buffered blocks + in-kernel one-hot/gather
    # temporaries), capped at 48 MiB so it stays inside v7x's 64 MiB physical VMEM.
    est = 2 * (tk * 12 + n_pad * tn * itemsize + tn * 4 + tm * tn * 4)
    est += (tk * n_pad + tm * tk) * itemsize + 2 * tk * tn * 4
    vmem_limit = int(min(max(2 * est, 32 * 1024 * 1024), 48 * 1024 * 1024))

    packed = total_chunks * tk
    cost = pl.CostEstimate(
        flops=int(2 * packed * out_pad * (n_pad + tm)),
        transcendentals=0,
        bytes_accessed=int(num_col_tiles * packed * 12
                           + n_pad * out_pad * itemsize + out_pad * 4
                           + m_pad * out_pad * 4 + 3 * total_chunks * 4),
    )

    return pl.pallas_call(
        _spmm_kernel,
        out_shape=jax.ShapeDtypeStruct((m_pad, out_pad), jnp.float32),
        grid_spec=pltpu.PrefetchScalarGridSpec(
            num_scalar_prefetch=3,
            # j: output-column tile ("parallel" -> megacore split on v7x);
            # i: CSR nnz chunk ("arbitrary"); chunks of one row tile are consecutive
            #    so the (TM, TN) output block stays resident as the f32 accumulator.
            grid=(num_col_tiles, total_chunks),
            in_specs=[
                pl.BlockSpec((1, tk), lambda j, i, t, f, l: (0, i)),      # local rows
                pl.BlockSpec((tk, 1), lambda j, i, t, f, l: (i, 0)),      # cols
                pl.BlockSpec((tk, 1), lambda j, i, t, f, l: (i, 0)),      # values
                pl.BlockSpec((n_pad, tn), lambda j, i, t, f, l: (0, j)),  # weight col tile
                pl.BlockSpec((1, tn), lambda j, i, t, f, l: (0, j)),      # bias col tile
            ],
            out_specs=pl.BlockSpec((tm, tn), lambda j, i, t, f, l: (t[i], j)),
        ),
        compiler_params=pltpu.CompilerParams(
            dimension_semantics=("parallel", "arbitrary"),
            vmem_limit_bytes=vmem_limit,
        ),
        cost_estimate=cost,
    )(chunk_tile, chunk_first, chunk_last, lrows, cols, vals, w, b)


def sparse_fully_connected(feature_indices, feature_values, weight, bias,
                           num_nodes=None, block_m=256, block_k=1024):
    """Forward pass matching SparseFullyConnected.forward:
         out = spmm(feature_indices, feature_values, m, n, weight) + bias
    Pass `weight` as bfloat16 to use the fast bf16 MXU path (f32 accumulation).
    """
    sched, num_nodes, tm, tk, num_tiles, total_chunks = _build_csr_schedule(
        feature_indices, feature_values, num_nodes, block_m, block_k)

    n, out_ch = weight.shape
    out_pad = _round_up(out_ch, 128)   # lane-dense output -> unmasked stores
    n_pad = _round_up(n, 128)          # lane-dense gather one-hot / MXU-aligned contraction
    tn = 256 if out_pad % 256 == 0 else 128

    w = jnp.zeros((n_pad, out_pad), weight.dtype).at[:n, :out_ch].set(weight)
    b = jnp.zeros((1, out_pad), jnp.float32).at[0, :out_ch].set(
        bias.astype(jnp.float32))

    out = _spmm_pallas(sched["chunk_tile"], sched["chunk_first"], sched["chunk_last"],
                       sched["lrows"], sched["cols"], sched["vals"], w, b,
                       tm=tm, tk=tk, tn=tn, num_tiles=num_tiles,
                       total_chunks=total_chunks)
    return out[:num_nodes, :out_ch]


def init_parameters(key, in_channels, out_channels):
    """Deterministic re-implementation of the module's init."""
    kw, kb = jax.random.split(key)
    bound = math.sqrt(6.0 / (in_channels + out_channels))     # xavier_uniform_
    weight = jax.random.uniform(
        kw, (in_channels, out_channels), jnp.float32, -bound, bound)
    stdv = 1.0 / math.sqrt(out_channels)                       # uniform(out_channels, bias)
    bias = jax.random.uniform(kb, (out_channels,), jnp.float32, -stdv, stdv)
    return weight, bias


if __name__ == "__main__":
    key = jax.random.PRNGKey(0)
    k_r, k_c, k_v, k_p = jax.random.split(key, 4)

    num_nodes = 500       # m
    in_channels = 200     # n
    out_channels = 320
    nnz = 3000

    rows = jax.random.randint(k_r, (nnz,), 0, num_nodes, jnp.int32)
    cols = jax.random.randint(k_c, (nnz,), 0, in_channels, jnp.int32)
    # Guarantee max(row)+1 == num_nodes and max(col)+1 == in_channels, matching
    # how the torch module derives m and n from the data.
    rows = rows.at[0].set(num_nodes - 1)
    cols = cols.at[0].set(in_channels - 1)
    feature_indices = jnp.stack([rows, cols], axis=0)          # (2, nnz)
    feature_values = jax.random.normal(k_v, (nnz,), jnp.float32)

    weight, bias = init_parameters(k_p, in_channels, out_channels)

    # Pure-JAX reference: densify A and matmul at highest precision.
    dense_a = jnp.zeros((num_nodes, in_channels), jnp.float32)
    dense_a = dense_a.at[rows, cols].add(feature_values)
    ref = jnp.dot(dense_a, weight, precision=lax.Precision.HIGHEST) + bias[None, :]

    # f32 path: 2 row tiles x 3 chunks x 3 column tiles (exercises init/accumulate/
    # bias-fold and the parallel column axis).
    out_f32 = sparse_fully_connected(feature_indices, feature_values, weight, bias,
                                     num_nodes=num_nodes, block_m=256, block_k=512)
    out_f32 = jax.block_until_ready(out_f32)
    assert out_f32.shape == (num_nodes, out_channels)
    assert jnp.allclose(out_f32, ref, atol=1e-4, rtol=1e-3), "f32 path mismatch"

    # bf16 MXU fast path (recommended on v6e/v7x): bf16 operands, f32 accumulation.
    out_bf16 = sparse_fully_connected(feature_indices, feature_values,
                                      weight.astype(jnp.bfloat16), bias,
                                      num_nodes=num_nodes, block_m=256, block_k=512)
    out_bf16 = jax.block_until_ready(out_bf16)
    assert jnp.allclose(out_bf16, ref, atol=3e-2, rtol=3e-2), "bf16 path mismatch"

    # Empty sparse matrix (nnz == 0): every row tile gets a dummy chunk, so the
    # output is exactly the broadcast bias (previously a crash / undefined output).
    out_empty = sparse_fully_connected(jnp.zeros((2, 0), jnp.int32),
                                       jnp.zeros((0,), jnp.float32),
                                       weight, bias, num_nodes=32)
    out_empty = jax.block_until_ready(out_empty)
    assert jnp.allclose(out_empty,
                        jnp.broadcast_to(bias, (32, out_channels)), atol=1e-6)

    print("KERNEL_OK")
</pallas_src>

<mosaic_0001>
module attributes {stable_mosaic.version = 11 : i64} {
  func.func @_spmm_kernel(%arg0: i32, %arg1: i32, %arg2: memref<6xi32, #tpu.memory_space<smem>>, %arg3: memref<6xi32, #tpu.memory_space<smem>>, %arg4: memref<6xi32, #tpu.memory_space<smem>>, %arg5: memref<1x512xi32, #tpu.memory_space<vmem>>, %arg6: memref<512x1xi32, #tpu.memory_space<vmem>>, %arg7: memref<512x1xf32, #tpu.memory_space<vmem>>, %arg8: memref<256x128xf32, #tpu.memory_space<vmem>>, %arg9: memref<1x128xf32, #tpu.memory_space<vmem>>, %arg10: memref<256x128xf32, #tpu.memory_space<vmem>>) attributes {dimension_semantics = [#tpu.dimension_semantics<parallel>, #tpu.dimension_semantics<arbitrary>], iteration_bounds = array<i64: 3, 6>, scalar_prefetch = 3 : i64, scratch_operands = 0 : i64, tpu.core_type = #tpu.core_type<tc>, window_params = [{transform_indices = @transform_0, window_bounds = array<i64: 1, 512>}, {transform_indices = @transform_1, window_bounds = array<i64: 512, 1>}, {transform_indices = @transform_2, window_bounds = array<i64: 512, 1>}, {transform_indices = @transform_3, window_bounds = array<i64: 256, 128>}, {transform_indices = @transform_4, window_bounds = array<i64: 1, 128>}, {transform_indices = @transform_5, window_bounds = array<i64: 256, 128>}]} {
    %0 = tpu.iota {dimensions = array<i32: 1>} : vector<512x256xi32>
    %c0 = arith.constant 0 : index
    %c0_0 = arith.constant 0 : index
    %1 = vector.load %arg6[%c0, %c0_0] : memref<512x1xi32, #tpu.memory_space<vmem>>, vector<512x1xi32>
    %2 = vector.broadcast %1 : vector<512x1xi32> to vector<512x256xi32>
    %3 = arith.cmpi eq, %2, %0 : vector<512x256xi32>
    %4 = arith.extui %3 : vector<512x256xi1> to vector<512x256xi32>
    %5 = arith.sitofp %4 : vector<512x256xi32> to vector<512x256xf32>
    %c0_1 = arith.constant 0 : index
    %c0_2 = arith.constant 0 : index
    %6 = vector.load %arg8[%c0_1, %c0_2] : memref<256x128xf32, #tpu.memory_space<vmem>>, vector<256x128xf32>
    %cst = arith.constant dense<0.000000e+00> : vector<512x128xf32>
    %7 = tpu.matmul %5, %6, %cst {dimension_numbers = #tpu.dot_dimension_numbers<[1], [0], [0], [1], [0, 0, 1, 1], [], []>} : vector<512x256xf32>, vector<256x128xf32>, vector<512x128xf32> -> vector<512x128xf32>
    %c0_3 = arith.constant 0 : index
    %c0_4 = arith.constant 0 : index
    %8 = vector.load %arg7[%c0_3, %c0_4] : memref<512x1xf32, #tpu.memory_space<vmem>>, vector<512x1xf32>
    %9 = vector.broadcast %8 : vector<512x1xf32> to vector<512x128xf32>
    %10 = arith.mulf %7, %9 : vector<512x128xf32>
    %11 = tpu.iota {dimensions = array<i32: 0>} : vector<256x512xi32>
    %c0_5 = arith.constant 0 : index
    %c0_6 = arith.constant 0 : index
    %12 = vector.load %arg5[%c0_5, %c0_6] : memref<1x512xi32, #tpu.memory_space<vmem>>, vector<1x512xi32>
    %13 = vector.broadcast %12 : vector<1x512xi32> to vector<256x512xi32>
    %14 = arith.cmpi eq, %13, %11 : vector<256x512xi32>
    %15 = arith.extui %14 : vector<256x512xi1> to vector<256x512xi32>
    %16 = arith.sitofp %15 : vector<256x512xi32> to vector<256x512xf32>
    %cst_7 = arith.constant dense<0.000000e+00> : vector<256x128xf32>
    %17 = tpu.matmul %16, %10, %cst_7 {dimension_numbers = #tpu.dot_dimension_numbers<[1], [0], [0], [1], [0, 0, 1, 1], [], []>} : vector<256x512xf32>, vector<512x128xf32>, vector<256x128xf32> -> vector<256x128xf32>
    %18 = arith.index_cast %arg1 : i32 to index
    %19 = memref.load %arg4[%18] : memref<6xi32, #tpu.memory_space<smem>>
    %c1_i32 = arith.constant 1 : i32
    %20 = arith.cmpi eq, %19, %c1_i32 : i32
    %21 = arith.extui %20 : i1 to i32
    %22 = arith.sitofp %21 : i32 to f32
    %c0_8 = arith.constant 0 : index
    %c0_9 = arith.constant 0 : index
    %23 = vector.load %arg9[%c0_8, %c0_9] : memref<1x128xf32, #tpu.memory_space<vmem>>, vector<1x128xf32>
    %24 = vector.broadcast %22 : f32 to vector<1x128xf32>
    %25 = arith.mulf %24, %23 : vector<1x128xf32>
    %26 = vector.broadcast %25 : vector<1x128xf32> to vector<256x128xf32>
    %27 = arith.addf %17, %26 : vector<256x128xf32>
    %28 = arith.index_cast %arg1 : i32 to index
    %29 = memref.load %arg3[%28] : memref<6xi32, #tpu.memory_space<smem>>
    %c1_i32_10 = arith.constant 1 : i32
    %30 = arith.cmpi eq, %29, %c1_i32_10 : i32
    %31 = arith.extui %30 : i1 to i32
    %c0_i32 = arith.constant 0 : i32
    %32 = arith.cmpi ne, %31, %c0_i32 : i32
    scf.if %32 {
      %c0_13 = arith.constant 0 : index
      %c0_14 = arith.constant 0 : index
      %38 = vector.load %arg10[%c0_13, %c0_14] : memref<256x128xf32, #tpu.memory_space<vmem>>, vector<256x128xf32>
      tpu.vector_store %arg10[%c0_13, %c0_14], %27 {strides = array<i32>} : memref<256x128xf32, #tpu.memory_space<vmem>>, vector<256x128xf32>,
    } else {
    }
    %33 = arith.index_cast %arg1 : i32 to index
    %34 = memref.load %arg3[%33] : memref<6xi32, #tpu.memory_space<smem>>
    %c0_i32_11 = arith.constant 0 : i32
    %35 = arith.cmpi eq, %34, %c0_i32_11 : i32
    %36 = arith.extui %35 : i1 to i32
    %c0_i32_12 = arith.constant 0 : i32
    %37 = arith.cmpi ne, %36, %c0_i32_12 : i32
    scf.if %37 {
      %c0_13 = arith.constant 0 : index
      %c0_14 = arith.constant 0 : index
      %38 = vector.load %arg10[%c0_13, %c0_14] : memref<256x128xf32, #tpu.memory_space<vmem>>, vector<256x128xf32>
      %39 = arith.addf %38, %27 : vector<256x128xf32>
      %c0_15 = arith.constant 0 : index
      %c0_16 = arith.constant 0 : index
      %40 = vector.load %arg10[%c0_15, %c0_16] : memref<256x128xf32, #tpu.memory_space<vmem>>, vector<256x128xf32>
      tpu.vector_store %arg10[%c0_15, %c0_16], %39 {strides = array<i32>} : memref<256x128xf32, #tpu.memory_space<vmem>>, vector<256x128xf32>,
    } else {
    }
    return
  }
  func.func @transform_0(%arg0: i32, %arg1: i32, %arg2: memref<6xi32, #tpu.memory_space<smem>>, %arg3: memref<6xi32, #tpu.memory_space<smem>>, %arg4: memref<6xi32, #tpu.memory_space<smem>>) -> (i32, i32) {
    %c0_i32 = arith.constant 0 : i32
    %c0_i32_0 = arith.constant 0 : i32
    return %c0_i32, %arg1 : i32, i32
  }
  func.func @transform_1(%arg0: i32, %arg1: i32, %arg2: memref<6xi32, #tpu.memory_space<smem>>, %arg3: memref<6xi32, #tpu.memory_space<smem>>, %arg4: memref<6xi32, #tpu.memory_space<smem>>) -> (i32, i32) {
    %c0_i32 = arith.constant 0 : i32
    %c0_i32_0 = arith.constant 0 : i32
    return %arg1, %c0_i32 : i32, i32
  }
  func.func @transform_2(%arg0: i32, %arg1: i32, %arg2: memref<6xi32, #tpu.memory_space<smem>>, %arg3: memref<6xi32, #tpu.memory_space<smem>>, %arg4: memref<6xi32, #tpu.memory_space<smem>>) -> (i32, i32) {
    %c0_i32 = arith.constant 0 : i32
    %c0_i32_0 = arith.constant 0 : i32
    return %arg1, %c0_i32 : i32, i32
  }
  func.func @transform_3(%arg0: i32, %arg1: i32, %arg2: memref<6xi32, #tpu.memory_space<smem>>, %arg3: memref<6xi32, #tpu.memory_space<smem>>, %arg4: memref<6xi32, #tpu.memory_space<smem>>) -> (i32, i32) {
    %c0_i32 = arith.constant 0 : i32
    %c0_i32_0 = arith.constant 0 : i32
    return %c0_i32, %arg0 : i32, i32
  }
  func.func @transform_4(%arg0: i32, %arg1: i32, %arg2: memref<6xi32, #tpu.memory_space<smem>>, %arg3: memref<6xi32, #tpu.memory_space<smem>>, %arg4: memref<6xi32, #tpu.memory_space<smem>>) -> (i32, i32) {
    %c0_i32 = arith.constant 0 : i32
    %c0_i32_0 = arith.constant 0 : i32
    return %c0_i32, %arg0 : i32, i32
  }
  func.func @transform_5(%arg0: i32, %arg1: i32, %arg2: memref<6xi32, #tpu.memory_space<smem>>, %arg3: memref<6xi32, #tpu.memory_space<smem>>, %arg4: memref<6xi32, #tpu.memory_space<smem>>) -> (i32, i32) {
    %0 = arith.index_cast %arg1 : i32 to index
    %1 = memref.load %arg2[%0] : memref<6xi32, #tpu.memory_space<smem>>
    %c0_i32 = arith.constant 0 : i32
    return %1, %arg0 : i32, i32
  }
}

</mosaic_0001>

<bundles_post_ra>
// kernel: _spmm_pallas.1
= control target key start
LH: loop header
LB: loop body
LE: loop exit
PB: predicated region body
PF: predicated region fallthrough
CT: control target
= control target key end

     0   :  { %s5820_s0 = inlined_call_operand.vmem [shape: s32[6], index: 0, kind: input, shape index: {}]   ;;  %s5821_s3 = inlined_call_operand.vmem [shape: s32[1,3072], index: 3, kind: input, shape index: {}]   ;;  %s5822_s4 = inlined_call_operand.vmem [shape: s32[3072,1], index: 4, kind: input, shape index: {}]   ;;  %s5823_s5 = inlined_call_operand.vmem [shape: f32[3072,1], index: 5, kind: input, shape index: {}]   ;;  %s5824_s6 = inlined_call_operand.vmem [shape: f32[256,384], index: 6, kind: input, shape index: {}]   ;;  %s5825_s7 = inlined_call_operand.vmem [shape: f32[1,384], index: 7, kind: input, shape index: {}]   ;;  %s5826_s8 = inlined_call_operand.hbm [shape: f32[512,384], index: 8, kind: output, shape index: {}]   ;;  %s5827_s1 = inlined_call_operand.vmem [shape: s32[6], index: 1, kind: input, shape index: {}]   ;;  %s5828_s2 = inlined_call_operand.vmem [shape: s32[6], index: 2, kind: input, shape index: {}]  }
   0x1   :  { %5831 = sst [smem:[#allocation14_spill]] %s5821_s3  ;;  %s13_s29 = sshll.u32 %s5820_s0, 4  ;;  %s14_s29 = int_to_ptr.vmem [resolvable:$true] %s13_s29 }
   0x2   :  { %s17_s10 = sshll.u32 %s5827_s1, 4  ;;  %s4052_s11 = scalar_lea.vmem %s14_s29, 16  ;;  %s18_s10 = int_to_ptr.vmem [resolvable:$true] %s17_s10 }
   0x3   :  { %p4053_p0 = scmp.ne.s32.totalorder %s14_s29, %s4052_s11  ;;  %p4057_p1 = scmp.lt.s32.totalorder %s14_s29, %s14_s29 }
   0x4   :  { %p4058_p2 = scmp.lt.s32.totalorder %s4052_s11, %s4052_s11 }
   0x6   :  { %p4059_p3 = por %p4058_p2, %p4057_p1 }
   0x8   :  { %p4060_p4 = pnand %p4059_p3, %p4053_p0 }
   0xa   :  { %4063 = shalt.err (!%p4060_p4)  }
   0xb   :  { %s4202_s12 = smov [#allocation3]   ;;  %s4064_s13 = scalar_lea.vmem %s18_s10, 16 }
   0xc   :  { %16 = dma.vmem_to_smem %s14_s29, 16, %s4202_s12, [#allocation2] }
   0xd   :  { %p4065_p5 = scmp.ne.s32.totalorder %s18_s10, %s4064_s13  ;;  %p4069_p6 = scmp.lt.s32.totalorder %s18_s10, %s18_s10 }
   0xe   :  { %p4070_p7 = scmp.lt.s32.totalorder %s4064_s13, %s4064_s13 }
  0x10   :  { %p4071_p8 = por %p4070_p7, %p4069_p6 }
  0x12   :  { %p4072_p9 = pnand %p4071_p8, %p4065_p5 }
  0x14   :  { %4075 = shalt.err (!%p4072_p9)  }
  0x15   :  { %s4203_s0 = smov [#allocation4]   ;;  %s21_s15 = sshll.u32 %s5828_s2, 4  ;;  %s22_s15 = int_to_ptr.vmem [resolvable:$true] %s21_s15 }
  0x16   :  { %20 = dma.vmem_to_smem %s18_s10, 16, %s4203_s0, [#allocation2] }
  0x17   :  { %s4076_s16 = scalar_lea.vmem %s22_s15, 16  ;;  %p4081_p11 = scmp.lt.s32.totalorder %s22_s15, %s22_s15 }
  0x18   :  { %p4077_p10 = scmp.ne.s32.totalorder %s22_s15, %s4076_s16  ;;  %p4082_p12 = scmp.lt.s32.totalorder %s4076_s16, %s4076_s16 }
  0x1a   :  { %p4083_p13 = por %p4082_p12, %p4081_p11 }
  0x1c   :  { %p4084_p0 = pnand %p4083_p13, %p4077_p10 }
  0x1e   :  { %4087 = shalt.err (!%p4084_p0)  }
  0x1f   :  { %s4204_s17 = smov [#allocation5]  }
  0x20   :  { %24 = dma.vmem_to_smem %s22_s15, 16, %s4204_s17, [#allocation2] }
  0x21   :  { %4156 = dma.done.wait [#allocation2], 48 }
  0x22   :  { %4157 = vsyncadd [#allocation2], 4294967248 }
  0x23   :  { %26 = sfence }
  0x24   :  { %27 = vsyncpa [#allocation8], 0 }
  0x25   :  { %29 = vsyncpa [#allocation8 + $0x1], 0  ;;  %s4266_s18 = smov 0   ;;  %s4268_s19 = smov 0  }
  0x26   :  { %s4270_s2 = smov 0   ;;  %s4272_s20 = smov 0  }
  0x27   :  { %s4274_s21 = smov 0   ;;  %s4276_s22 = smov 0  }
  0x28   :  { %s4278_s23 = smov 0   ;;  %s4280_s24 = smov 0  }
  0x29   :  { %s4282_s25 = smov 0   ;;  %s4284_s26 = smov 0  }
  0x2a LB: > { %s3176_s27 = sadd.s32 4294967295, %s4200_s26   ;;  %s3177_s28 = sadd.s32 4294967294, %s4200_s26   ;;  %s4200_s26 = sphi %s4284_s26, %s35_s26   ;;  %s4196_s25 = sphi %s4282_s25, %s5848_s25   ;;  %s4192_s24 = sphi %s4280_s24, %s5847_s24   ;;  %s4188_s23 = sphi %s4278_s23, %s5846_s23   ;;  %s4184_s22 = sphi %s4276_s22, %s5845_s22   ;;  %s4180_s21 = sphi %s4274_s21, %s5844_s21   ;;  %s4176_s20 = sphi %s4272_s20, %s5843_s20   ;;  %s4172_s2 = sphi %s4270_s2, %s5842_s2   ;;  %s4168_s19 = sphi %s4268_s19, %s5841_s19   ;;  %s4164_s18 = sphi %s4266_s18, %s5840_s18  }
  0x2b   : > { %s44_s29 = sadd.s32 1, %s4192_s24  ;;  %s47_s30 = sadd.s32 1, %s4196_s25 }
  0x2c   : > { %p45_p1 = scmp.ge.s32.totalorder %s44_s29, 6  ;;  %p139_p2 = scmp.ne.s32.totalorder %s4180_s21, %s4176_s20 }
  0x2d   : > { %p140_p3 = scmp.eq.s32.totalorder %s4200_s26, 0  ;;  %s181_s10 = sld [smem:[#allocation3 + %s4192_s24]] }
  0x2e   : > { %s5850_s29 = smov (%p45_p1, %s44_s29), 0  ;;  %s5852_s30 = smov (!%p45_p1, %s47_s30), %s4196_s25 }
  0x2f   : > { %5832 = sst [smem:[#allocation12_spill]] %s5850_s29  ;;  %p4326_p4 = por %p140_p3, %p139_p2 }
  0x30   : > { %p49_p5 = scmp.ge.s32.totalorder %s5852_s30, 3  ;;  %s182_s11 = sld [smem:[#allocation3 + %s5850_s29]] }
  0x31   : > { %s132_s12 = sadd.s32 1, %s4180_s21  ;;  %p198_p6 = scmp.ne.s32.totalorder %s4172_s2, %s4168_s19 }
  0x32   : > { %s5854_s30 = smov (%p49_p5, %s5852_s30), 0  ;;  %p199_p7 = scmp.eq.s32.totalorder %s3176_s27, 17 }
  0x33   : > { %5834 = sst [smem:[#allocation13_spill]] %s5854_s30  ;;  %p204_p8 = scmp.ne.s32.totalorder %s4168_s19, %s4164_s18 }
  0x34   : > { %s129_s13 = ssub.s32 %s4196_s25, %s5854_s30  ;;  %p205_p9 = scmp.eq.s32.totalorder %s3177_s28, 17 }
  0x35   : > { %p130_p10 = scmp.eq.s32.totalorder %s129_s13, 0  ;;  %p4341_p11 = por %p199_p7, %p198_p6 }
  0x36   : > { %s183_s1 = ssub.s32 %s181_s10, %s182_s11  ;;  %p4345_p12 = por %p205_p9, %p204_p8 }
  0x37   : > { %s4350_s15 = scalar_select %p130_p10, %s4180_s21, %s132_s12  }
  0x38   : > { %s185_s16 = sor.u32 %s183_s1, %s129_s13  ;;  %s188_s17 = sadd.s32 1, %s4172_s2 }
  0x39   : > { %p186_p13 = scmp.eq.s32.totalorder %s185_s16, 0  ;;  %p3179_p0 = scmp.ge.s32.totalorder %s4200_s26, 18 }
  0x3b   : > { %s4354_s29 = scalar_select %p186_p13, %s4172_s2, %s188_s17  }
  0x3c   : > { %221 = sbr.rel (%p3179_p0) target bundleno = 87 (0x57), region = 16 }
  0x43   : > { %250 = sbr.rel (!%p4326_p4) target bundleno = 87 (0x57), region = 32  ;;  %s252_s27 = sand.u32 (%p4326_p4), 1, %s4180_s21  }
  0x44   : > { %s3181_s28 = sshll.u32 (%p4326_p4), %s4196_s25, 3  ;;  %s3180_s10 = sshll.u32 (%p4326_p4), %s252_s27, 8 }
  0x45   : > { %s4364_s12 = scalar_lea.vmem (%p4326_p4), %s5824_s6, %s3181_s28  ;;  %s4369_s9 = scalar_lea.vmem (%p4326_p4), [#allocation6], %s3180_s10 }
  0x46   : > { %v346_v0 = vld [vmem:[%s4364_s12] sm:$0xff] (%p4326_p4)  ;;  %v348_v1 = vld [vmem:[%s4364_s12 + $0x18] sm:$0xff] (%p4326_p4)  ;;  %v350_v2 = vld [vmem:[%s4364_s12 + $0x30] sm:$0xff] (%p4326_p4) }
  0x47   : > { %347 = vst [vmem:[%s4369_s9] sm:$0xff] (%p4326_p4), %v346_v0  ;;  %349 = vst [vmem:[%s4369_s9 + $0x8] sm:$0xff] (%p4326_p4), %v348_v1  ;;  %v352_v3 = vld [vmem:[%s4364_s12 + $0x48] sm:$0xff] (%p4326_p4)  ;;  %v354_v4 = vld [vmem:[%s4364_s12 + $0x60] sm:$0xff] (%p4326_p4) }
  0x48   : > { %351 = vst [vmem:[%s4369_s9 + $0x10] sm:$0xff] (%p4326_p4), %v350_v2  ;;  %v356_v5 = vld [vmem:[%s4364_s12 + $0x78] sm:$0xff] (%p4326_p4)  ;;  %353 = vst [vmem:[%s4369_s9 + $0x18] sm:$0xff] (%p4326_p4), %v352_v3  ;;  %v358_v6 = vld [vmem:[%s4364_s12 + $0x90] sm:$0xff] (%p4326_p4) }
  0x49   : > { %355 = vst [vmem:[%s4369_s9 + $0x20] sm:$0xff] (%p4326_p4), %v354_v4  ;;  %357 = vst [vmem:[%s4369_s9 + $0x28] sm:$0xff] (%p4326_p4), %v356_v5  ;;  %v360_v7 = vld [vmem:[%s4364_s12 + $0xa8] sm:$0xff] (%p4326_p4)  ;;  %v362_v8 = vld [vmem:[%s4364_s12 + $0xc0] sm:$0xff] (%p4326_p4) }
  0x4a   : > { %359 = vst [vmem:[%s4369_s9 + $0x30] sm:$0xff] %v358_v6  ;;  %361 = vst [vmem:[%s4369_s9 + $0x38] sm:$0xff] %v360_v7  ;;  %v364_v9 = vld [vmem:[%s4364_s12 + $0xd8] sm:$0xff]  ;;  %v366_v10 = vld [vmem:[%s4364_s12 + $0xf0] sm:$0xff] }
  0x4b   : > { %363 = vst [vmem:[%s4369_s9 + $0x40] sm:$0xff] %v362_v8  ;;  %v368_v11 = vld [vmem:[%s4364_s12 + $0x108] sm:$0xff]  ;;  %365 = vst [vmem:[%s4369_s9 + $0x48] sm:$0xff] %v364_v9  ;;  %v370_v12 = vld [vmem:[%s4364_s12 + $0x120] sm:$0xff] }
  0x4c   : > { %367 = vst [vmem:[%s4369_s9 + $0x50] sm:$0xff] %v366_v10  ;;  %369 = vst [vmem:[%s4369_s9 + $0x58] sm:$0xff] %v368_v11  ;;  %v372_v13 = vld [vmem:[%s4364_s12 + $0x138] sm:$0xff]  ;;  %v374_v14 = vld [vmem:[%s4364_s12 + $0x150] sm:$0xff] }
  0x4d   : > { %371 = vst [vmem:[%s4369_s9 + $0x60] sm:$0xff] %v370_v12  ;;  %373 = vst [vmem:[%s4369_s9 + $0x68] sm:$0xff] %v372_v13  ;;  %v376_v15 = vld [vmem:[%s4364_s12 + $0x168] sm:$0xff]  ;;  %v378_v16 = vld [vmem:[%s4364_s12 + $0x180] sm:$0xff] }
  0x4e   : > { %375 = vst [vmem:[%s4369_s9 + $0x70] sm:$0xff] %v374_v14  ;;  %v380_v17 = vld [vmem:[%s4364_s12 + $0x198] sm:$0xff]  ;;  %377 = vst [vmem:[%s4369_s9 + $0x78] sm:$0xff] %v376_v15  ;;  %v382_v18 = vld [vmem:[%s4364_s12 + $0x1b0] sm:$0xff] }
  0x4f   : > { %379 = vst [vmem:[%s4369_s9 + $0x80] sm:$0xff] %v378_v16  ;;  %381 = vst [vmem:[%s4369_s9 + $0x88] sm:$0xff] %v380_v17  ;;  %v384_v19 = vld [vmem:[%s4364_s12 + $0x1c8] sm:$0xff]  ;;  %v386_v20 = vld [vmem:[%s4364_s12 + $0x1e0] sm:$0xff] }
  0x50   : > { %383 = vst [vmem:[%s4369_s9 + $0x90] sm:$0xff] %v382_v18  ;;  %385 = vst [vmem:[%s4369_s9 + $0x98] sm:$0xff] %v384_v19  ;;  %v388_v21 = vld [vmem:[%s4364_s12 + $0x1f8] sm:$0xff]  ;;  %v390_v22 = vld [vmem:[%s4364_s12 + $0x210] sm:$0xff] }
  0x51   : > { %387 = vst [vmem:[%s4369_s9 + $0xa0] sm:$0xff] %v386_v20  ;;  %v392_v23 = vld [vmem:[%s4364_s12 + $0x228] sm:$0xff]  ;;  %389 = vst [vmem:[%s4369_s9 + $0xa8] sm:$0xff] %v388_v21  ;;  %v394_v24 = vld [vmem:[%s4364_s12 + $0x240] sm:$0xff] }
  0x52   : > { %391 = vst [vmem:[%s4369_s9 + $0xb0] sm:$0xff] %v390_v22  ;;  %393 = vst [vmem:[%s4369_s9 + $0xb8] sm:$0xff] %v392_v23  ;;  %v396_v25 = vld [vmem:[%s4364_s12 + $0x258] sm:$0xff]  ;;  %v398_v26 = vld [vmem:[%s4364_s12 + $0x270] sm:$0xff] }
  0x53   : > { %395 = vst [vmem:[%s4369_s9 + $0xc0] sm:$0xff] %v394_v24  ;;  %397 = vst [vmem:[%s4369_s9 + $0xc8] sm:$0xff] %v396_v25  ;;  %v400_v27 = vld [vmem:[%s4364_s12 + $0x288] sm:$0xff]  ;;  %v402_v28 = vld [vmem:[%s4364_s12 + $0x2a0] sm:$0xff] }
  0x54   : > { %399 = vst [vmem:[%s4369_s9 + $0xd0] sm:$0xff] %v398_v26  ;;  %v404_v29 = vld [vmem:[%s4364_s12 + $0x2b8] sm:$0xff]  ;;  %401 = vst [vmem:[%s4369_s9 + $0xd8] sm:$0xff] %v400_v27  ;;  %v406_v30 = vld [vmem:[%s4364_s12 + $0x2d0] sm:$0xff] }
  0x55   : > { %403 = vst [vmem:[%s4369_s9 + $0xe0] sm:$0xff] %v402_v28  ;;  %405 = vst [vmem:[%s4369_s9 + $0xe8] sm:$0xff] %v404_v29  ;;  %v408_v31 = vld [vmem:[%s4364_s12 + $0x2e8] sm:$0xff] }
  0x56   : > { %407 = vst [vmem:[%s4369_s9 + $0xf0] sm:$0xff] %v406_v30  ;;  %409 = vst [vmem:[%s4369_s9 + $0xf8] sm:$0xff] %v408_v31 }
  0x57 PF: > { %p3182_p1 = scmp.ge.s32.totalorder %s4200_s26, 1  ;;  %p420_p2 = scmp.lt.s32.totalorder %s4200_s26, 19 }
  0x59   : > { %p421_p3 = pnand %p3182_p1, %p420_p2 }
  0x5a   : > { %s3186_s30 = sshll.u32 (!%p421_p3), %s4184_s22, 6  ;;  %s468_s13 = sand.u32 (!%p421_p3), 1, %s4168_s19   ;;  %v4205_v32 = vmov (!%p421_p3), 0   ;;  %v4206_v33 = vmov (!%p421_p3), 0.0|0.0  }
  0x5b   : > { %424 = sbr.rel (%p421_p3) target bundleno = 1096 (0x448), region = 74  ;;  %4050 = vset.pattern.permute.xlu1 (!%p421_p3), %v4205_v32  ;;  %4049 = vset.pattern.permute.xlu0 (!%p421_p3), %v4205_v32  ;;  %p477_p4 = scmp.lt.s32.totalorder (!%p421_p3), %s3186_s30, 383 }
  0x5c   : > { %s4438_s1 = sshll.u32 (!%p421_p3), %s468_s13, 8  ;;  %3710 = vmatprep.subr.bf16.mxu0 (!%p421_p3), %v4206_v33  ;;  %s427_s16 = sand.u32 (!%p421_p3), 1, %s4176_s20   ;;  %3758 = vmatprep.subr.bf16.mxu1 (!%p421_p3), %v4206_v33 }
  0x5d   : > { %s3183_s17 = sshll.u32 (!%p421_p3), %s427_s16, 8  ;;  %s5837_s3 = sld [smem:[#allocation14_spill]] (!%p421_p3) }
  0x5e   : > { %s4453_s20 = scalar_lea.vmem (!%p421_p3), [#allocation6], %s3183_s17  ;;  %s2435_s10 = sld [smem:[#allocation5 + %s4184_s22]] (!%p421_p3) }
  0x5f   : > { %v1136_v34 = vld [vmem:[%s4453_s20] sm:$0xff] (!%p421_p3)  ;;  %v1137_v35 = vld [vmem:[%s4453_s20 + $0x8] sm:$0xff] (!%p421_p3)  ;;  %v1138_v45 = vld [vmem:[%s4453_s20 + $0x10] sm:$0xff] (!%p421_p3)  ;;  %p488_p7 = scmp.lt.s32.totalorder (!%p421_p3), %s4188_s23, 2  ;;  %s5483_s17 = sld [smem:[#allocation4 + %s4184_s22]] (!%p421_p3) }
  0x60   : > { %v3711_v38 = vpack.c.bf16 (!%p421_p3), %v1137_v35, %v1136_v34  ;;  %v1139_v46 = vld [vmem:[%s4453_s20 + $0x18] sm:$0xff] (!%p421_p3)  ;;  %v1140_v48 = vld [vmem:[%s4453_s20 + $0x20] sm:$0xff] (!%p421_p3)  ;;  %v1141_v49 = vld [vmem:[%s4453_s20 + $0x28] sm:$0xff] (!%p421_p3) }
  0x61   : > { %v3714_v47 = vpack.c.bf16 (!%p421_p3), %v1139_v46, %v1138_v45  ;;  %v3717_v52 = vpack.c.bf16 (!%p421_p3), %v1141_v49, %v1140_v48  ;;  %v1142_v53 = vld [vmem:[%s4453_s20 + $0x30] sm:$0xff] (!%p421_p3)  ;;  %v1143_v54 = vld [vmem:[%s4453_s20 + $0x38] sm:$0xff] (!%p421_p3)  ;;  %v1144_v58 = vld [vmem:[%s4453_s20 + $0x40] sm:$0xff] (!%p421_p3) }
  0x62   : > { %s5856_s30 = smov (!%p477_p4, %s3186_s30), 383  ;;  %3712 = vmatpush1.bf16.msra.mxu0 %v3711_v38  ;;  %v3720_v57 = vpack.c.bf16 %v1143_v54, %v1142_v53  ;;  %v1145_v59 = vld [vmem:[%s4453_s20 + $0x48] sm:$0xff]  ;;  %v1146_v63 = vld [vmem:[%s4453_s20 + $0x50] sm:$0xff]  ;;  %v1147_v0 = vld [vmem:[%s4453_s20 + $0x58] sm:$0xff] }
  0x63   : > { %s3187_s27 = sshll.u32 %s5856_s30, 3  ;;  %3713 = vmatprep.subr.bf16.mxu0 %v4206_v33  ;;  %v3723_v62 = vpack.c.bf16 %v1145_v59, %v1144_v58  ;;  %v3726_v3 = vpack.c.bf16 %v1147_v0, %v1146_v63  ;;  %v1148_v4 = vld [vmem:[%s4453_s20 + $0x60] sm:$0xff]  ;;  %v1149_v5 = vld [vmem:[%s4453_s20 + $0x68] sm:$0xff]  ;;  %v1150_v9 = vld [vmem:[%s4453_s20 + $0x70] sm:$0xff]  ;;  %s3185_s30 = sshll.u32 %s4184_s22, 2 }
  0x64   : > { %s4451_s11 = scalar_lea.vmem %s5822_s4, %s3187_s27  ;;  %v3729_v8 = vpack.c.bf16 %v1149_v5, %v1148_v4  ;;  %v1151_v10 = vld [vmem:[%s4453_s20 + $0x78] sm:$0xff]  ;;  %v1152_v14 = vld [vmem:[%s4453_s20 + $0x80] sm:$0xff]  ;;  %v1153_v15 = vld [vmem:[%s4453_s20 + $0x88] sm:$0xff]  ;;  %s4574_s16 = scalar_lea.vmem %s5823_s5, %s3187_s27 }
  0x65   : > { %v498_v36 = vld [vmem:[%s4451_s11 + $0x10] sm:$0xff]  ;;  %v496_v37 = vld [vmem:[%s4451_s11] sm:$0xff]  ;;  %v499_v39 = vld [vmem:[%s4451_s11 + $0x18] sm:$0xff]  ;;  %v3732_v13 = vpack.c.bf16 %v1151_v10, %v1150_v9  ;;  %v3735_v18 = vpack.c.bf16 %v1153_v15, %v1152_v14  ;;  %v493_v15 = vlaneseq  ;;  %p472_p5 = scmp.lt.s32.totalorder %s3185_s30, 23  ;;  %p2436_p6 = scmp.eq.s32.totalorder %s2435_s10, 1 }
  0x66   : > { %567 = vperm.xlu1 %4050, %v498_v36   ;;  %561 = vperm.xlu0 %4049, %v496_v37   ;;  %v497_v40 = vld [vmem:[%s4451_s11 + $0x8] sm:$0xff]  ;;  %v500_v42 = vld [vmem:[%s4451_s11 + $0x20] sm:$0xff]  ;;  %v503_v43 = vld [vmem:[%s4451_s11 + $0x38] sm:$0xff]  ;;  %s5582_s27 = scalar_lea.vmem [#allocation7], %s4438_s1  ;;  %p3702_p8 = scmp.ne.s32.totalorder %s5483_s17, 1 }
  0x67   : > { %v501_v41 = vld [vmem:[%s4451_s11 + $0x28] sm:$0xff]  ;;  %v502_v44 = vld [vmem:[%s4451_s11 + $0x30] sm:$0xff]  ;;  %v504_v51 = vld [vmem:[%s4451_s11 + $0x40] sm:$0xff]  ;;  %3715 = vmatpush1.bf16.msra.mxu0 %v3714_v47  ;;  %s5858_s30 = smov (!%p472_p5, %s3185_s30), 23 }
  0x68   : > { %v505_v50 = vld [vmem:[%s4451_s11 + $0x48] sm:$0xff]  ;;  %3716 = vmatprep.subr.bf16.mxu0 %v4206_v33  ;;  %v507_v55 = vld [vmem:[%s4451_s11 + $0x58] sm:$0xff]  ;;  %v506_v56 = vld [vmem:[%s4451_s11 + $0x50] sm:$0xff]  ;;  %s4882_s28 = scalar_lea.vmem %s5837_s3, %s5858_s30 }
  0x69   : > { %v509_v60 = vld [vmem:[%s4451_s11 + $0x68] sm:$0xff]  ;;  %v508_v61 = vld [vmem:[%s4451_s11 + $0x60] sm:$0xff]  ;;  %v511_v1 = vld [vmem:[%s4451_s11 + $0x78] sm:$0xff] }
  0x6a   : > { %570 = vperm.xlu1 %4050, %v499_v39   ;;  %564 = vperm.xlu0 %4049, %v497_v40   ;;  %v510_v2 = vld [vmem:[%s4451_s11 + $0x70] sm:$0xff]  ;;  %v513_v6 = vld [vmem:[%s4451_s11 + $0x88] sm:$0xff]  ;;  %v512_v7 = vld [vmem:[%s4451_s11 + $0x80] sm:$0xff] }
  0x6b   : > { %3718 = vmatpush1.bf16.msra.mxu0 %v3717_v52  ;;  %v515_v11 = vld [vmem:[%s4451_s11 + $0x98] sm:$0xff]  ;;  %v514_v12 = vld [vmem:[%s4451_s11 + $0x90] sm:$0xff]  ;;  %v517_v16 = vld [vmem:[%s4451_s11 + $0xa8] sm:$0xff] }
  0x6c   : > { %3719 = vmatprep.subr.bf16.mxu0 %v4206_v33  ;;  %v516_v17 = vld [vmem:[%s4451_s11 + $0xa0] sm:$0xff]  ;;  %v1154_v19 = vld [vmem:[%s4453_s20 + $0x90] sm:$0xff]  ;;  %v1155_v20 = vld [vmem:[%s4453_s20 + $0x98] sm:$0xff] }
  0x6d   : > { %v519_v21 = vld [vmem:[%s4451_s11 + $0xb8] sm:$0xff]  ;;  %v518_v22 = vld [vmem:[%s4451_s11 + $0xb0] sm:$0xff]  ;;  %v3738_v23 = vpack.c.bf16 %v1155_v20, %v1154_v19  ;;  %v1156_v24 = vld [vmem:[%s4453_s20 + $0xa0] sm:$0xff] }
  0x6e   : > { %576 = vperm.xlu1 %4050, %v501_v41   ;;  %573 = vperm.xlu0 %4049, %v500_v42   ;;  %v1157_v25 = vld [vmem:[%s4453_s20 + $0xa8] sm:$0xff]  ;;  %v520_v27 = vld [vmem:[%s4451_s11 + $0xc0] sm:$0xff]  ;;  %v1158_v29 = vld [vmem:[%s4453_s20 + $0xb0] sm:$0xff] }
  0x6f   : > { %3721 = vmatpush1.bf16.msra.mxu0 %v3720_v57  ;;  %v521_v26 = vld [vmem:[%s4451_s11 + $0xc8] sm:$0xff]  ;;  %v3741_v28 = vpack.c.bf16 %v1157_v25, %v1156_v24  ;;  %v1159_v30 = vld [vmem:[%s4453_s20 + $0xb8] sm:$0xff]  ;;  %v522_v32 = vld [vmem:[%s4451_s11 + $0xd0] sm:$0xff]  ;;  %v4207_v25 = vmov 1.0  }
  0x70   : > { %3722 = vmatprep.subr.bf16.mxu0 %v4206_v33  ;;  %v523_v31 = vld [vmem:[%s4451_s11 + $0xd8] sm:$0xff]  ;;  %v3744_v34 = vpack.c.bf16 %v1159_v30, %v1158_v29  ;;  %v1160_v35 = vld [vmem:[%s4453_s20 + $0xc0] sm:$0xff]  ;;  %v1161_v36 = vld [vmem:[%s4453_s20 + $0xc8] sm:$0xff] }
  0x71   : > { %v525_v37 = vld [vmem:[%s4451_s11 + $0xe8] sm:$0xff]  ;;  %v524_v38 = vld [vmem:[%s4451_s11 + $0xe0] sm:$0xff]  ;;  %v3747_v39 = vpack.c.bf16 %v1161_v36, %v1160_v35  ;;  %v1162_v40 = vld [vmem:[%s4453_s20 + $0xd0] sm:$0xff] }
  0x72   : > { %582 = vperm.xlu1 %4050, %v503_v43   ;;  %579 = vperm.xlu0 %4049, %v502_v44   ;;  %v1163_v41 = vld [vmem:[%s4453_s20 + $0xd8] sm:$0xff]  ;;  %v526_v43 = vld [vmem:[%s4451_s11 + $0xf0] sm:$0xff]  ;;  %v1164_v45 = vld [vmem:[%s4453_s20 + $0xe0] sm:$0xff] }
  0x73   : > { %3724 = vmatpush1.bf16.msra.mxu0 %v3723_v62  ;;  %v527_v42 = vld [vmem:[%s4451_s11 + $0xf8] sm:$0xff]  ;;  %v3750_v44 = vpack.c.bf16 %v1163_v41, %v1162_v40  ;;  %v1165_v46 = vld [vmem:[%s4453_s20 + $0xe8] sm:$0xff]  ;;  %v528_v48 = vld [vmem:[%s4451_s11 + $0x100] sm:$0xff] }
  0x74   : > { %3725 = vmatprep.subr.bf16.mxu0 %v4206_v33  ;;  %v529_v47 = vld [vmem:[%s4451_s11 + $0x108] sm:$0xff]  ;;  %v3753_v49 = vpack.c.bf16 %v1165_v46, %v1164_v45  ;;  %v531_v52 = vld [vmem:[%s4451_s11 + $0x118] sm:$0xff]  ;;  %v530_v53 = vld [vmem:[%s4451_s11 + $0x110] sm:$0xff] }
  0x75   : > { %v535_v57 = vld [vmem:[%s4451_s11 + $0x138] sm:$0xff]  ;;  %v534_v58 = vld [vmem:[%s4451_s11 + $0x130] sm:$0xff]  ;;  %v537_v59 = vld [vmem:[%s4451_s11 + $0x148] sm:$0xff] }
  0x76   : > { %588 = vperm.xlu1 %4050, %v505_v50   ;;  %585 = vperm.xlu0 %4049, %v504_v51   ;;  %v1166_v50 = vld [vmem:[%s4453_s20 + $0xf0] sm:$0xff]  ;;  %v1167_v51 = vld [vmem:[%s4453_s20 + $0xf8] sm:$0xff]  ;;  %v541_v63 = vld [vmem:[%s4451_s11 + $0x168] sm:$0xff]  ;;  %s489_s20 = scalar_select %p488_p7, %s4188_s23, 2 }
  0x77   : > { %3727 = vmatpush1.bf16.msra.mxu0 %v3726_v3  ;;  %v3756_v54 = vpack.c.bf16 %v1167_v51, %v1166_v50  ;;  %v538_v62 = vld [vmem:[%s4451_s11 + $0x150] sm:$0xff]  ;;  %v540_v0 = vld [vmem:[%s4451_s11 + $0x160] sm:$0xff]  ;;  %v545_v3 = vld [vmem:[%s4451_s11 + $0x188] sm:$0xff] }
  0x78   : > { %3728 = vmatprep.subr.bf16.mxu0 %v4206_v33  ;;  %v544_v4 = vld [vmem:[%s4451_s11 + $0x180] sm:$0xff]  ;;  %v547_v5 = vld [vmem:[%s4451_s11 + $0x198] sm:$0xff]  ;;  %v550_v10 = vld [vmem:[%s4451_s11 + $0x1b0] sm:$0xff]  ;;  %s490_s30 = scalar_lea.vmem %s5825_s7, %s489_s20 }
  0x79   : > { %v551_v9 = vld [vmem:[%s4451_s11 + $0x1b8] sm:$0xff]  ;;  %v554_v14 = vld [vmem:[%s4451_s11 + $0x1d0] sm:$0xff]  ;;  %v1558_v30 = vld [vmem:[%s4574_s16 + $0x28] sm:$0xff] }
  0x7a   : > { %594 = vperm.xlu1 %4050, %v507_v55   ;;  %591 = vperm.xlu0 %4049, %v506_v56   ;;  %v533_v55 = vld [vmem:[%s4451_s11 + $0x128] sm:$0xff]  ;;  %v532_v56 = vld [vmem:[%s4451_s11 + $0x120] sm:$0xff]  ;;  %v559_v19 = vld [vmem:[%s4451_s11 + $0x1f8] sm:$0xff] }
  0x7b   : > { %3730 = vmatpush1.bf16.msra.mxu0 %v3729_v8  ;;  %v548_v8 = vld [vmem:[%s4451_s11 + $0x1a0] sm:$0xff]  ;;  %v558_v20 = vld [vmem:[%s4451_s11 + $0x1f0] sm:$0xff]  ;;  %v1564_v40 = vld [vmem:[%s4574_s16 + $0x58] sm:$0xff] }
  0x7c   : > { %3731 = vmatprep.subr.bf16.mxu0 %v4206_v33  ;;  %v1559_v35 = vld [vmem:[%s4574_s16 + $0x30] sm:$0xff]  ;;  %v1568_v46 = vld [vmem:[%s4574_s16 + $0x78] sm:$0xff]  ;;  %v1569_v50 = vld [vmem:[%s4574_s16 + $0x80] sm:$0xff] }
  0x7d   : > { %v1563_v41 = vld [vmem:[%s4574_s16 + $0x50] sm:$0xff] }
  0x7e   : > { %600 = vperm.xlu1 %4050, %v509_v60   ;;  %597 = vperm.xlu0 %4049, %v508_v61   ;;  %v536_v60 = vld [vmem:[%s4451_s11 + $0x140] sm:$0xff]  ;;  %v539_v61 = vld [vmem:[%s4451_s11 + $0x158] sm:$0xff] }
  0x7f   : > { %3733 = vmatpush1.bf16.msra.mxu0 %v3732_v13  ;;  %v555_v13 = vld [vmem:[%s4451_s11 + $0x1d8] sm:$0xff] }
  0x80   : > { %3734 = vmatprep.subr.bf16.mxu0 %v4206_v33 }
  0x82   : > { %606 = vperm.xlu1 %4050, %v511_v1   ;;  %603 = vperm.xlu0 %4049, %v510_v2   ;;  %v543_v1 = vld [vmem:[%s4451_s11 + $0x178] sm:$0xff]  ;;  %v542_v2 = vld [vmem:[%s4451_s11 + $0x170] sm:$0xff] }
  0x83   : > { %3736 = vmatpush1.bf16.msra.mxu0 %v3735_v18  ;;  %v4565_v18 = vand.u32 127, %v493_v15 }
  0x84   : > { %3737 = vmatprep.subr.bf16.mxu0 %v4206_v33 }
  0x86   : > { %612 = vperm.xlu1 %4050, %v513_v6   ;;  %609 = vperm.xlu0 %4049, %v512_v7   ;;  %v546_v6 = vld [vmem:[%s4451_s11 + $0x190] sm:$0xff]  ;;  %v549_v7 = vld [vmem:[%s4451_s11 + $0x1a8] sm:$0xff] }
  0x87   : > { %3739 = vmatpush1.bf16.msra.mxu0 %v3738_v23  ;;  %v1553_v23 = vld [vmem:[%s4574_s16] sm:$0xff] }
  0x88   : > { %3740 = vmatprep.subr.bf16.mxu0 %v4206_v33 }
  0x8a   : > { %618 = vperm.xlu1 %4050, %v515_v11   ;;  %615 = vperm.xlu0 %4049, %v514_v12   ;;  %v553_v11 = vld [vmem:[%s4451_s11 + $0x1c8] sm:$0xff]  ;;  %v552_v12 = vld [vmem:[%s4451_s11 + $0x1c0] sm:$0xff] }
  0x8b   : > { %3742 = vmatpush1.bf16.msra.mxu0 %v3741_v28 }
  0x8c   : > { %3743 = vmatprep.subr.bf16.mxu0 %v4206_v33 }
  0x8e   : > { %624 = vperm.xlu1 %4050, %v517_v16   ;;  %621 = vperm.xlu0 %4049, %v516_v17   ;;  %v557_v16 = vld [vmem:[%s4451_s11 + $0x1e8] sm:$0xff]  ;;  %v556_v17 = vld [vmem:[%s4451_s11 + $0x1e0] sm:$0xff]  ;;  %s2437_s11 = scalar_select %p2436_p6, 1, 0 }
  0x8f   : > { %3745 = vmatpush1.bf16.msra.mxu0 %v3744_v34  ;;  %v1560_v34 = vld [vmem:[%s4574_s16 + $0x38] sm:$0xff] }
  0x90   : > { %3746 = vmatprep.subr.bf16.mxu0 %v4206_v33  ;;  %s2438_s12 = scvt.s32.f32 %s2437_s11 }
  0x92   : > { %630 = vperm.xlu1 %4050, %v519_v21   ;;  %627 = vperm.xlu0 %4049, %v518_v22   ;;  %v4577_v21 = vadd.s32 128, %v4565_v18  ;;  %v1554_v22 = vld [vmem:[%s4574_s16 + $0x8] sm:$0xff] }
  0x93   : > { %3748 = vmatpush1.bf16.msra.mxu0 %v3747_v39 }
  0x94   : > { %3749 = vmatprep.subr.bf16.mxu0 %v4206_v33 }
  0x96   : > { %636 = vperm.xlu1 %4050, %v521_v26   ;;  %633 = vperm.xlu0 %4049, %v520_v27   ;;  %v1556_v26 = vld [vmem:[%s4574_s16 + $0x18] sm:$0xff]  ;;  %v1555_v27 = vld [vmem:[%s4574_s16 + $0x10] sm:$0xff] }
  0x97   : > { %3751 = vmatpush1.bf16.msra.mxu0 %v3750_v44  ;;  %v1565_v44 = vld [vmem:[%s4574_s16 + $0x60] sm:$0xff] }
  0x98   : > { %3752 = vmatprep.subr.bf16.mxu0 %v4206_v33 }
  0x9a   : > { %642 = vperm.xlu1 %4050, %v523_v31   ;;  %639 = vperm.xlu0 %4049, %v522_v32   ;;  %v1557_v31 = vld [vmem:[%s4574_s16 + $0x20] sm:$0xff] }
  0x9b   : > { %3754 = vmatpush1.bf16.msra.mxu0 %v3753_v49  ;;  %v1570_v49 = vld [vmem:[%s4574_s16 + $0x88] sm:$0xff] }
  0x9c   : > { %3755 = vmatprep.subr.bf16.mxu0 %v4206_v33 }
  0x9e   : > { %648 = vperm.xlu1 %4050, %v525_v37   ;;  %645 = vperm.xlu0 %4049, %v524_v38   ;;  %v1562_v37 = vld [vmem:[%s4574_s16 + $0x48] sm:$0xff]  ;;  %v1561_v38 = vld [vmem:[%s4574_s16 + $0x40] sm:$0xff] }
  0x9f   : > { %3757 = vmatpush1.bf16.msra.mxu0 %v3756_v54 }
  0xa2   : > { %654 = vperm.xlu1 %4050, %v527_v42   ;;  %651 = vperm.xlu0 %4049, %v526_v43   ;;  %v1566_v43 = vld [vmem:[%s4574_s16 + $0x68] sm:$0xff] }
  0xa6   : > { %660 = vperm.xlu1 %4050, %v529_v47   ;;  %657 = vperm.xlu0 %4049, %v528_v48   ;;  %v1567_v47 = vld [vmem:[%s4574_s16 + $0x70] sm:$0xff] }
  0xaa   : > { %666 = vperm.xlu1 %4050, %v531_v52   ;;  %663 = vperm.xlu0 %4049, %v530_v53   ;;  %v1572_v52 = vld [vmem:[%s4574_s16 + $0x98] sm:$0xff]  ;;  %v1571_v53 = vld [vmem:[%s4574_s16 + $0x90] sm:$0xff] }
  0xae   : > { %672 = vperm.xlu1 %4050, %v533_v55   ;;  %669 = vperm.xlu0 %4049, %v532_v56   ;;  %v1574_v55 = vld [vmem:[%s4574_s16 + $0xa8] sm:$0xff]  ;;  %v1573_v56 = vld [vmem:[%s4574_s16 + $0xa0] sm:$0xff] }
  0xb2   : > { %678 = vperm.xlu1 %4050, %v535_v57   ;;  %675 = vperm.xlu0 %4049, %v534_v58   ;;  %v1576_v58 = vld [vmem:[%s4574_s16 + $0xb8] sm:$0xff] }
  0xb6   : > { %684 = vperm.xlu1 %4050, %v537_v59   ;;  %681 = vperm.xlu0 %4049, %v536_v60   ;;  %v1575_v59 = vld [vmem:[%s4574_s16 + $0xb0] sm:$0xff] }
  0xba   : > { %690 = vperm.xlu1 %4050, %v539_v61   ;;  %687 = vperm.xlu0 %4049, %v538_v62   ;;  %v1578_v61 = vld [vmem:[%s4574_s16 + $0xc8] sm:$0xff]  ;;  %v1577_v62 = vld [vmem:[%s4574_s16 + $0xc0] sm:$0xff] }
  0xbe   : > { %696 = vperm.xlu1 %4050, %v541_v63   ;;  %693 = vperm.xlu0 %4049, %v540_v0   ;;  %v1580_v0 = vld [vmem:[%s4574_s16 + $0xd8] sm:$0xff] }
  0xc2   : > { %702 = vperm.xlu1 %4050, %v543_v1   ;;  %699 = vperm.xlu0 %4049, %v542_v2   ;;  %v1579_v1 = vld [vmem:[%s4574_s16 + $0xd0] sm:$0xff] }
  0xc6   : > { %708 = vperm.xlu1 %4050, %v545_v3   ;;  %705 = vperm.xlu0 %4049, %v544_v4   ;;  %v1582_v3 = vld [vmem:[%s4574_s16 + $0xe8] sm:$0xff]  ;;  %v1581_v4 = vld [vmem:[%s4574_s16 + $0xe0] sm:$0xff] }
  0xca   : > { %714 = vperm.xlu1 %4050, %v547_v5   ;;  %711 = vperm.xlu0 %4049, %v546_v6   ;;  %v1584_v6 = vld [vmem:[%s4574_s16 + $0xf8] sm:$0xff] }
  0xce   : > { %720 = vperm.xlu1 %4050, %v549_v7   ;;  %717 = vperm.xlu0 %4049, %v548_v8   ;;  %v1583_v7 = vld [vmem:[%s4574_s16 + $0xf0] sm:$0xff] }
  0xd2   : > { %726 = vperm.xlu1 %4050, %v551_v9   ;;  %723 = vperm.xlu0 %4049, %v550_v10   ;;  %v1586_v9 = vld [vmem:[%s4574_s16 + $0x108] sm:$0xff]  ;;  %v1585_v10 = vld [vmem:[%s4574_s16 + $0x100] sm:$0xff] }
  0xd6   : > { %732 = vperm.xlu1 %4050, %v553_v11   ;;  %729 = vperm.xlu0 %4049, %v552_v12   ;;  %v1588_v12 = vld [vmem:[%s4574_s16 + $0x118] sm:$0xff] }
  0xda   : > { %738 = vperm.xlu1 %4050, %v555_v13   ;;  %735 = vperm.xlu0 %4049, %v554_v14   ;;  %v1587_v13 = vld [vmem:[%s4574_s16 + $0x110] sm:$0xff] }
  0xde   : > { %744 = vperm.xlu1 %4050, %v557_v16   ;;  %741 = vperm.xlu0 %4049, %v556_v17   ;;  %v1590_v16 = vld [vmem:[%s4574_s16 + $0x128] sm:$0xff]  ;;  %v1589_v17 = vld [vmem:[%s4574_s16 + $0x120] sm:$0xff] }
  0xe2   : > { %750 = vperm.xlu1 %4050, %v559_v19   ;;  %747 = vperm.xlu0 %4049, %v558_v20   ;;  %v1592_v20 = vld [vmem:[%s4574_s16 + $0x138] sm:$0xff] }
  0xe5   : > { %v562_v24 = vpop.permute.xlu0 %561  ;;  %v568_v28 = vpop.permute.xlu1 %567 }
  0xe6   : > { %1624 = vperm.xlu1 %4050, %v1554_v22   ;;  %1619 = vperm.xlu0 %4049, %v1553_v23   ;;  %vm753_vm0 = vcmp.eq.s32.totalorder %v562_v24, %v4577_v21  ;;  %vm752_vm1 = vcmp.eq.s32.totalorder %v562_v24, %v4565_v18  ;;  %vm757_vm4 = vcmp.eq.s32.totalorder %v568_v28, %v4577_v21  ;;  %v1591_v22 = vld [vmem:[%s4574_s16 + $0x130] sm:$0xff]  ;;  %v1594_v24 = vld [vmem:[%s4574_s16 + $0x148] sm:$0xff] }
  0xe7   : > { %3318 = vmatprep.mubr.msk.f32.mxu0 %vm753_vm0, %v4207_v25  ;;  %vm756_vm5 = vcmp.eq.s32.totalorder %v568_v28, %v4565_v18  ;;  %v1596_v28 = vld [vmem:[%s4574_s16 + $0x158] sm:$0xff] }
  0xe8   : > { %3319 = vmatmul.mubr.msk.f32.vlgmr.msra.gmra.mrb[0].mxu0 %vm752_vm1, %v4207_v25 }
  0xe9   : > { %v565_v29 = vpop.permute.xlu0 %564  ;;  %v571_v32 = vpop.permute.xlu1 %570 }
  0xea   : > { %1634 = vperm.xlu1 %4050, %v1556_v26   ;;  %1629 = vperm.xlu0 %4049, %v1555_v27   ;;  %vm755_vm2 = vcmp.eq.s32.totalorder %v565_v29, %v4577_v21  ;;  %vm754_vm3 = vcmp.eq.s32.totalorder %v565_v29, %v4565_v18  ;;  %vm759_vm6 = vcmp.eq.s32.totalorder %v571_v32, %v4577_v21  ;;  %v1593_v26 = vld [vmem:[%s4574_s16 + $0x140] sm:$0xff]  ;;  %v1595_v29 = vld [vmem:[%s4574_s16 + $0x150] sm:$0xff] }
  0xeb   : > { %3320 = vmatprep.mubr.msk.f32.mxu0 %vm755_vm2, %v4207_v25  ;;  %vm758_vm7 = vcmp.eq.s32.totalorder %v571_v32, %v4565_v18  ;;  %v1597_v32 = vld [vmem:[%s4574_s16 + $0x160] sm:$0xff] }
  0xec   : > { %3321 = vmatmul.mubr.msk.f32.gmra.mrb[2].mxu0 %vm754_vm3, %v4207_v25 }
  0xed   : > { %3322 = vmatprep.mubr.msk.f32.mxu0 %vm757_vm4, %v4207_v25  ;;  %v574_v36 = vpop.permute.xlu0 %573  ;;  %v577_v39 = vpop.permute.xlu1 %576 }
  0xee   : > { %1644 = vperm.xlu1 %4050, %v1558_v30   ;;  %1639 = vperm.xlu0 %4049, %v1557_v31   ;;  %vm761_vm8 = vcmp.eq.s32.totalorder %v574_v36, %v4577_v21  ;;  %vm760_vm9 = vcmp.eq.s32.totalorder %v574_v36, %v4565_v18  ;;  %vm763_vm10 = vcmp.eq.s32.totalorder %v577_v39, %v4577_v21  ;;  %v1598_v31 = vld [vmem:[%s4574_s16 + $0x168] sm:$0xff]  ;;  %v1599_v36 = vld [vmem:[%s4574_s16 + $0x170] sm:$0xff] }
  0xef   : > { %vm762_vm11 = vcmp.eq.s32.totalorder %v577_v39, %v4565_v18  ;;  %v1601_v39 = vld [vmem:[%s4574_s16 + $0x180] sm:$0xff] }
  0xf0   : > { %3323 = vmatmul.mubr.msk.f32.gmra.mrb[4].mxu0 %vm756_vm5, %v4207_v25 }
  0xf1   : > { %3324 = vmatprep.mubr.msk.f32.mxu0 %vm759_vm6, %v4207_v25  ;;  %v580_v42 = vpop.permute.xlu0 %579  ;;  %v583_v45 = vpop.permute.xlu1 %582 }
  0xf2   : > { %1654 = vperm.xlu1 %4050, %v1560_v34   ;;  %1649 = vperm.xlu0 %4049, %v1559_v35   ;;  %vm765_vm12 = vcmp.eq.s32.totalorder %v580_v42, %v4577_v21  ;;  %vm764_vm13 = vcmp.eq.s32.totalorder %v580_v42, %v4565_v18  ;;  %vm767_vm14 = vcmp.eq.s32.totalorder %v583_v45, %v4577_v21  ;;  %v1600_v35 = vld [vmem:[%s4574_s16 + $0x178] sm:$0xff]  ;;  %v1603_v42 = vld [vmem:[%s4574_s16 + $0x190] sm:$0xff] }
  0xf3   : > { %vm766_vm15 = vcmp.eq.s32.totalorder %v583_v45, %v4565_v18 }
  0xf4   : > { %3325 = vmatmul.mubr.msk.f32.gmra.mrb[6].mxu0 %vm758_vm7, %v4207_v25 }
  0xf5   : > { %3326 = vmatprep.mubr.msk.f32.mxu0 %vm761_vm8, %v4207_v25  ;;  %v586_v48 = vpop.permute.xlu0 %585  ;;  %v589_v51 = vpop.permute.xlu1 %588 }
  0xf6   : > { %1664 = vperm.xlu1 %4050, %v1562_v37   ;;  %1659 = vperm.xlu0 %4049, %v1561_v38   ;;  %vm769_vm0 = vcmp.eq.s32.totalorder %v586_v48, %v4577_v21  ;;  %vm768_vm1 = vcmp.eq.s32.totalorder %v586_v48, %v4565_v18  ;;  %vm771_vm2 = vcmp.eq.s32.totalorder %v589_v51, %v4577_v21  ;;  %v1602_v38 = vld [vmem:[%s4574_s16 + $0x188] sm:$0xff]  ;;  %v1607_v48 = vld [vmem:[%s4574_s16 + $0x1b0] sm:$0xff] }
  0xf7   : > { %vm770_vm3 = vcmp.eq.s32.totalorder %v589_v51, %v4565_v18  ;;  %v1610_v51 = vld [vmem:[%s4574_s16 + $0x1c8] sm:$0xff] }
  0xf8   : > { %3327 = vmatmul.mubr.msk.f32.gmra.mrb[8].mxu0 %vm760_vm9, %v4207_v25 }
  0xf9   : > { %3328 = vmatprep.mubr.msk.f32.mxu0 %vm763_vm10, %v4207_v25  ;;  %v592_v54 = vpop.permute.xlu0 %591  ;;  %v595_v57 = vpop.permute.xlu1 %594 }
  0xfa   : > { %1674 = vperm.xlu1 %4050, %v1564_v40   ;;  %1669 = vperm.xlu0 %4049, %v1563_v41   ;;  %vm773_vm4 = vcmp.eq.s32.totalorder %v592_v54, %v4577_v21  ;;  %vm772_vm5 = vcmp.eq.s32.totalorder %v592_v54, %v4565_v18  ;;  %vm775_vm6 = vcmp.eq.s32.totalorder %v595_v57, %v4577_v21  ;;  %v1604_v41 = vld [vmem:[%s4574_s16 + $0x198] sm:$0xff] }
  0xfb   : > { %vm774_vm7 = vcmp.eq.s32.totalorder %v595_v57, %v4565_v18  ;;  %v1614_v57 = vld [vmem:[%s4574_s16 + $0x1e8] sm:$0xff] }
  0xfc   : > { %3329 = vmatmul.mubr.msk.f32.gmra.mrb[10].mxu0 %vm762_vm11, %v4207_v25 }
  0xfd   : > { %3330 = vmatprep.mubr.msk.f32.mxu0 %vm765_vm12, %v4207_v25  ;;  %v598_v60 = vpop.permute.xlu0 %597  ;;  %v601_v63 = vpop.permute.xlu1 %600 }
  0xfe   : > { %1684 = vperm.xlu1 %4050, %v1566_v43   ;;  %1679 = vperm.xlu0 %4049, %v1565_v44   ;;  %vm777_vm8 = vcmp.eq.s32.totalorder %v598_v60, %v4577_v21  ;;  %vm776_vm9 = vcmp.eq.s32.totalorder %v598_v60, %v4565_v18  ;;  %vm779_vm10 = vcmp.eq.s32.totalorder %v601_v63, %v4577_v21  ;;  %v1606_v44 = vld [vmem:[%s4574_s16 + $0x1a8] sm:$0xff] }
  0xff   : > { %vm778_vm11 = vcmp.eq.s32.totalorder %v601_v63, %v4565_v18 }
 0x100   : > { %3331 = vmatmul.mubr.msk.f32.gmra.mrb[12].mxu0 %vm764_vm13, %v4207_v25 }
 0x101   : > { %3332 = vmatprep.mubr.msk.f32.mxu0 %vm767_vm14, %v4207_v25  ;;  %v604_v2 = vpop.permute.xlu0 %603  ;;  %v607_v5 = vpop.permute.xlu1 %606 }
 0x102   : > { %1694 = vperm.xlu1 %4050, %v1568_v46   ;;  %1689 = vperm.xlu0 %4049, %v1567_v47   ;;  %vm781_vm12 = vcmp.eq.s32.totalorder %v604_v2, %v4577_v21  ;;  %vm780_vm13 = vcmp.eq.s32.totalorder %v604_v2, %v4565_v18  ;;  %vm783_vm14 = vcmp.eq.s32.totalorder %v607_v5, %v4577_v21  ;;  %v1605_v46 = vld [vmem:[%s4574_s16 + $0x1a0] sm:$0xff]  ;;  %v1608_v47 = vld [vmem:[%s4574_s16 + $0x1b8] sm:$0xff] }
 0x104   : > { %3333 = vmatmul.mubr.msk.f32.gmra.mrb[14].mxu0 %vm766_vm15, %v4207_v25  ;;  %vm782_vm15 = vcmp.eq.s32.totalorder %v607_v5, %v4565_v18 }
 0x105   : > { %3334 = vmatprep.mubr.msk.f32.mxu0 %vm769_vm0, %v4207_v25  ;;  %v610_v8 = vpop.permute.xlu0 %609  ;;  %v613_v11 = vpop.permute.xlu1 %612 }
 0x106   : > { %1704 = vperm.xlu1 %4050, %v1570_v49   ;;  %1699 = vperm.xlu0 %4049, %v1569_v50   ;;  %vm785_vm0 = vcmp.eq.s32.totalorder %v610_v8, %v4577_v21 }
 0x108   : > { %3335 = vmatmul.mubr.msk.f32.gmra.mrb[16].mxu0 %vm768_vm1, %v4207_v25  ;;  %vm784_vm1 = vcmp.eq.s32.totalorder %v610_v8, %v4565_v18 }
 0x109   : > { %3336 = vmatprep.mubr.msk.f32.mxu0 %vm771_vm2, %v4207_v25  ;;  %vm787_vm2 = vcmp.eq.s32.totalorder %v613_v11, %v4577_v21  ;;  %v616_v14 = vpop.permute.xlu0 %615  ;;  %v619_v19 = vpop.permute.xlu1 %618 }
 0x10a   : > { %1714 = vperm.xlu1 %4050, %v1572_v52   ;;  %1709 = vperm.xlu0 %4049, %v1571_v53   ;;  %v1609_v52 = vld [vmem:[%s4574_s16 + $0x1c0] sm:$0xff]  ;;  %v1612_v53 = vld [vmem:[%s4574_s16 + $0x1d8] sm:$0xff] }
 0x10c   : > { %3337 = vmatmul.mubr.msk.f32.gmra.mrb[18].mxu0 %vm770_vm3, %v4207_v25  ;;  %vm786_vm3 = vcmp.eq.s32.totalorder %v613_v11, %v4565_v18 }
 0x10d   : > { %3338 = vmatprep.mubr.msk.f32.mxu0 %vm773_vm4, %v4207_v25  ;;  %vm789_vm4 = vcmp.eq.s32.totalorder %v616_v14, %v4577_v21  ;;  %v622_v23 = vpop.permute.xlu0 %621  ;;  %v625_v27 = vpop.permute.xlu1 %624 }
 0x10e   : > { %1724 = vperm.xlu1 %4050, %v1574_v55   ;;  %1719 = vperm.xlu0 %4049, %v1573_v56   ;;  %v1611_v55 = vld [vmem:[%s4574_s16 + $0x1d0] sm:$0xff] }
 0x110   : > { %3339 = vmatmul.mubr.msk.f32.gmra.mrb[20].mxu0 %vm772_vm5, %v4207_v25  ;;  %vm788_vm5 = vcmp.eq.s32.totalorder %v616_v14, %v4565_v18 }
 0x111   : > { %3340 = vmatprep.mubr.msk.f32.mxu0 %vm775_vm6, %v4207_v25  ;;  %vm791_vm6 = vcmp.eq.s32.totalorder %v619_v19, %v4577_v21  ;;  %v628_v30 = vpop.permute.xlu0 %627  ;;  %v631_v34 = vpop.permute.xlu1 %630 }
 0x112   : > { %1734 = vperm.xlu1 %4050, %v1576_v58   ;;  %1729 = vperm.xlu0 %4049, %v1575_v59   ;;  %v1613_v58 = vld [vmem:[%s4574_s16 + $0x1e0] sm:$0xff] }
 0x114   : > { %3341 = vmatmul.mubr.msk.f32.gmra.mrb[22].mxu0 %vm774_vm7, %v4207_v25  ;;  %vm790_vm7 = vcmp.eq.s32.totalorder %v619_v19, %v4565_v18 }
 0x115   : > { %3342 = vmatprep.mubr.msk.f32.mxu0 %vm777_vm8, %v4207_v25  ;;  %vm793_vm8 = vcmp.eq.s32.totalorder %v622_v23, %v4577_v21  ;;  %v634_v37 = vpop.permute.xlu0 %633  ;;  %v637_v40 = vpop.permute.xlu1 %636 }
 0x116   : > { %1744 = vperm.xlu1 %4050, %v1578_v61   ;;  %1739 = vperm.xlu0 %4049, %v1577_v62   ;;  %v1616_v61 = vld [vmem:[%s4574_s16 + $0x1f8] sm:$0xff]  ;;  %v1615_v62 = vld [vmem:[%s4574_s16 + $0x1f0] sm:$0xff] }
 0x118   : > { %3343 = vmatmul.mubr.msk.f32.gmra.mrb[24].mxu0 %vm776_vm9, %v4207_v25  ;;  %vm792_vm9 = vcmp.eq.s32.totalorder %v622_v23, %v4565_v18 }
 0x119   : > { %3344 = vmatprep.mubr.msk.f32.mxu0 %vm779_vm10, %v4207_v25  ;;  %vm795_vm10 = vcmp.eq.s32.totalorder %v625_v27, %v4577_v21  ;;  %v640_v43 = vpop.permute.xlu0 %639  ;;  %v643_v45 = vpop.permute.xlu1 %642 }
 0x11a   : > { %1754 = vperm.xlu1 %4050, %v1580_v0   ;;  %1749 = vperm.xlu0 %4049, %v1579_v1  }
 0x11c   : > { %3345 = vmatmul.mubr.msk.f32.gmra.mrb[26].mxu0 %vm778_vm11, %v4207_v25  ;;  %vm794_vm11 = vcmp.eq.s32.totalorder %v625_v27, %v4565_v18 }
 0x11d   : > { %3346 = vmatprep.mubr.msk.f32.mxu0 %vm781_vm12, %v4207_v25  ;;  %vm797_vm12 = vcmp.eq.s32.totalorder %v628_v30, %v4577_v21  ;;  %v646_v49 = vpop.permute.xlu0 %645  ;;  %v649_v50 = vpop.permute.xlu1 %648 }
 0x11e   : > { %1764 = vperm.xlu1 %4050, %v1582_v3   ;;  %1759 = vperm.xlu0 %4049, %v1581_v4  }
 0x120   : > { %3347 = vmatmul.mubr.msk.f32.gmra.mrb[28].mxu0 %vm780_vm13, %v4207_v25  ;;  %vm796_vm13 = vcmp.eq.s32.totalorder %v628_v30, %v4565_v18 }
 0x121   : > { %3348 = vmatprep.mubr.msk.f32.mxu0 %vm783_vm14, %v4207_v25  ;;  %vm799_vm14 = vcmp.eq.s32.totalorder %v631_v34, %v4577_v21  ;;  %v655_v54 = vpop.permute.xlu1 %654  ;;  %v652_v56 = vpop.permute.xlu0 %651 }
 0x122   : > { %1774 = vperm.xlu1 %4050, %v1584_v6   ;;  %1769 = vperm.xlu0 %4049, %v1583_v7  }
 0x124   : > { %3349 = vmatmul.mubr.msk.f32.gmra.mrb[30].mxu0 %vm782_vm15, %v4207_v25  ;;  %vm798_vm15 = vcmp.eq.s32.totalorder %v631_v34, %v4565_v18 }
 0x125   : > { %3350 = vmatprep.mubr.msk.f32.mxu0 %vm785_vm0, %v4207_v25  ;;  %vm801_vm0 = vcmp.eq.s32.totalorder %v634_v37, %v4577_v21  ;;  %v661_v59 = vpop.permute.xlu1 %660  ;;  %v658_v60 = vpop.permute.xlu0 %657 }
 0x126   : > { %1784 = vperm.xlu1 %4050, %v1586_v9   ;;  %1779 = vperm.xlu0 %4049, %v1585_v10  }
 0x128   : > { %3351 = vmatmul.mubr.msk.f32.gmra.mrb[32].mxu0 %vm784_vm1, %v4207_v25  ;;  %vm800_vm1 = vcmp.eq.s32.totalorder %v634_v37, %v4565_v18  ;;  %v4887_v37 = vld [vmem:[%s4882_s28] sm:$0xf] }
 0x129   : > { %3352 = vmatprep.mubr.msk.f32.mxu0 %vm787_vm2, %v4207_v25  ;;  %vm803_vm2 = vcmp.eq.s32.totalorder %v637_v40, %v4577_v21  ;;  %v667_v63 = vpop.permute.xlu1 %666  ;;  %v664_v0 = vpop.permute.xlu0 %663 }
 0x12a   : > { %1794 = vperm.xlu1 %4050, %v1588_v12   ;;  %1789 = vperm.xlu0 %4049, %v1587_v13  }
 0x12c   : > { %3353 = vmatmul.mubr.msk.f32.gmra.mrb[34].mxu0 %vm786_vm3, %v4207_v25  ;;  %vm802_vm3 = vcmp.eq.s32.totalorder %v637_v40, %v4565_v18 }
 0x12d   : > { %3354 = vmatprep.mubr.msk.f32.mxu0 %vm789_vm4, %v4207_v25  ;;  %vm805_vm4 = vcmp.eq.s32.totalorder %v640_v43, %v4577_v21  ;;  %v673_v1 = vpop.permute.xlu1 %672  ;;  %v670_v2 = vpop.permute.xlu0 %669 }
 0x12e   : > { %1804 = vperm.xlu1 %4050, %v1590_v16   ;;  %1799 = vperm.xlu0 %4049, %v1589_v17  }
 0x130   : > { %3355 = vmatmul.mubr.msk.f32.gmra.mrb[36].mxu0 %vm788_vm5, %v4207_v25  ;;  %vm804_vm5 = vcmp.eq.s32.totalorder %v640_v43, %v4565_v18 }
 0x131   : > { %3356 = vmatprep.mubr.msk.f32.mxu0 %vm791_vm6, %v4207_v25  ;;  %vm807_vm6 = vcmp.eq.s32.totalorder %v643_v45, %v4577_v21  ;;  %v679_v3 = vpop.permute.xlu1 %678  ;;  %v676_v4 = vpop.permute.xlu0 %675 }
 0x132   : > { %1814 = vperm.xlu1 %4050, %v1592_v20   ;;  %1809 = vperm.xlu0 %4049, %v1591_v22  }
 0x134   : > { %3357 = vmatmul.mubr.msk.f32.gmra.mrb[38].mxu0 %vm790_vm7, %v4207_v25  ;;  %vm806_vm7 = vcmp.eq.s32.totalorder %v643_v45, %v4565_v18 }
 0x135   : > { %3358 = vmatprep.mubr.msk.f32.mxu0 %vm793_vm8, %v4207_v25  ;;  %vm809_vm8 = vcmp.eq.s32.totalorder %v646_v49, %v4577_v21  ;;  %v685_v5 = vpop.permute.xlu1 %684  ;;  %v682_v6 = vpop.permute.xlu0 %681 }
 0x136   : > { %1824 = vperm.xlu1 %4050, %v1594_v24   ;;  %1819 = vperm.xlu0 %4049, %v1593_v26  }
 0x138   : > { %3359 = vmatmul.mubr.msk.f32.gmra.mrb[40].mxu0 %vm792_vm9, %v4207_v25  ;;  %vm808_vm9 = vcmp.eq.s32.totalorder %v646_v49, %v4565_v18 }
 0x139   : > { %3360 = vmatprep.mubr.msk.f32.mxu0 %vm795_vm10, %v4207_v25  ;;  %vm811_vm10 = vcmp.eq.s32.totalorder %v649_v50, %v4577_v21  ;;  %v691_v7 = vpop.permute.xlu1 %690  ;;  %v688_v8 = vpop.permute.xlu0 %687 }
 0x13a   : > { %1834 = vperm.xlu1 %4050, %v1596_v28   ;;  %1829 = vperm.xlu0 %4049, %v1595_v29  }
 0x13c   : > { %3361 = vmatmul.mubr.msk.f32.gmra.mrb[42].mxu0 %vm794_vm11, %v4207_v25  ;;  %vm810_vm11 = vcmp.eq.s32.totalorder %v649_v50, %v4565_v18 }
 0x13d   : > { %3362 = vmatprep.mubr.msk.f32.mxu0 %vm797_vm12, %v4207_v25  ;;  %vm813_vm12 = vcmp.eq.s32.totalorder %v652_v56, %v4577_v21  ;;  %v697_v9 = vpop.permute.xlu1 %696  ;;  %v694_v10 = vpop.permute.xlu0 %693 }
 0x13e   : > { %1844 = vperm.xlu1 %4050, %v1598_v31   ;;  %1839 = vperm.xlu0 %4049, %v1597_v32   ;;  %v4874_v32 = vshrl.u32 %v493_v15, 7 }
 0x140   : > { %3363 = vmatmul.mubr.msk.f32.gmra.mrb[44].mxu0 %vm796_vm13, %v4207_v25  ;;  %vm812_vm13 = vcmp.eq.s32.totalorder %v652_v56, %v4565_v18 }
 0x141   : > { %3364 = vmatprep.mubr.msk.f32.mxu0 %vm799_vm14, %v4207_v25  ;;  %vm815_vm14 = vcmp.eq.s32.totalorder %v655_v54, %v4577_v21  ;;  %v703_v11 = vpop.permute.xlu1 %702  ;;  %v700_v12 = vpop.permute.xlu0 %699 }
 0x142   : > { %1854 = vperm.xlu1 %4050, %v1600_v35   ;;  %1849 = vperm.xlu0 %4049, %v1599_v36   ;;  %v2041_v35 = vsub.s32 1, %v4874_v32 }
 0x144   : > { %3365 = vmatmul.mubr.msk.f32.gmra.mrb[46].mxu0 %vm798_vm15, %v4207_v25  ;;  %vm814_vm15 = vcmp.eq.s32.totalorder %v655_v54, %v4565_v18 }
 0x145   : > { %3366 = vmatprep.mubr.msk.f32.mxu0 %vm801_vm0, %v4207_v25  ;;  %vm817_vm0 = vcmp.eq.s32.totalorder %v658_v60, %v4577_v21  ;;  %v709_v13 = vpop.permute.xlu1 %708  ;;  %v706_v14 = vpop.permute.xlu0 %705 }
 0x146   : > { %1864 = vperm.xlu1 %4050, %v1602_v38   ;;  %1859 = vperm.xlu0 %4049, %v1601_v39   ;;  %v4892_v38 = vrot.slane %v4887_v37, %v2041_v35 }
 0x148   : > { %3367 = vmatmul.mubr.msk.f32.gmra.mrb[48].mxu0 %vm800_vm1, %v4207_v25  ;;  %vm816_vm1 = vcmp.eq.s32.totalorder %v658_v60, %v4565_v18 }
 0x149   : > { %3368 = vmatprep.mubr.msk.f32.mxu0 %vm803_vm2, %v4207_v25  ;;  %vm819_vm2 = vcmp.eq.s32.totalorder %v661_v59, %v4577_v21  ;;  %v715_v16 = vpop.permute.xlu1 %714  ;;  %v712_v17 = vpop.permute.xlu0 %711 }
 0x14a   : > { %1874 = vperm.xlu1 %4050, %v1604_v41   ;;  %1869 = vperm.xlu0 %4049, %v1603_v42  }
 0x14c   : > { %3369 = vmatmul.mubr.msk.f32.gmra.mrb[50].mxu0 %vm802_vm3, %v4207_v25  ;;  %vm818_vm3 = vcmp.eq.s32.totalorder %v661_v59, %v4565_v18 }
 0x14d   : > { %3370 = vmatprep.mubr.msk.f32.mxu0 %vm805_vm4, %v4207_v25  ;;  %vm821_vm4 = vcmp.eq.s32.totalorder %v664_v0, %v4577_v21  ;;  %v721_v19 = vpop.permute.xlu1 %720  ;;  %v718_v20 = vpop.permute.xlu0 %717 }
 0x14e   : > { %1884 = vperm.xlu1 %4050, %v1606_v44   ;;  %1879 = vperm.xlu0 %4049, %v1605_v46  }
 0x150   : > { %3371 = vmatmul.mubr.msk.f32.gmra.mrb[52].mxu0 %vm804_vm5, %v4207_v25  ;;  %vm820_vm5 = vcmp.eq.s32.totalorder %v664_v0, %v4565_v18 }
 0x151   : > { %3372 = vmatprep.mubr.msk.f32.mxu0 %vm807_vm6, %v4207_v25  ;;  %vm823_vm6 = vcmp.eq.s32.totalorder %v667_v63, %v4577_v21  ;;  %v4831_v22 = vpop.permute.xlu1 %726  ;;  %v724_v23 = vpop.permute.xlu0 %723 }
 0x152   : > { %1894 = vperm.xlu1 %4050, %v1608_v47   ;;  %1889 = vperm.xlu0 %4049, %v1607_v48  }
 0x154   : > { %3373 = vmatmul.mubr.msk.f32.gmra.mrb[54].mxu0 %vm806_vm7, %v4207_v25  ;;  %vm822_vm7 = vcmp.eq.s32.totalorder %v667_v63, %v4565_v18 }
 0x155   : > { %3374 = vmatprep.mubr.msk.f32.mxu0 %vm809_vm8, %v4207_v25  ;;  %vm825_vm8 = vcmp.eq.s32.totalorder %v670_v2, %v4577_v21  ;;  %v4839_v24 = vpop.permute.xlu1 %732  ;;  %v4842_v26 = vpop.permute.xlu0 %729 }
 0x156   : > { %1904 = vperm.xlu1 %4050, %v1610_v51   ;;  %1899 = vperm.xlu0 %4049, %v1609_v52  }
 0x158   : > { %3375 = vmatmul.mubr.msk.f32.gmra.mrb[56].mxu0 %vm808_vm9, %v4207_v25  ;;  %vm824_vm9 = vcmp.eq.s32.totalorder %v670_v2, %v4565_v18 }
 0x159   : > { %3376 = vmatprep.mubr.msk.f32.mxu0 %vm811_vm10, %v4207_v25  ;;  %vm827_vm10 = vcmp.eq.s32.totalorder %v673_v1, %v4577_v21  ;;  %v4849_v27 = vpop.permute.xlu1 %738  ;;  %v4852_v28 = vpop.permute.xlu0 %735 }
 0x15a   : > { %1914 = vperm.xlu1 %4050, %v1612_v53   ;;  %1909 = vperm.xlu0 %4049, %v1611_v55  }
 0x15c   : > { %3377 = vmatmul.mubr.msk.f32.gmra.mrb[58].mxu0 %vm810_vm11, %v4207_v25  ;;  %vm826_vm11 = vcmp.eq.s32.totalorder %v673_v1, %v4565_v18 }
 0x15d   : > { %3378 = vmatprep.mubr.msk.f32.mxu0 %vm813_vm12, %v4207_v25  ;;  %vm829_vm12 = vcmp.eq.s32.totalorder %v676_v4, %v4577_v21  ;;  %v4859_v29 = vpop.permute.xlu1 %744  ;;  %v4862_v30 = vpop.permute.xlu0 %741 }
 0x15e   : > { %1924 = vperm.xlu1 %4050, %v1614_v57   ;;  %1919 = vperm.xlu0 %4049, %v1613_v58  }
 0x160   : > { %3379 = vmatmul.mubr.msk.f32.gmra.mrb[60].mxu0 %vm812_vm13, %v4207_v25  ;;  %vm828_vm13 = vcmp.eq.s32.totalorder %v676_v4, %v4565_v18 }
 0x161   : > { %3380 = vmatprep.mubr.msk.f32.mxu0 %vm815_vm14, %v4207_v25  ;;  %vm831_vm14 = vcmp.eq.s32.totalorder %v679_v3, %v4577_v21  ;;  %v4870_v31 = vpop.permute.xlu1 %750  ;;  %v4876_v34 = vpop.permute.xlu0 %747 }
 0x162   : > { %1934 = vperm.xlu1 %4050, %v1616_v61   ;;  %1929 = vperm.xlu0 %4049, %v1615_v62  }
 0x164   : > { %3381 = vmatmul.mubr.msk.f32.gmra.mrb[62].mxu0 %vm814_vm15, %v4207_v25  ;;  %vm830_vm15 = vcmp.eq.s32.totalorder %v679_v3, %v4565_v18 }
 0x165   : > { %3382 = vmatprep.mubr.msk.f32.mxu0 %vm817_vm0, %v4207_v25  ;;  %vm833_vm0 = vcmp.eq.s32.totalorder %v682_v6, %v4577_v21  ;;  %v1625_v39 = vpop.permute.xlu1 %1624  ;;  %v1620_v40 = vpop.permute.xlu0 %1619 }
 0x168   : > { %3383 = vmatmul.mubr.msk.f32.gmra.mrb[64].mxu0 %vm816_vm1, %v4207_v25  ;;  %vm832_vm1 = vcmp.eq.s32.totalorder %v682_v6, %v4565_v18 }
 0x169   : > { %3384 = vmatprep.mubr.msk.f32.mxu0 %vm819_vm2, %v4207_v25  ;;  %vm835_vm2 = vcmp.eq.s32.totalorder %v685_v5, %v4577_v21  ;;  %v1635_v48 = vpop.permute.xlu1 %1634  ;;  %v1630_v49 = vpop.permute.xlu0 %1629 }
 0x16c   : > { %3385 = vmatmul.mubr.msk.f32.gmra.mrb[66].mxu0 %vm818_vm3, %v4207_v25  ;;  %vm834_vm3 = vcmp.eq.s32.totalorder %v685_v5, %v4565_v18 }
 0x16d   : > { %3386 = vmatprep.mubr.msk.f32.mxu0 %vm821_vm4, %v4207_v25  ;;  %vm837_vm4 = vcmp.eq.s32.totalorder %v688_v8, %v4577_v21  ;;  %v1645_v57 = vpop.permute.xlu1 %1644  ;;  %v1640_v58 = vpop.permute.xlu0 %1639 }
 0x170   : > { %3387 = vmatmul.mubr.msk.f32.gmra.mrb[68].mxu0 %vm820_vm5, %v4207_v25  ;;  %vm836_vm5 = vcmp.eq.s32.totalorder %v688_v8, %v4565_v18 }
 0x171   : > { %3388 = vmatprep.mubr.msk.f32.mxu0 %vm823_vm6, %v4207_v25  ;;  %vm839_vm6 = vcmp.eq.s32.totalorder %v691_v7, %v4577_v21  ;;  %v1655_v2 = vpop.permute.xlu1 %1654  ;;  %v1650_v3 = vpop.permute.xlu0 %1649 }
 0x174   : > { %3389 = vmatmul.mubr.msk.f32.gmra.mrb[70].mxu0 %vm822_vm7, %v4207_v25  ;;  %vm838_vm7 = vcmp.eq.s32.totalorder %v691_v7, %v4565_v18 }
 0x175   : > { %3390 = vmatprep.mubr.msk.f32.mxu0 %vm825_vm8, %v4207_v25  ;;  %vm841_vm8 = vcmp.eq.s32.totalorder %v694_v10, %v4577_v21 }
 0x178   : > { %3391 = vmatmul.mubr.msk.f32.gmra.mrb[72].mxu0 %vm824_vm9, %v4207_v25  ;;  %vm840_vm9 = vcmp.eq.s32.totalorder %v694_v10, %v4565_v18 }
 0x179   : > { %3392 = vmatprep.mubr.msk.f32.mxu0 %vm827_vm10, %v4207_v25  ;;  %vm843_vm10 = vcmp.eq.s32.totalorder %v697_v9, %v4577_v21 }
 0x17c   : > { %3393 = vmatmul.mubr.msk.f32.gmra.mrb[74].mxu0 %vm826_vm11, %v4207_v25  ;;  %vm842_vm11 = vcmp.eq.s32.totalorder %v697_v9, %v4565_v18 }
 0x17d   : > { %3394 = vmatprep.mubr.msk.f32.mxu0 %vm829_vm12, %v4207_v25  ;;  %vm845_vm12 = vcmp.eq.s32.totalorder %v700_v12, %v4577_v21 }
 0x180   : > { %3395 = vmatmul.mubr.msk.f32.gmra.mrb[76].mxu0 %vm828_vm13, %v4207_v25  ;;  %vm844_vm13 = vcmp.eq.s32.totalorder %v700_v12, %v4565_v18  ;;  %v1660_v12 = vpop.permute.xlu0 %1659 }
 0x181   : > { %3396 = vmatprep.mubr.msk.f32.mxu0 %vm831_vm14, %v4207_v25  ;;  %vm847_vm14 = vcmp.eq.s32.totalorder %v703_v11, %v4577_v21 }
 0x184   : > { %3397 = vmatmul.mubr.msk.f32.gmra.mrb[78].mxu0 %vm830_vm15, %v4207_v25  ;;  %vm846_vm15 = vcmp.eq.s32.totalorder %v703_v11, %v4565_v18  ;;  %v1665_v11 = vpop.permute.xlu1 %1664 }
 0x185   : > { %3398 = vmatprep.mubr.msk.f32.mxu0 %vm833_vm0, %v4207_v25  ;;  %vm849_vm0 = vcmp.eq.s32.totalorder %v706_v14, %v4577_v21 }
 0x188   : > { %3399 = vmatmul.mubr.msk.f32.gmra.mrb[80].mxu0 %vm832_vm1, %v4207_v25  ;;  %vm848_vm1 = vcmp.eq.s32.totalorder %v706_v14, %v4565_v18 }
 0x189   : > { %3400 = vmatprep.mubr.msk.f32.mxu0 %vm835_vm2, %v4207_v25  ;;  %vm851_vm2 = vcmp.eq.s32.totalorder %v709_v13, %v4577_v21 }
 0x18c   : > { %3401 = vmatmul.mubr.msk.f32.gmra.mrb[82].mxu0 %vm834_vm3, %v4207_v25  ;;  %vm850_vm3 = vcmp.eq.s32.totalorder %v709_v13, %v4565_v18 }
 0x18d   : > { %3402 = vmatprep.mubr.msk.f32.mxu0 %vm837_vm4, %v4207_v25  ;;  %vm853_vm4 = vcmp.eq.s32.totalorder %v712_v17, %v4577_v21 }
 0x190   : > { %3403 = vmatmul.mubr.msk.f32.gmra.mrb[84].mxu0 %vm836_vm5, %v4207_v25  ;;  %vm852_vm5 = vcmp.eq.s32.totalorder %v712_v17, %v4565_v18 }
 0x191   : > { %3404 = vmatprep.mubr.msk.f32.mxu0 %vm839_vm6, %v4207_v25  ;;  %vm855_vm6 = vcmp.eq.s32.totalorder %v715_v16, %v4577_v21 }
 0x194   : > { %3405 = vmatmul.mubr.msk.f32.gmra.mrb[86].mxu0 %vm838_vm7, %v4207_v25  ;;  %vm854_vm7 = vcmp.eq.s32.totalorder %v715_v16, %v4565_v18 }
 0x195   : > { %3406 = vmatprep.mubr.msk.f32.mxu0 %vm841_vm8, %v4207_v25  ;;  %vm857_vm8 = vcmp.eq.s32.totalorder %v718_v20, %v4577_v21 }
 0x198   : > { %3407 = vmatmul.mubr.msk.f32.gmra.mrb[88].mxu0 %vm840_vm9, %v4207_v25  ;;  %vm856_vm9 = vcmp.eq.s32.totalorder %v718_v20, %v4565_v18 }
 0x199   : > { %3408 = vmatprep.mubr.msk.f32.mxu0 %vm843_vm10, %v4207_v25  ;;  %vm859_vm10 = vcmp.eq.s32.totalorder %v721_v19, %v4577_v21 }
 0x19c   : > { %3409 = vmatmul.mubr.msk.f32.gmra.mrb[90].mxu0 %vm842_vm11, %v4207_v25  ;;  %vm858_vm11 = vcmp.eq.s32.totalorder %v721_v19, %v4565_v18 }
 0x19d   : > { %3410 = vmatprep.mubr.msk.f32.mxu0 %vm845_vm12, %v4207_v25  ;;  %vm861_vm12 = vcmp.eq.s32.totalorder %v724_v23, %v4577_v21 }
 0x1a0   : > { %3411 = vmatmul.mubr.msk.f32.gmra.mrb[92].mxu0 %vm844_vm13, %v4207_v25  ;;  %vm2052_vm13 = vcmp.eq.s32.totalorder %v4892_v38, %v4874_v32 }
 0x1a1   : > { %3412 = vmatprep.mubr.msk.f32.mxu0 %vm847_vm14, %v4207_v25  ;;  %vm860_vm14 = vcmp.eq.s32.totalorder %v724_v23, %v4565_v18  ;;  %3574 = vmatprep.mubr.msk.f32.mxu1 %vm2052_vm13, %v4207_v25  ;;  %vm877_vm13 = vcmp.eq.s32.totalorder %v4876_v34, %v4577_v21  ;;  %v1675_v23 = vpop.permute.xlu1 %1674 }
 0x1a4   : > { %3413 = vmatmul.mubr.msk.f32.gmra.mrb[94].mxu0 %vm846_vm15, %v4207_v25  ;;  %vm863_vm15 = vcmp.eq.s32.totalorder %v4831_v22, %v4577_v21 }
 0x1a5   : > { %3414 = vmatprep.mubr.msk.f32.mxu0 %vm849_vm0, %v4207_v25  ;;  %vm862_vm0 = vcmp.eq.s32.totalorder %v4831_v22, %v4565_v18 }
 0x1a8   : > { %3415 = vmatmul.mubr.msk.f32.gmra.mrb[96].mxu0 %vm848_vm1, %v4207_v25  ;;  %vm865_vm1 = vcmp.eq.s32.totalorder %v4842_v26, %v4577_v21 }
 0x1a9   : > { %3416 = vmatprep.mubr.msk.f32.mxu0 %vm851_vm2, %v4207_v25  ;;  %vm864_vm2 = vcmp.eq.s32.totalorder %v4842_v26, %v4565_v18 }
 0x1ac   : > { %3417 = vmatmul.mubr.msk.f32.gmra.mrb[98].mxu0 %vm850_vm3, %v4207_v25  ;;  %vm867_vm3 = vcmp.eq.s32.totalorder %v4839_v24, %v4577_v21 }
 0x1ad   : > { %3418 = vmatprep.mubr.msk.f32.mxu0 %vm853_vm4, %v4207_v25  ;;  %vm866_vm4 = vcmp.eq.s32.totalorder %v4839_v24, %v4565_v18 }
 0x1b0   : > { %3419 = vmatmul.mubr.msk.f32.gmra.mrb[100].mxu0 %vm852_vm5, %v4207_v25  ;;  %vm869_vm5 = vcmp.eq.s32.totalorder %v4852_v28, %v4577_v21 }
 0x1b1   : > { %3420 = vmatprep.mubr.msk.f32.mxu0 %vm855_vm6, %v4207_v25  ;;  %vm868_vm6 = vcmp.eq.s32.totalorder %v4852_v28, %v4565_v18 }
 0x1b4   : > { %3421 = vmatmul.mubr.msk.f32.gmra.mrb[102].mxu0 %vm854_vm7, %v4207_v25  ;;  %vm871_vm7 = vcmp.eq.s32.totalorder %v4849_v27, %v4577_v21 }
 0x1b5   : > { %3422 = vmatprep.mubr.msk.f32.mxu0 %vm857_vm8, %v4207_v25  ;;  %vm870_vm8 = vcmp.eq.s32.totalorder %v4849_v27, %v4565_v18 }
 0x1b8   : > { %3423 = vmatmul.mubr.msk.f32.gmra.mrb[104].mxu0 %vm856_vm9, %v4207_v25  ;;  %vm873_vm9 = vcmp.eq.s32.totalorder %v4862_v30, %v4577_v21 }
 0x1b9   : > { %3424 = vmatprep.mubr.msk.f32.mxu0 %vm859_vm10, %v4207_v25  ;;  %vm872_vm10 = vcmp.eq.s32.totalorder %v4862_v30, %v4565_v18 }
 0x1bb   : > { %v1234_v36 = vpop.f32.mrb[0].mxu0 }
 0x1bc   : > { %v1236_v15 = vpop.f32.mrb[1].mxu0  ;;  %3425 = vmatmul.mubr.msk.f32.gmra.mrb[106].mxu0 %vm858_vm11, %v4207_v25  ;;  %v1937_v42 = vmul.f32 %v1620_v40, %v1234_v36  ;;  %vm875_vm11 = vcmp.eq.s32.totalorder %v4859_v29, %v4577_v21 }
 0x1bd   : > { %3426 = vmatprep.mubr.msk.f32.mxu0 %vm861_vm12, %v4207_v25  ;;  %vm874_vm12 = vcmp.eq.s32.totalorder %v4859_v29, %v4565_v18 }
 0x1bf   : > { %v1239_v41 = vpop.f32.mrb[2].mxu0 }
 0x1c0   : > { %v1938_v43 = vmul.f32 %v1625_v39, %v1239_v41  ;;  %v1241_v44 = vpop.f32.mrb[3].mxu0  ;;  %3427 = vmatmul.mubr.msk.f32.gmra.mrb[108].mxu0 %vm860_vm14, %v4207_v25  ;;  %vm876_vm14 = vcmp.eq.s32.totalorder %v4876_v34, %v4565_v18 }
 0x1c1   : > { %3428 = vmatprep.mubr.msk.f32.mxu0 %vm863_vm15, %v4207_v25  ;;  %vm879_vm15 = vcmp.eq.s32.totalorder %v4870_v31, %v4577_v21  ;;  %v1670_v21 = vpop.permute.xlu0 %1669 }
 0x1c2   : > { %v3759_v45 = vpack.c.bf16 %v1938_v43, %v1937_v42 }
 0x1c3   : > { %v1244_v46 = vpop.f32.mrb[4].mxu0 }
 0x1c4   : > { %v1246_v47 = vpop.f32.mrb[5].mxu0  ;;  %3429 = vmatmul.mubr.msk.f32.gmra.mrb[110].mxu0 %vm862_vm0, %v4207_v25  ;;  %3760 = vmatpush1.bf16.msra.mxu1 %v3759_v45  ;;  %v1939_v51 = vmul.f32 %v1630_v49, %v1244_v46  ;;  %vm878_vm0 = vcmp.eq.s32.totalorder %v4870_v31, %v4565_v18  ;;  %v1685_v18 = vpop.permute.xlu1 %1684 }
 0x1c5   : > { %3430 = vmatprep.mubr.msk.f32.mxu0 %vm865_vm1, %v4207_v25  ;;  %3761 = vmatprep.subr.bf16.mxu1 %v4206_v33  ;;  %v1680_v31 = vpop.permute.xlu0 %1679 }
 0x1c7   : > { %v1249_v50 = vpop.f32.mrb[6].mxu0 }
 0x1c8   : > { %v1940_v52 = vmul.f32 %v1635_v48, %v1249_v50  ;;  %v1251_v53 = vpop.f32.mrb[7].mxu0  ;;  %3431 = vmatmul.mubr.msk.f32.gmra.mrb[112].mxu0 %vm864_vm2, %v4207_v25  ;;  %v1695_v43 = vpop.permute.xlu1 %1694 }
 0x1c9   : > { %3432 = vmatprep.mubr.msk.f32.mxu0 %vm867_vm3, %v4207_v25  ;;  %v1690_v44 = vpop.permute.xlu0 %1689 }
 0x1ca   : > { %v3762_v54 = vpack.c.bf16 %v1940_v52, %v1939_v51 }
 0x1cb   : > { %v1254_v55 = vpop.f32.mrb[8].mxu0 }
 0x1cc   : > { %v1256_v56 = vpop.f32.mrb[9].mxu0  ;;  %3433 = vmatmul.mubr.msk.f32.gmra.mrb[114].mxu0 %vm866_vm4, %v4207_v25  ;;  %3763 = vmatpush1.bf16.msra.mxu1 %v3762_v54  ;;  %v1941_v60 = vmul.f32 %v1640_v58, %v1254_v55  ;;  %v1705_v52 = vpop.permute.xlu1 %1704 }
 0x1cd   : > { %3434 = vmatprep.mubr.msk.f32.mxu0 %vm869_vm5, %v4207_v25  ;;  %3764 = vmatprep.subr.bf16.mxu1 %v4206_v33  ;;  %v1700_v53 = vpop.permute.xlu0 %1699 }
 0x1cf   : > { %v1259_v59 = vpop.f32.mrb[10].mxu0 }
 0x1d0   : > { %v1942_v61 = vmul.f32 %v1645_v57, %v1259_v59  ;;  %v1261_v62 = vpop.f32.mrb[11].mxu0  ;;  %3435 = vmatmul.mubr.msk.f32.gmra.mrb[116].mxu0 %vm868_vm6, %v4207_v25 }
 0x1d1   : > { %3436 = vmatprep.mubr.msk.f32.mxu0 %vm871_vm7, %v4207_v25  ;;  %v1710_v62 = vpop.permute.xlu0 %1709 }
 0x1d2   : > { %v3765_v63 = vpack.c.bf16 %v1942_v61, %v1941_v60  ;;  %v1715_v61 = vpop.permute.xlu1 %1714 }
 0x1d3   : > { %v1264_v0 = vpop.f32.mrb[12].mxu0 }
 0x1d4   : > { %v1266_v1 = vpop.f32.mrb[13].mxu0  ;;  %3437 = vmatmul.mubr.msk.f32.gmra.mrb[118].mxu0 %vm870_vm8, %v4207_v25  ;;  %3766 = vmatpush1.bf16.msra.mxu1 %v3765_v63  ;;  %v1943_v5 = vmul.f32 %v1650_v3, %v1264_v0 }
 0x1d5   : > { %3438 = vmatprep.mubr.msk.f32.mxu0 %vm873_vm9, %v4207_v25  ;;  %3767 = vmatprep.subr.bf16.mxu1 %v4206_v33 }
 0x1d7   : > { %v1269_v4 = vpop.f32.mrb[14].mxu0 }
 0x1d8   : > { %v1944_v6 = vmul.f32 %v1655_v2, %v1269_v4  ;;  %v1271_v7 = vpop.f32.mrb[15].mxu0  ;;  %3439 = vmatmul.mubr.msk.f32.gmra.mrb[120].mxu0 %vm872_vm10, %v4207_v25 }
 0x1d9   : > { %3440 = vmatprep.mubr.msk.f32.mxu0 %vm875_vm11, %v4207_v25  ;;  %v1720_v7 = vpop.permute.xlu0 %1719 }
 0x1da   : > { %v3768_v8 = vpack.c.bf16 %v1944_v6, %v1943_v5  ;;  %v1725_v6 = vpop.permute.xlu1 %1724 }
 0x1db   : > { %v1274_v9 = vpop.f32.mrb[16].mxu0 }
 0x1dc   : > { %v1276_v10 = vpop.f32.mrb[17].mxu0  ;;  %3441 = vmatmul.mubr.msk.f32.gmra.mrb[122].mxu0 %vm874_vm12, %v4207_v25  ;;  %3769 = vmatpush1.bf16.msra.mxu1 %v3768_v8  ;;  %v1945_v14 = vmul.f32 %v1660_v12, %v1274_v9 }
 0x1dd   : > { %3442 = vmatprep.mubr.msk.f32.mxu0 %vm877_vm13, %v4207_v25  ;;  %3770 = vmatprep.subr.bf16.mxu1 %v4206_v33 }
 0x1df   : > { %v1279_v13 = vpop.f32.mrb[18].mxu0 }
 0x1e0   : > { %v1946_v16 = vmul.f32 %v1665_v11, %v1279_v13  ;;  %v1281_v17 = vpop.f32.mrb[19].mxu0  ;;  %3443 = vmatmul.mubr.msk.f32.gmra.mrb[124].mxu0 %vm876_vm14, %v4207_v25 }
 0x1e1   : > { %3444 = vmatprep.mubr.msk.f32.mxu0 %vm879_vm15, %v4207_v25  ;;  %v1730_v17 = vpop.permute.xlu0 %1729 }
 0x1e2   : > { %v3771_v19 = vpack.c.bf16 %v1946_v16, %v1945_v14  ;;  %v1735_v16 = vpop.permute.xlu1 %1734 }
 0x1e3   : > { %v1284_v20 = vpop.f32.mrb[20].mxu0 }
 0x1e4   : > { %v1286_v22 = vpop.f32.mrb[21].mxu0  ;;  %3445 = vmatmul.mubr.msk.f32.gmra.mrb[126].mxu0 %vm878_vm0, %v4207_v25  ;;  %3772 = vmatpush1.bf16.msra.mxu1 %v3771_v19  ;;  %v1947_v26 = vmul.f32 %v1670_v21, %v1284_v20 }
 0x1e5   : > { %3773 = vmatprep.subr.bf16.mxu1 %v4206_v33 }
 0x1e7   : > { %v1289_v24 = vpop.f32.mrb[22].mxu0 }
 0x1e8   : > { %v1948_v27 = vmul.f32 %v1675_v23, %v1289_v24  ;;  %v1291_v28 = vpop.f32.mrb[23].mxu0 }
 0x1e9   : > { %v1740_v28 = vpop.permute.xlu0 %1739 }
 0x1ea   : > { %v3774_v29 = vpack.c.bf16 %v1948_v27, %v1947_v26  ;;  %v1745_v27 = vpop.permute.xlu1 %1744 }
 0x1eb   : > { %v1294_v30 = vpop.f32.mrb[24].mxu0 }
 0x1ec   : > { %v1296_v34 = vpop.f32.mrb[25].mxu0  ;;  %3775 = vmatpush1.bf16.msra.mxu1 %v3774_v29  ;;  %v1949_v36 = vmul.f32 %v1680_v31, %v1294_v30 }
 0x1ed   : > { %3776 = vmatprep.subr.bf16.mxu1 %v4206_v33 }
 0x1ef   : > { %v1299_v35 = vpop.f32.mrb[26].mxu0 }
 0x1f0   : > { %v1950_v15 = vmul.f32 %v1685_v18, %v1299_v35  ;;  %v1301_v39 = vpop.f32.mrb[27].mxu0 }
 0x1f1   : > { %v1750_v39 = vpop.permute.xlu0 %1749 }
 0x1f2   : > { %v3777_v40 = vpack.c.bf16 %v1950_v15, %v1949_v36  ;;  %v1755_v15 = vpop.permute.xlu1 %1754 }
 0x1f3   : > { %v1304_v41 = vpop.f32.mrb[28].mxu0 }
 0x1f4   : > { %v1306_v42 = vpop.f32.mrb[29].mxu0  ;;  %3778 = vmatpush1.bf16.msra.mxu1 %v3777_v40  ;;  %v1951_v46 = vmul.f32 %v1690_v44, %v1304_v41 }
 0x1f5   : > { %3779 = vmatprep.subr.bf16.mxu1 %v4206_v33 }
 0x1f7   : > { %v1309_v45 = vpop.f32.mrb[30].mxu0 }
 0x1f8   : > { %v1952_v47 = vmul.f32 %v1695_v43, %v1309_v45  ;;  %v1311_v48 = vpop.f32.mrb[31].mxu0 }
 0x1f9   : > { %v1760_v48 = vpop.permute.xlu0 %1759 }
 0x1fa   : > { %v3780_v49 = vpack.c.bf16 %v1952_v47, %v1951_v46  ;;  %v1765_v47 = vpop.permute.xlu1 %1764 }
 0x1fb   : > { %v1314_v50 = vpop.f32.mrb[32].mxu0 }
 0x1fc   : > { %v1316_v51 = vpop.f32.mrb[33].mxu0  ;;  %3781 = vmatpush1.bf16.msra.mxu1 %v3780_v49  ;;  %v1953_v55 = vmul.f32 %v1700_v53, %v1314_v50 }
 0x1fd   : > { %3782 = vmatprep.subr.bf16.mxu1 %v4206_v33 }
 0x1ff   : > { %v1319_v54 = vpop.f32.mrb[34].mxu0 }
 0x200   : > { %v1954_v56 = vmul.f32 %v1705_v52, %v1319_v54  ;;  %v1321_v57 = vpop.f32.mrb[35].mxu0 }
 0x201   : > { %v1775_v57 = vpop.permute.xlu1 %1774 }
 0x202   : > { %v3783_v58 = vpack.c.bf16 %v1954_v56, %v1953_v55  ;;  %v2037_v56 = vsub.s32 0, %v4874_v32 }
 0x203   : > { %v1324_v59 = vpop.f32.mrb[36].mxu0 }
 0x204   : > { %v1326_v60 = vpop.f32.mrb[37].mxu0  ;;  %3784 = vmatpush1.bf16.msra.mxu1 %v3783_v58  ;;  %v1955_v0 = vmul.f32 %v1710_v62, %v1324_v59  ;;  %v1770_v58 = vpop.permute.xlu0 %1769 }
 0x205   : > { %3785 = vmatprep.subr.bf16.mxu1 %v4206_v33 }
 0x207   : > { %v1329_v63 = vpop.f32.mrb[38].mxu0 }
 0x208   : > { %v1956_v1 = vmul.f32 %v1715_v61, %v1329_v63  ;;  %v1331_v2 = vpop.f32.mrb[39].mxu0  ;;  %v4973_v63 = vrot.slane %v4887_v37, %v2037_v56  ;;  %v1785_v37 = vpop.permute.xlu1 %1784 }
 0x20a   : > { %v3786_v3 = vpack.c.bf16 %v1956_v1, %v1955_v0  ;;  %v4976_v0 = vadd.s32 8, %v4874_v32  ;;  %vm2051_vm1 = vcmp.eq.s32.totalorder %v4973_v63, %v4874_v32 }
 0x20b   : > { %v1334_v4 = vpop.f32.mrb[40].mxu0 }
 0x20c   : > { %v1336_v5 = vpop.f32.mrb[41].mxu0  ;;  %3787 = vmatpush1.bf16.msra.mxu1 %v3786_v3  ;;  %v1957_v9 = vmul.f32 %v1720_v7, %v1334_v4  ;;  %vm2056_vm2 = vcmp.eq.s32.totalorder %v4892_v38, %v4976_v0  ;;  %v4984_v4 = vadd.s32 16, %v4874_v32  ;;  %vm2055_vm3 = vcmp.eq.s32.totalorder %v4973_v63, %v4976_v0 }
 0x20d   : > { %3788 = vmatprep.subr.bf16.mxu1 %v4206_v33  ;;  %v1780_v5 = vpop.permute.xlu0 %1779 }
 0x20e   : > { %vm2060_vm4 = vcmp.eq.s32.totalorder %v4892_v38, %v4984_v4  ;;  %vm2059_vm5 = vcmp.eq.s32.totalorder %v4973_v63, %v4984_v4 }
 0x20f   : > { %v1339_v8 = vpop.f32.mrb[42].mxu0 }
 0x210   : > { %v1958_v10 = vmul.f32 %v1725_v6, %v1339_v8  ;;  %v1341_v11 = vpop.f32.mrb[43].mxu0 }
 0x212   : > { %v3789_v12 = vpack.c.bf16 %v1958_v10, %v1957_v9  ;;  %v4993_v10 = vadd.s32 24, %v4874_v32 }
 0x213   : > { %v1344_v13 = vpop.f32.mrb[44].mxu0 }
 0x214   : > { %v1346_v14 = vpop.f32.mrb[45].mxu0  ;;  %3790 = vmatpush1.bf16.msra.mxu1 %v3789_v12  ;;  %v1959_v20 = vmul.f32 %v1730_v17, %v1344_v13  ;;  %vm2064_vm6 = vcmp.eq.s32.totalorder %v4892_v38, %v4993_v10  ;;  %v1790_v17 = vpop.permute.xlu0 %1789  ;;  %vm2063_vm7 = vcmp.eq.s32.totalorder %v4973_v63, %v4993_v10 }
 0x215   : > { %3791 = vmatprep.subr.bf16.mxu1 %v4206_v33  ;;  %v5003_v14 = vadd.s32 32, %v4874_v32 }
 0x217   : > { %v1349_v19 = vpop.f32.mrb[46].mxu0  ;;  %vm2068_vm8 = vcmp.eq.s32.totalorder %v4892_v38, %v5003_v14  ;;  %vm2067_vm9 = vcmp.eq.s32.totalorder %v4973_v63, %v5003_v14 }
 0x218   : > { %v1960_v22 = vmul.f32 %v1735_v16, %v1349_v19  ;;  %v1351_v23 = vpop.f32.mrb[47].mxu0  ;;  %v1795_v16 = vpop.permute.xlu1 %1794 }
 0x21a   : > { %v3792_v21 = vpack.c.bf16 %v1960_v22, %v1959_v20 }
 0x21b   : > { %v1354_v24 = vpop.f32.mrb[48].mxu0 }
 0x21c   : > { %v1356_v26 = vpop.f32.mrb[49].mxu0  ;;  %3793 = vmatpush1.bf16.msra.mxu1 %v3792_v21  ;;  %v1961_v30 = vmul.f32 %v1740_v28, %v1354_v24  ;;  %v5012_v21 = vadd.s32 40, %v4874_v32  ;;  %v5022_v28 = vadd.s32 48, %v4874_v32 }
 0x21d   : > { %3794 = vmatprep.subr.bf16.mxu1 %v4206_v33 }
 0x21e   : > { %vm2072_vm10 = vcmp.eq.s32.totalorder %v4892_v38, %v5012_v21  ;;  %vm2071_vm11 = vcmp.eq.s32.totalorder %v4973_v63, %v5012_v21  ;;  %vm2076_vm12 = vcmp.eq.s32.totalorder %v4892_v38, %v5022_v28  ;;  %vm2075_vm13 = vcmp.eq.s32.totalorder %v4973_v63, %v5022_v28 }
 0x21f   : > { %v1359_v29 = vpop.f32.mrb[50].mxu0 }
 0x220   : > { %v1962_v34 = vmul.f32 %v1745_v27, %v1359_v29  ;;  %v1361_v18 = vpop.f32.mrb[51].mxu0  ;;  %v1805_v29 = vpop.permute.xlu1 %1804 }
 0x222   : > { %v3795_v31 = vpack.c.bf16 %v1962_v34, %v1961_v30  ;;  %v1800_v30 = vpop.permute.xlu0 %1799 }
 0x223   : > { %v1364_v35 = vpop.f32.mrb[52].mxu0 }
 0x224   : > { %v1366_v36 = vpop.f32.mrb[53].mxu0  ;;  %3796 = vmatpush1.bf16.msra.mxu1 %v3795_v31  ;;  %v1963_v41 = vmul.f32 %v1750_v39, %v1364_v35 }
 0x225   : > { %3797 = vmatprep.subr.bf16.mxu1 %v4206_v33  ;;  %v5031_v36 = vadd.s32 56, %v4874_v32 }
 0x227   : > { %v1369_v40 = vpop.f32.mrb[54].mxu0  ;;  %vm2080_vm14 = vcmp.eq.s32.totalorder %v4892_v38, %v5031_v36  ;;  %vm2079_vm15 = vcmp.eq.s32.totalorder %v4973_v63, %v5031_v36 }
 0x228   : > { %v1964_v42 = vmul.f32 %v1755_v15, %v1369_v40  ;;  %v1371_v43 = vpop.f32.mrb[55].mxu0 }
 0x229   : > { %v1810_v43 = vpop.permute.xlu0 %1809 }
 0x22a   : > { %v3798_v44 = vpack.c.bf16 %v1964_v42, %v1963_v41  ;;  %v5041_v41 = vadd.s32 64, %v4874_v32  ;;  %v1815_v42 = vpop.permute.xlu1 %1814 }
 0x22b   : > { %v1374_v45 = vpop.f32.mrb[56].mxu0 }
 0x22c   : > { %v1376_v46 = vpop.f32.mrb[57].mxu0  ;;  %3799 = vmatpush1.bf16.msra.mxu1 %v3798_v44  ;;  %v1965_v50 = vmul.f32 %v1760_v48, %v1374_v45  ;;  %vm2084_vm0 = vcmp.eq.s32.totalorder %v4892_v38, %v5041_v41  ;;  %v5050_v48 = vadd.s32 72, %v4874_v32 }
 0x22d   : > { %3800 = vmatprep.subr.bf16.mxu1 %v4206_v33 }
 0x22f   : > { %v1379_v49 = vpop.f32.mrb[58].mxu0 }
 0x230   : > { %v1966_v51 = vmul.f32 %v1765_v47, %v1379_v49  ;;  %v1381_v52 = vpop.f32.mrb[59].mxu0 }
 0x231   : > { %v5060_v52 = vadd.s32 80, %v4874_v32 }
 0x232   : > { %v3801_v53 = vpack.c.bf16 %v1966_v51, %v1965_v50 }
 0x233   : > { %v1384_v54 = vpop.f32.mrb[60].mxu0 }
 0x234   : > { %v1386_v55 = vpop.f32.mrb[61].mxu0  ;;  %3802 = vmatpush1.bf16.msra.mxu1 %v3801_v53  ;;  %v1967_v60 = vmul.f32 %v1770_v58, %v1384_v54  ;;  %v1825_v53 = vpop.permute.xlu1 %1824 }
 0x235   : > { %3803 = vmatprep.subr.bf16.mxu1 %v4206_v33  ;;  %v1820_v54 = vpop.permute.xlu0 %1819 }
 0x237   : > { %v1389_v59 = vpop.f32.mrb[62].mxu0 }
 0x238   : > { %v1968_v61 = vmul.f32 %v1775_v57, %v1389_v59  ;;  %v1391_v62 = vpop.f32.mrb[63].mxu0 }
 0x23a   : > { %v3804_v1 = vpack.c.bf16 %v1968_v61, %v1967_v60  ;;  %v5069_v60 = vadd.s32 88, %v4874_v32 }
 0x23b   : > { %v1394_v2 = vpop.f32.mrb[64].mxu0 }
 0x23c   : > { %v1396_v3 = vpop.f32.mrb[65].mxu0  ;;  %3805 = vmatpush1.bf16.msra.mxu1 %v3804_v1  ;;  %v1969_v7 = vmul.f32 %v1780_v5, %v1394_v2  ;;  %v5079_v2 = vadd.s32 96, %v4874_v32 }
 0x23d   : > { %3806 = vmatprep.subr.bf16.mxu1 %v4206_v33  ;;  %v1835_v3 = vpop.permute.xlu1 %1834 }
 0x23f   : > { %v1399_v6 = vpop.f32.mrb[66].mxu0  ;;  %3575 = vmatmul.mubr.msk.f32.vlgmr.msra.gmra.mrb[0].mxu1 %vm2051_vm1, %v4207_v25  ;;  %vm2083_vm1 = vcmp.eq.s32.totalorder %v4973_v63, %v5041_v41 }
 0x240   : > { %v1970_v8 = vmul.f32 %v1785_v37, %v1399_v6  ;;  %v1401_v9 = vpop.f32.mrb[67].mxu0  ;;  %3576 = vmatprep.mubr.msk.f32.mxu1 %vm2056_vm2, %v4207_v25  ;;  %vm2088_vm2 = vcmp.eq.s32.totalorder %v4892_v38, %v5050_v48  ;;  %v1830_v37 = vpop.permute.xlu0 %1829 }
 0x241   : > { %v5088_v9 = vadd.s32 104, %v4874_v32 }
 0x242   : > { %v3807_v11 = vpack.c.bf16 %v1970_v8, %v1969_v7 }
 0x243   : > { %v1404_v12 = vpop.f32.mrb[68].mxu0  ;;  %3577 = vmatmul.mubr.msk.f32.gmra.mrb[2].mxu1 %vm2055_vm3, %v4207_v25  ;;  %vm2087_vm3 = vcmp.eq.s32.totalorder %v4973_v63, %v5050_v48 }
 0x244   : > { %v1406_v13 = vpop.f32.mrb[69].mxu0  ;;  %3808 = vmatpush1.bf16.msra.mxu1 %v3807_v11  ;;  %3578 = vmatprep.mubr.msk.f32.mxu1 %vm2060_vm4, %v4207_v25  ;;  %v1971_v20 = vmul.f32 %v1790_v17, %v1404_v12  ;;  %vm2092_vm4 = vcmp.eq.s32.totalorder %v4892_v38, %v5060_v52  ;;  %v1845_v17 = vpop.permute.xlu1 %1844 }
 0x245   : > { %3809 = vmatprep.subr.bf16.mxu1 %v4206_v33 }
 0x247   : > { %v1409_v19 = vpop.f32.mrb[70].mxu0  ;;  %3579 = vmatmul.mubr.msk.f32.gmra.mrb[4].mxu1 %vm2059_vm5, %v4207_v25  ;;  %vm2091_vm5 = vcmp.eq.s32.totalorder %v4973_v63, %v5060_v52 }
 0x248   : > { %v1972_v22 = vmul.f32 %v1795_v16, %v1409_v19  ;;  %v1411_v23 = vpop.f32.mrb[71].mxu0  ;;  %3580 = vmatprep.mubr.msk.f32.mxu1 %vm2064_vm6, %v4207_v25  ;;  %vm2096_vm6 = vcmp.eq.s32.totalorder %v4892_v38, %v5069_v60  ;;  %v5098_v16 = vadd.s32 112, %v4874_v32  ;;  %v1840_v19 = vpop.permute.xlu0 %1839 }
 0x24a   : > { %v3810_v24 = vpack.c.bf16 %v1972_v22, %v1971_v20 }
 0x24b   : > { %v1414_v26 = vpop.f32.mrb[72].mxu0  ;;  %3581 = vmatmul.mubr.msk.f32.gmra.mrb[6].mxu1 %vm2063_vm7, %v4207_v25  ;;  %vm2095_vm7 = vcmp.eq.s32.totalorder %v4973_v63, %v5069_v60 }
 0x24c   : > { %v1416_v27 = vpop.f32.mrb[73].mxu0  ;;  %3811 = vmatpush1.bf16.msra.mxu1 %v3810_v24  ;;  %3582 = vmatprep.mubr.msk.f32.mxu1 %vm2068_vm8, %v4207_v25  ;;  %v1973_v18 = vmul.f32 %v1800_v30, %v1414_v26  ;;  %vm2100_vm8 = vcmp.eq.s32.totalorder %v4892_v38, %v5079_v2  ;;  %v5107_v26 = vadd.s32 120, %v4874_v32 }
 0x24d   : > { %3812 = vmatprep.subr.bf16.mxu1 %v4206_v33 }
 0x24f   : > { %v1419_v34 = vpop.f32.mrb[74].mxu0  ;;  %3583 = vmatmul.mubr.msk.f32.gmra.mrb[8].mxu1 %vm2067_vm9, %v4207_v25  ;;  %vm2099_vm9 = vcmp.eq.s32.totalorder %v4973_v63, %v5079_v2 }
 0x250   : > { %v1974_v31 = vmul.f32 %v1805_v29, %v1419_v34  ;;  %v1421_v35 = vpop.f32.mrb[75].mxu0  ;;  %3584 = vmatprep.mubr.msk.f32.mxu1 %vm2072_vm10, %v4207_v25  ;;  %vm2104_vm10 = vcmp.eq.s32.totalorder %v4892_v38, %v5088_v9  ;;  %v5117_v34 = vadd.s32 128, %v4874_v32 }
 0x252   : > { %v3813_v15 = vpack.c.bf16 %v1974_v31, %v1973_v18  ;;  %v1855_v18 = vpop.permute.xlu1 %1854  ;;  %v1850_v31 = vpop.permute.xlu0 %1849 }
 0x253   : > { %v1424_v39 = vpop.f32.mrb[76].mxu0  ;;  %3585 = vmatmul.mubr.msk.f32.gmra.mrb[10].mxu1 %vm2071_vm11, %v4207_v25  ;;  %vm2103_vm11 = vcmp.eq.s32.totalorder %v4973_v63, %v5088_v9 }
 0x254   : > { %v1426_v40 = vpop.f32.mrb[77].mxu0  ;;  %3814 = vmatpush1.bf16.msra.mxu1 %v3813_v15  ;;  %3586 = vmatprep.mubr.msk.f32.mxu1 %vm2076_vm12, %v4207_v25  ;;  %v1975_v45 = vmul.f32 %v1810_v43, %v1424_v39  ;;  %vm2108_vm12 = vcmp.eq.s32.totalorder %v4892_v38, %v5098_v16 }
 0x255   : > { %3815 = vmatprep.subr.bf16.mxu1 %v4206_v33 }
 0x257   : > { %v1429_v44 = vpop.f32.mrb[78].mxu0  ;;  %3587 = vmatmul.mubr.msk.f32.gmra.mrb[12].mxu1 %vm2075_vm13, %v4207_v25  ;;  %vm2107_vm13 = vcmp.eq.s32.totalorder %v4973_v63, %v5098_v16 }
 0x258   : > { %v1976_v46 = vmul.f32 %v1815_v42, %v1429_v44  ;;  %v1431_v47 = vpop.f32.mrb[79].mxu0  ;;  %3588 = vmatprep.mubr.msk.f32.mxu1 %vm2080_vm14, %v4207_v25  ;;  %vm2112_vm14 = vcmp.eq.s32.totalorder %v4892_v38, %v5107_v26  ;;  %v5126_v42 = vadd.s32 136, %v4874_v32 }
 0x259   : > { %v1865_v47 = vpop.permute.xlu1 %1864 }
 0x25a   : > { %v3816_v49 = vpack.c.bf16 %v1976_v46, %v1975_v45  ;;  %v5136_v46 = vadd.s32 144, %v4874_v32 }
 0x25b   : > { %v1434_v50 = vpop.f32.mrb[80].mxu0  ;;  %3589 = vmatmul.mubr.msk.f32.gmra.mrb[14].mxu1 %vm2079_vm15, %v4207_v25  ;;  %vm2111_vm15 = vcmp.eq.s32.totalorder %v4973_v63, %v5107_v26 }
 0x25c   : > { %v1436_v51 = vpop.f32.mrb[81].mxu0  ;;  %3817 = vmatpush1.bf16.msra.mxu1 %v3816_v49  ;;  %3590 = vmatprep.mubr.msk.f32.mxu1 %vm2084_vm0, %v4207_v25  ;;  %v1977_v57 = vmul.f32 %v1820_v54, %v1434_v50  ;;  %vm2116_vm0 = vcmp.eq.s32.totalorder %v4892_v38, %v5117_v34  ;;  %v1860_v49 = vpop.permute.xlu0 %1859 }
 0x25d   : > { %3818 = vmatprep.subr.bf16.mxu1 %v4206_v33 }
 0x25f   : > { %v1439_v55 = vpop.f32.mrb[82].mxu0  ;;  %3591 = vmatmul.mubr.msk.f32.gmra.mrb[16].mxu1 %vm2083_vm1, %v4207_v25  ;;  %vm2115_vm1 = vcmp.eq.s32.totalorder %v4973_v63, %v5117_v34 }
 0x260   : > { %v1978_v58 = vmul.f32 %v1825_v53, %v1439_v55  ;;  %v1441_v59 = vpop.f32.mrb[83].mxu0  ;;  %3592 = vmatprep.mubr.msk.f32.mxu1 %vm2088_vm2, %v4207_v25  ;;  %vm2120_vm2 = vcmp.eq.s32.totalorder %v4892_v38, %v5126_v42  ;;  %v5145_v55 = vadd.s32 152, %v4874_v32 }
 0x262   : > { %v3819_v61 = vpack.c.bf16 %v1978_v58, %v1977_v57 }
 0x263   : > { %v1444_v62 = vpop.f32.mrb[84].mxu0  ;;  %3593 = vmatmul.mubr.msk.f32.gmra.mrb[18].mxu1 %vm2087_vm3, %v4207_v25  ;;  %vm2119_vm3 = vcmp.eq.s32.totalorder %v4973_v63, %v5126_v42 }
 0x264   : > { %v1446_v1 = vpop.f32.mrb[85].mxu0  ;;  %3820 = vmatpush1.bf16.msra.mxu1 %v3819_v61  ;;  %3594 = vmatprep.mubr.msk.f32.mxu1 %vm2092_vm4, %v4207_v25  ;;  %v1979_v6 = vmul.f32 %v1830_v37, %v1444_v62  ;;  %vm2124_vm4 = vcmp.eq.s32.totalorder %v4892_v38, %v5136_v46  ;;  %v5155_v61 = vadd.s32 160, %v4874_v32  ;;  %v1875_v62 = vpop.permute.xlu1 %1874 }
 0x265   : > { %3821 = vmatprep.subr.bf16.mxu1 %v4206_v33  ;;  %v1870_v1 = vpop.permute.xlu0 %1869 }
 0x267   : > { %v1449_v5 = vpop.f32.mrb[86].mxu0  ;;  %3595 = vmatmul.mubr.msk.f32.gmra.mrb[20].mxu1 %vm2091_vm5, %v4207_v25  ;;  %vm2123_vm5 = vcmp.eq.s32.totalorder %v4973_v63, %v5136_v46 }
 0x268   : > { %v1980_v7 = vmul.f32 %v1835_v3, %v1449_v5  ;;  %v1451_v8 = vpop.f32.mrb[87].mxu0  ;;  %3596 = vmatprep.mubr.msk.f32.mxu1 %vm2096_vm6, %v4207_v25  ;;  %vm2128_vm6 = vcmp.eq.s32.totalorder %v4892_v38, %v5145_v55 }
 0x26a   : > { %v3822_v11 = vpack.c.bf16 %v1980_v7, %v1979_v6  ;;  %v5164_v7 = vadd.s32 168, %v4874_v32 }
 0x26b   : > { %v1454_v12 = vpop.f32.mrb[88].mxu0  ;;  %3597 = vmatmul.mubr.msk.f32.gmra.mrb[22].mxu1 %vm2095_vm7, %v4207_v25  ;;  %vm2127_vm7 = vcmp.eq.s32.totalorder %v4973_v63, %v5145_v55 }
 0x26c   : > { %v1456_v13 = vpop.f32.mrb[89].mxu0  ;;  %3823 = vmatpush1.bf16.msra.mxu1 %v3822_v11  ;;  %3598 = vmatprep.mubr.msk.f32.mxu1 %vm2100_vm8, %v4207_v25  ;;  %v1981_v22 = vmul.f32 %v1840_v19, %v1454_v12  ;;  %vm2132_vm8 = vcmp.eq.s32.totalorder %v4892_v38, %v5155_v61  ;;  %v1880_v19 = vpop.permute.xlu0 %1879 }
 0x26d   : > { %3824 = vmatprep.subr.bf16.mxu1 %v4206_v33  ;;  %v5174_v13 = vadd.s32 176, %v4874_v32 }
 0x26f   : > { %v1459_v20 = vpop.f32.mrb[90].mxu0  ;;  %3599 = vmatmul.mubr.msk.f32.gmra.mrb[24].mxu1 %vm2099_vm9, %v4207_v25  ;;  %vm2131_vm9 = vcmp.eq.s32.totalorder %v4973_v63, %v5155_v61 }
 0x270   : > { %v1982_v23 = vmul.f32 %v1845_v17, %v1459_v20  ;;  %v1461_v24 = vpop.f32.mrb[91].mxu0  ;;  %3600 = vmatprep.mubr.msk.f32.mxu1 %vm2104_vm10, %v4207_v25  ;;  %vm2136_vm10 = vcmp.eq.s32.totalorder %v4892_v38, %v5164_v7  ;;  %v1885_v17 = vpop.permute.xlu1 %1884 }
 0x272   : > { %v3825_v27 = vpack.c.bf16 %v1982_v23, %v1981_v22 }
 0x273   : > { %v1464_v29 = vpop.f32.mrb[92].mxu0  ;;  %3601 = vmatmul.mubr.msk.f32.gmra.mrb[26].mxu1 %vm2103_vm11, %v4207_v25  ;;  %vm2135_vm11 = vcmp.eq.s32.totalorder %v4973_v63, %v5164_v7 }
 0x274   : > { %v1466_v30 = vpop.f32.mrb[93].mxu0  ;;  %3826 = vmatpush1.bf16.msra.mxu1 %v3825_v27  ;;  %3602 = vmatprep.mubr.msk.f32.mxu1 %vm2108_vm12, %v4207_v25  ;;  %v1983_v15 = vmul.f32 %v1850_v31, %v1464_v29  ;;  %vm2140_vm12 = vcmp.eq.s32.totalorder %v4892_v38, %v5174_v13  ;;  %v5183_v27 = vadd.s32 184, %v4874_v32  ;;  %v5193_v31 = vadd.s32 192, %v4874_v32 }
 0x275   : > { %3827 = vmatprep.subr.bf16.mxu1 %v4206_v33 }
 0x277   : > { %v1469_v35 = vpop.f32.mrb[94].mxu0  ;;  %3603 = vmatmul.mubr.msk.f32.gmra.mrb[28].mxu1 %vm2107_vm13, %v4207_v25  ;;  %vm2139_vm13 = vcmp.eq.s32.totalorder %v4973_v63, %v5174_v13 }
 0x278   : > { %v1984_v39 = vmul.f32 %v1855_v18, %v1469_v35  ;;  %v1471_v40 = vpop.f32.mrb[95].mxu0  ;;  %3604 = vmatprep.mubr.msk.f32.mxu1 %vm2112_vm14, %v4207_v25  ;;  %vm2144_vm14 = vcmp.eq.s32.totalorder %v4892_v38, %v5183_v27  ;;  %v1895_v35 = vpop.permute.xlu1 %1894 }
 0x27a   : > { %v3828_v43 = vpack.c.bf16 %v1984_v39, %v1983_v15  ;;  %v1890_v15 = vpop.permute.xlu0 %1889 }
 0x27b   : > { %v1474_v44 = vpop.f32.mrb[96].mxu0  ;;  %3605 = vmatmul.mubr.msk.f32.gmra.mrb[30].mxu1 %vm2111_vm15, %v4207_v25  ;;  %vm2143_vm15 = vcmp.eq.s32.totalorder %v4973_v63, %v5183_v27 }
 0x27c   : > { %v1476_v45 = vpop.f32.mrb[97].mxu0  ;;  %3829 = vmatpush1.bf16.msra.mxu1 %v3828_v43  ;;  %3606 = vmatprep.mubr.msk.f32.mxu1 %vm2116_vm0, %v4207_v25  ;;  %v1985_v51 = vmul.f32 %v1860_v49, %v1474_v44  ;;  %vm2148_vm0 = vcmp.eq.s32.totalorder %v4892_v38, %v5193_v31 }
 0x27d   : > { %3830 = vmatprep.subr.bf16.mxu1 %v4206_v33  ;;  %v5202_v45 = vadd.s32 200, %v4874_v32 }
 0x27f   : > { %v1479_v50 = vpop.f32.mrb[98].mxu0  ;;  %3607 = vmatmul.mubr.msk.f32.gmra.mrb[32].mxu1 %vm2115_vm1, %v4207_v25  ;;  %vm2147_vm1 = vcmp.eq.s32.totalorder %v4973_v63, %v5193_v31 }
 0x280   : > { %v1986_v53 = vmul.f32 %v1865_v47, %v1479_v50  ;;  %v1481_v54 = vpop.f32.mrb[99].mxu0  ;;  %3608 = vmatprep.mubr.msk.f32.mxu1 %vm2120_vm2, %v4207_v25  ;;  %vm2152_vm2 = vcmp.eq.s32.totalorder %v4892_v38, %v5202_v45 }
 0x281   : > { %v1900_v54 = vpop.permute.xlu0 %1899 }
 0x282   : > { %v3831_v57 = vpack.c.bf16 %v1986_v53, %v1985_v51  ;;  %v5212_v51 = vadd.s32 208, %v4874_v32  ;;  %v1905_v53 = vpop.permute.xlu1 %1904 }
 0x283   : > { %v1484_v58 = vpop.f32.mrb[100].mxu0  ;;  %3609 = vmatmul.mubr.msk.f32.gmra.mrb[34].mxu1 %vm2119_vm3, %v4207_v25  ;;  %vm2151_vm3 = vcmp.eq.s32.totalorder %v4973_v63, %v5202_v45 }
 0x284   : > { %v1486_v59 = vpop.f32.mrb[101].mxu0  ;;  %3832 = vmatpush1.bf16.msra.mxu1 %v3831_v57  ;;  %3610 = vmatprep.mubr.msk.f32.mxu1 %vm2124_vm4, %v4207_v25  ;;  %v1987_v37 = vmul.f32 %v1870_v1, %v1484_v58  ;;  %vm2156_vm4 = vcmp.eq.s32.totalorder %v4892_v38, %v5212_v51  ;;  %v5221_v1 = vadd.s32 216, %v4874_v32 }
 0x285   : > { %3833 = vmatprep.subr.bf16.mxu1 %v4206_v33 }
 0x287   : > { %v1489_v3 = vpop.f32.mrb[102].mxu0  ;;  %3611 = vmatmul.mubr.msk.f32.gmra.mrb[36].mxu1 %vm2123_vm5, %v4207_v25  ;;  %vm2155_vm5 = vcmp.eq.s32.totalorder %v4973_v63, %v5212_v51 }
 0x288   : > { %v1988_v5 = vmul.f32 %v1875_v62, %v1489_v3  ;;  %v1491_v6 = vpop.f32.mrb[103].mxu0  ;;  %3612 = vmatprep.mubr.msk.f32.mxu1 %vm2128_vm6, %v4207_v25  ;;  %vm2160_vm6 = vcmp.eq.s32.totalorder %v4892_v38, %v5221_v1 }
 0x289   : > { %v5231_v6 = vadd.s32 224, %v4874_v32 }
 0x28a   : > { %v3834_v8 = vpack.c.bf16 %v1988_v5, %v1987_v37 }
 0x28b   : > { %v1494_v11 = vpop.f32.mrb[104].mxu0  ;;  %3613 = vmatmul.mubr.msk.f32.gmra.mrb[38].mxu1 %vm2127_vm7, %v4207_v25  ;;  %vm2159_vm7 = vcmp.eq.s32.totalorder %v4973_v63, %v5221_v1 }
 0x28c   : > { %v1496_v12 = vpop.f32.mrb[105].mxu0  ;;  %3835 = vmatpush1.bf16.msra.mxu1 %v3834_v8  ;;  %3614 = vmatprep.mubr.msk.f32.mxu1 %vm2132_vm8, %v4207_v25  ;;  %v1989_v22 = vmul.f32 %v1880_v19, %v1494_v11  ;;  %v1915_v8 = vpop.permute.xlu1 %1914  ;;  %vm2164_vm8 = vcmp.eq.s32.totalorder %v4892_v38, %v5231_v6 }
 0x28d   : > { %3836 = vmatprep.subr.bf16.mxu1 %v4206_v33  ;;  %v1910_v11 = vpop.permute.xlu0 %1909 }
 0x28f   : > { %v1499_v20 = vpop.f32.mrb[106].mxu0  ;;  %3615 = vmatmul.mubr.msk.f32.gmra.mrb[40].mxu1 %vm2131_vm9, %v4207_v25  ;;  %vm2163_vm9 = vcmp.eq.s32.totalorder %v4973_v63, %v5231_v6 }
 0x290   : > { %v1990_v23 = vmul.f32 %v1885_v17, %v1499_v20  ;;  %v1501_v24 = vpop.f32.mrb[107].mxu0  ;;  %3616 = vmatprep.mubr.msk.f32.mxu1 %vm2136_vm10, %v4207_v25 }
 0x292   : > { %v3837_v29 = vpack.c.bf16 %v1990_v23, %v1989_v22  ;;  %v5240_v22 = vadd.s32 232, %v4874_v32 }
 0x293   : > { %v1504_v30 = vpop.f32.mrb[108].mxu0  ;;  %3617 = vmatmul.mubr.msk.f32.gmra.mrb[42].mxu1 %vm2135_vm11, %v4207_v25 }
 0x294   : > { %v1506_v18 = vpop.f32.mrb[109].mxu0  ;;  %3838 = vmatpush1.bf16.msra.mxu1 %v3837_v29  ;;  %3618 = vmatprep.mubr.msk.f32.mxu1 %vm2140_vm12, %v4207_v25  ;;  %v1991_v40 = vmul.f32 %v1890_v15, %v1504_v30  ;;  %vm2168_vm10 = vcmp.eq.s32.totalorder %v4892_v38, %v5240_v22  ;;  %v5250_v30 = vadd.s32 240, %v4874_v32  ;;  %vm2167_vm11 = vcmp.eq.s32.totalorder %v4973_v63, %v5240_v22 }
 0x295   : > { %3839 = vmatprep.subr.bf16.mxu1 %v4206_v33  ;;  %v1925_v18 = vpop.permute.xlu1 %1924 }
 0x296   : > { %vm2172_vm12 = vcmp.eq.s32.totalorder %v4892_v38, %v5250_v30 }
 0x297   : > { %v1509_v39 = vpop.f32.mrb[110].mxu0  ;;  %3619 = vmatmul.mubr.msk.f32.gmra.mrb[44].mxu1 %vm2139_vm13, %v4207_v25  ;;  %vm2171_vm13 = vcmp.eq.s32.totalorder %v4973_v63, %v5250_v30 }
 0x298   : > { %v1992_v43 = vmul.f32 %v1895_v35, %v1509_v39  ;;  %v1511_v44 = vpop.f32.mrb[111].mxu0  ;;  %3620 = vmatprep.mubr.msk.f32.mxu1 %vm2144_vm14, %v4207_v25  ;;  %v1920_v35 = vpop.permute.xlu0 %1919 }
 0x299   : > { %v5259_v44 = vadd.s32 248, %v4874_v32 }
 0x29a   : > { %v3840_v47 = vpack.c.bf16 %v1992_v43, %v1991_v40 }
 0x29b   : > { %v1514_v49 = vpop.f32.mrb[112].mxu0  ;;  %3621 = vmatmul.mubr.msk.f32.gmra.mrb[46].mxu1 %vm2143_vm15, %v4207_v25  ;;  %vm2176_vm14 = vcmp.eq.s32.totalorder %v4892_v38, %v5259_v44  ;;  %vm2175_vm15 = vcmp.eq.s32.totalorder %v4973_v63, %v5259_v44  ;;  %v2439_v38 = vld [vmem:[%s490_s30] sm:$0x1]  ;;  %v2440_v63 = vstv %s2438_s12 }
 0x29c   : > { %v1516_v50 = vpop.f32.mrb[113].mxu0  ;;  %3841 = vmatpush1.bf16.msra.mxu1 %v3840_v47  ;;  %3622 = vmatprep.mubr.msk.f32.mxu1 %vm2148_vm0, %v4207_v25  ;;  %v1993_v58 = vmul.f32 %v1900_v54, %v1514_v49  ;;  %v2049_v47 = vsub.s32 3, %v4874_v32  ;;  %v2045_v54 = vsub.s32 2, %v4874_v32 }
 0x29d   : > { %3842 = vmatprep.subr.bf16.mxu1 %v4206_v33 }
 0x29f   : > { %v1519_v57 = vpop.f32.mrb[114].mxu0  ;;  %3623 = vmatmul.mubr.msk.f32.gmra.mrb[48].mxu1 %vm2147_vm1, %v4207_v25 }
 0x2a0   : > { %v1994_v59 = vmul.f32 %v1905_v53, %v1519_v57  ;;  %v1521_v62 = vpop.f32.mrb[115].mxu0  ;;  %3624 = vmatprep.mubr.msk.f32.mxu1 %vm2152_vm2, %v4207_v25  ;;  %v4051_v57 = vld [vmem:[%s4882_s28] sm:$0xf] }
 0x2a1   : > { %v1930_v62 = vpop.permute.xlu0 %1929 }
 0x2a2   : > { %v3843_v3 = vpack.c.bf16 %v1994_v59, %v1993_v58  ;;  %v5271_v58 = vrot.slane %v4051_v57, %v2049_v47  ;;  %v1935_v59 = vpop.permute.xlu1 %1934 }
 0x2a3   : > { %v1524_v37 = vpop.f32.mrb[116].mxu0  ;;  %3625 = vmatmul.mubr.msk.f32.gmra.mrb[50].mxu1 %vm2151_vm3, %v4207_v25 }
 0x2a4   : > { %v1526_v5 = vpop.f32.mrb[117].mxu0  ;;  %3844 = vmatpush1.bf16.msra.mxu1 %v3843_v3  ;;  %3626 = vmatprep.mubr.msk.f32.mxu1 %vm2156_vm4, %v4207_v25  ;;  %v1995_v17 = vmul.f32 %v1910_v11, %v1524_v37  ;;  %v5277_v11 = vrot.slane %v4051_v57, %v2045_v54  ;;  %vm2054_vm0 = vcmp.eq.s32.totalorder %v5271_v58, %v4874_v32 }
 0x2a5   : > { %3845 = vmatprep.subr.bf16.mxu1 %v4206_v33  ;;  %vm2058_vm2 = vcmp.eq.s32.totalorder %v5271_v58, %v4976_v0  ;;  %vm2062_vm4 = vcmp.eq.s32.totalorder %v5271_v58, %v4984_v4 }
 0x2a6   : > { %vm2053_vm1 = vcmp.eq.s32.totalorder %v5277_v11, %v4874_v32  ;;  %vm2057_vm3 = vcmp.eq.s32.totalorder %v5277_v11, %v4976_v0  ;;  %v2441_v0 = vmul.f32 %v2440_v63, %v2439_v38 }
 0x2a7   : > { %v1529_v12 = vpop.f32.mrb[118].mxu0  ;;  %3627 = vmatmul.mubr.msk.f32.gmra.mrb[52].mxu1 %vm2155_vm5, %v4207_v25  ;;  %vm2061_vm5 = vcmp.eq.s32.totalorder %v5277_v11, %v4984_v4 }
 0x2a8   : > { %v1996_v19 = vmul.f32 %v1915_v8, %v1529_v12  ;;  %v1531_v20 = vpop.f32.mrb[119].mxu0  ;;  %3628 = vmatprep.mubr.msk.f32.mxu1 %vm2160_vm6, %v4207_v25  ;;  %vm2066_vm6 = vcmp.eq.s32.totalorder %v5271_v58, %v4993_v10  ;;  %v5480_v4 = vrot.slane %v2441_v0, %v2037_v56 }
 0x2aa   : > { %v3846_v23 = vpack.c.bf16 %v1996_v19, %v1995_v17 }
 0x2ab   : > { %v1534_v24 = vpop.f32.mrb[120].mxu0  ;;  %3629 = vmatmul.mubr.msk.f32.gmra.mrb[54].mxu1 %vm2159_vm7, %v4207_v25  ;;  %vm2065_vm7 = vcmp.eq.s32.totalorder %v5277_v11, %v4993_v10 }
 0x2ac   : > { %v1536_v29 = vpop.f32.mrb[121].mxu0  ;;  %3847 = vmatpush1.bf16.msra.mxu1 %v3846_v23  ;;  %3630 = vmatprep.mubr.msk.f32.mxu1 %vm2164_vm8, %v4207_v25  ;;  %v1997_v39 = vmul.f32 %v1920_v35, %v1534_v24  ;;  %vm2070_vm8 = vcmp.eq.s32.totalorder %v5271_v58, %v5003_v14 }
 0x2ad   : > { %3848 = vmatprep.subr.bf16.mxu1 %v4206_v33 }
 0x2af   : > { %v1539_v15 = vpop.f32.mrb[122].mxu0  ;;  %3631 = vmatmul.mubr.msk.f32.gmra.mrb[56].mxu1 %vm2163_vm9, %v4207_v25  ;;  %vm2069_vm9 = vcmp.eq.s32.totalorder %v5277_v11, %v5003_v14 }
 0x2b0   : > { %v1998_v40 = vmul.f32 %v1925_v18, %v1539_v15  ;;  %v1541_v43 = vpop.f32.mrb[123].mxu0  ;;  %3632 = vmatprep.mubr.msk.f32.mxu1 %vm2168_vm10, %v4207_v25  ;;  %vm2074_vm10 = vcmp.eq.s32.totalorder %v5271_v58, %v5012_v21 }
 0x2b2   : > { %v3849_v49 = vpack.c.bf16 %v1998_v40, %v1997_v39 }
 0x2b3   : > { %v1544_v50 = vpop.f32.mrb[124].mxu0  ;;  %3633 = vmatmul.mubr.msk.f32.gmra.mrb[58].mxu1 %vm2167_vm11, %v4207_v25  ;;  %vm2073_vm11 = vcmp.eq.s32.totalorder %v5277_v11, %v5012_v21 }
 0x2b4   : > { %v1546_v53 = vpop.f32.mrb[125].mxu0  ;;  %3850 = vmatpush1.bf16.msra.mxu1 %v3849_v49  ;;  %3634 = vmatprep.mubr.msk.f32.mxu1 %vm2172_vm12, %v4207_v25  ;;  %v1999_v37 = vmul.f32 %v1930_v62, %v1544_v50  ;;  %vm2078_vm12 = vcmp.eq.s32.totalorder %v5271_v58, %v5022_v28 }
 0x2b5   : > { %3851 = vmatprep.subr.bf16.mxu1 %v4206_v33 }
 0x2b7   : > { %v1549_v3 = vpop.f32.mrb[126].mxu0  ;;  %3635 = vmatmul.mubr.msk.f32.gmra.mrb[60].mxu1 %vm2171_vm13, %v4207_v25  ;;  %vm2077_vm13 = vcmp.eq.s32.totalorder %v5277_v11, %v5022_v28 }
 0x2b8   : > { %v2000_v5 = vmul.f32 %v1935_v59, %v1549_v3  ;;  %v1551_v8 = vpop.f32.mrb[127].mxu0  ;;  %3636 = vmatprep.mubr.msk.f32.mxu1 %vm2176_vm14, %v4207_v25  ;;  %vm2082_vm14 = vcmp.eq.s32.totalorder %v5271_v58, %v5031_v36 }
 0x2ba   : > { %v3852_v33 = vpack.c.bf16 %v2000_v5, %v1999_v37 }
 0x2bb   : > { %3637 = vmatmul.mubr.msk.f32.gmra.mrb[62].mxu1 %vm2175_vm15, %v4207_v25  ;;  %vm2081_vm15 = vcmp.eq.s32.totalorder %v5277_v11, %v5031_v36 }
 0x2bc   : > { %3853 = vmatpush1.bf16.msra.mxu1 %v3852_v33  ;;  %3638 = vmatprep.mubr.msk.f32.mxu1 %vm2054_vm0, %v4207_v25  ;;  %vm2086_vm0 = vcmp.eq.s32.totalorder %v5271_v58, %v5041_v41 }
 0x2bf   : > { %3639 = vmatmul.mubr.msk.f32.vlgmr.msra.gmra.mrb[0].mxu1 %vm2053_vm1, %v4207_v25  ;;  %vm2085_vm1 = vcmp.eq.s32.totalorder %v5277_v11, %v5041_v41 }
 0x2c0   : > { %3640 = vmatprep.mubr.msk.f32.mxu1 %vm2058_vm2, %v4207_v25  ;;  %vm2090_vm2 = vcmp.eq.s32.totalorder %v5271_v58, %v5050_v48 }
 0x2c3   : > { %3641 = vmatmul.mubr.msk.f32.gmra.mrb[2].mxu1 %vm2057_vm3, %v4207_v25  ;;  %vm2089_vm3 = vcmp.eq.s32.totalorder %v5277_v11, %v5050_v48 }
 0x2c4   : > { %3642 = vmatprep.mubr.msk.f32.mxu1 %vm2062_vm4, %v4207_v25  ;;  %vm2094_vm4 = vcmp.eq.s32.totalorder %v5271_v58, %v5060_v52 }
 0x2c7   : > { %3643 = vmatmul.mubr.msk.f32.gmra.mrb[4].mxu1 %vm2061_vm5, %v4207_v25  ;;  %vm2093_vm5 = vcmp.eq.s32.totalorder %v5277_v11, %v5060_v52 }
 0x2c8   : > { %3644 = vmatprep.mubr.msk.f32.mxu1 %vm2066_vm6, %v4207_v25  ;;  %vm2098_vm6 = vcmp.eq.s32.totalorder %v5271_v58, %v5069_v60 }
 0x2cb   : > { %3645 = vmatmul.mubr.msk.f32.gmra.mrb[6].mxu1 %vm2065_vm7, %v4207_v25  ;;  %vm2097_vm7 = vcmp.eq.s32.totalorder %v5277_v11, %v5069_v60 }
 0x2cc   : > { %3646 = vmatprep.mubr.msk.f32.mxu1 %vm2070_vm8, %v4207_v25  ;;  %vm2102_vm8 = vcmp.eq.s32.totalorder %v5271_v58, %v5079_v2 }
 0x2cf   : > { %3647 = vmatmul.mubr.msk.f32.gmra.mrb[8].mxu1 %vm2069_vm9, %v4207_v25  ;;  %vm2101_vm9 = vcmp.eq.s32.totalorder %v5277_v11, %v5079_v2 }
 0x2d0   : > { %3648 = vmatprep.mubr.msk.f32.mxu1 %vm2074_vm10, %v4207_v25  ;;  %vm2106_vm10 = vcmp.eq.s32.totalorder %v5271_v58, %v5088_v9 }
 0x2d3   : > { %3649 = vmatmul.mubr.msk.f32.gmra.mrb[10].mxu1 %vm2073_vm11, %v4207_v25  ;;  %vm2105_vm11 = vcmp.eq.s32.totalorder %v5277_v11, %v5088_v9 }
 0x2d4   : > { %3650 = vmatprep.mubr.msk.f32.mxu1 %vm2078_vm12, %v4207_v25  ;;  %vm2110_vm12 = vcmp.eq.s32.totalorder %v5271_v58, %v5098_v16 }
 0x2d7   : > { %3651 = vmatmul.mubr.msk.f32.gmra.mrb[12].mxu1 %vm2077_vm13, %v4207_v25  ;;  %vm2109_vm13 = vcmp.eq.s32.totalorder %v5277_v11, %v5098_v16 }
 0x2d8   : > { %3652 = vmatprep.mubr.msk.f32.mxu1 %vm2082_vm14, %v4207_v25  ;;  %vm2114_vm14 = vcmp.eq.s32.totalorder %v5271_v58, %v5107_v26 }
 0x2db   : > { %3653 = vmatmul.mubr.msk.f32.gmra.mrb[14].mxu1 %vm2081_vm15, %v4207_v25  ;;  %vm2113_vm15 = vcmp.eq.s32.totalorder %v5277_v11, %v5107_v26 }
 0x2dc   : > { %3654 = vmatprep.mubr.msk.f32.mxu1 %vm2086_vm0, %v4207_v25  ;;  %vm2118_vm0 = vcmp.eq.s32.totalorder %v5271_v58, %v5117_v34 }
 0x2df   : > { %3655 = vmatmul.mubr.msk.f32.gmra.mrb[16].mxu1 %vm2085_vm1, %v4207_v25  ;;  %vm2117_vm1 = vcmp.eq.s32.totalorder %v5277_v11, %v5117_v34 }
 0x2e0   : > { %3656 = vmatprep.mubr.msk.f32.mxu1 %vm2090_vm2, %v4207_v25  ;;  %vm2122_vm2 = vcmp.eq.s32.totalorder %v5271_v58, %v5126_v42 }
 0x2e3   : > { %3657 = vmatmul.mubr.msk.f32.gmra.mrb[18].mxu1 %vm2089_vm3, %v4207_v25  ;;  %vm2121_vm3 = vcmp.eq.s32.totalorder %v5277_v11, %v5126_v42 }
 0x2e4   : > { %3658 = vmatprep.mubr.msk.f32.mxu1 %vm2094_vm4, %v4207_v25  ;;  %vm2126_vm4 = vcmp.eq.s32.totalorder %v5271_v58, %v5136_v46 }
 0x2e7   : > { %3659 = vmatmul.mubr.msk.f32.gmra.mrb[20].mxu1 %vm2093_vm5, %v4207_v25  ;;  %vm2125_vm5 = vcmp.eq.s32.totalorder %v5277_v11, %v5136_v46 }
 0x2e8   : > { %3660 = vmatprep.mubr.msk.f32.mxu1 %vm2098_vm6, %v4207_v25  ;;  %vm2130_vm6 = vcmp.eq.s32.totalorder %v5271_v58, %v5145_v55 }
 0x2eb   : > { %3661 = vmatmul.mubr.msk.f32.gmra.mrb[22].mxu1 %vm2097_vm7, %v4207_v25  ;;  %vm2129_vm7 = vcmp.eq.s32.totalorder %v5277_v11, %v5145_v55 }
 0x2ec   : > { %3662 = vmatprep.mubr.msk.f32.mxu1 %vm2102_vm8, %v4207_v25  ;;  %vm2134_vm8 = vcmp.eq.s32.totalorder %v5271_v58, %v5155_v61 }
 0x2ef   : > { %3663 = vmatmul.mubr.msk.f32.gmra.mrb[24].mxu1 %vm2101_vm9, %v4207_v25  ;;  %vm2133_vm9 = vcmp.eq.s32.totalorder %v5277_v11, %v5155_v61 }
 0x2f0   : > { %3664 = vmatprep.mubr.msk.f32.mxu1 %vm2106_vm10, %v4207_v25  ;;  %vm2138_vm10 = vcmp.eq.s32.totalorder %v5271_v58, %v5164_v7 }
 0x2f3   : > { %3665 = vmatmul.mubr.msk.f32.gmra.mrb[26].mxu1 %vm2105_vm11, %v4207_v25  ;;  %vm2137_vm11 = vcmp.eq.s32.totalorder %v5277_v11, %v5164_v7 }
 0x2f4   : > { %3666 = vmatprep.mubr.msk.f32.mxu1 %vm2110_vm12, %v4207_v25  ;;  %vm2142_vm12 = vcmp.eq.s32.totalorder %v5271_v58, %v5174_v13 }
 0x2f7   : > { %3667 = vmatmul.mubr.msk.f32.gmra.mrb[28].mxu1 %vm2109_vm13, %v4207_v25  ;;  %vm2141_vm13 = vcmp.eq.s32.totalorder %v5277_v11, %v5174_v13 }
 0x2f8   : > { %3668 = vmatprep.mubr.msk.f32.mxu1 %vm2114_vm14, %v4207_v25  ;;  %vm2146_vm14 = vcmp.eq.s32.totalorder %v5271_v58, %v5183_v27 }
 0x2fb   : > { %3669 = vmatmul.mubr.msk.f32.gmra.mrb[30].mxu1 %vm2113_vm15, %v4207_v25  ;;  %vm2145_vm15 = vcmp.eq.s32.totalorder %v5277_v11, %v5183_v27 }
 0x2fc   : > { %3670 = vmatprep.mubr.msk.f32.mxu1 %vm2118_vm0, %v4207_v25  ;;  %vm2150_vm0 = vcmp.eq.s32.totalorder %v5271_v58, %v5193_v31 }
 0x2ff   : > { %3671 = vmatmul.mubr.msk.f32.gmra.mrb[32].mxu1 %vm2117_vm1, %v4207_v25  ;;  %vm2149_vm1 = vcmp.eq.s32.totalorder %v5277_v11, %v5193_v31 }
 0x300   : > { %3672 = vmatprep.mubr.msk.f32.mxu1 %vm2122_vm2, %v4207_v25  ;;  %vm2154_vm2 = vcmp.eq.s32.totalorder %v5271_v58, %v5202_v45 }
 0x303   : > { %3673 = vmatmul.mubr.msk.f32.gmra.mrb[34].mxu1 %vm2121_vm3, %v4207_v25  ;;  %vm2153_vm3 = vcmp.eq.s32.totalorder %v5277_v11, %v5202_v45 }
 0x304   : > { %3674 = vmatprep.mubr.msk.f32.mxu1 %vm2126_vm4, %v4207_v25  ;;  %vm2158_vm4 = vcmp.eq.s32.totalorder %v5271_v58, %v5212_v51 }
 0x307   : > { %3675 = vmatmul.mubr.msk.f32.gmra.mrb[36].mxu1 %vm2125_vm5, %v4207_v25  ;;  %vm2157_vm5 = vcmp.eq.s32.totalorder %v5277_v11, %v5212_v51 }
 0x308   : > { %3676 = vmatprep.mubr.msk.f32.mxu1 %vm2130_vm6, %v4207_v25  ;;  %vm2162_vm6 = vcmp.eq.s32.totalorder %v5271_v58, %v5221_v1 }
 0x30b   : > { %3677 = vmatmul.mubr.msk.f32.gmra.mrb[38].mxu1 %vm2129_vm7, %v4207_v25  ;;  %vm2161_vm7 = vcmp.eq.s32.totalorder %v5277_v11, %v5221_v1 }
 0x30c   : > { %3678 = vmatprep.mubr.msk.f32.mxu1 %vm2134_vm8, %v4207_v25  ;;  %vm2166_vm8 = vcmp.eq.s32.totalorder %v5271_v58, %v5231_v6 }
 0x30f   : > { %3679 = vmatmul.mubr.msk.f32.gmra.mrb[40].mxu1 %vm2133_vm9, %v4207_v25  ;;  %vm2165_vm9 = vcmp.eq.s32.totalorder %v5277_v11, %v5231_v6 }
 0x310   : > { %3680 = vmatprep.mubr.msk.f32.mxu1 %vm2138_vm10, %v4207_v25  ;;  %vm2170_vm10 = vcmp.eq.s32.totalorder %v5271_v58, %v5240_v22 }
 0x313   : > { %3681 = vmatmul.mubr.msk.f32.gmra.mrb[42].mxu1 %vm2137_vm11, %v4207_v25  ;;  %vm2169_vm11 = vcmp.eq.s32.totalorder %v5277_v11, %v5240_v22 }
 0x314   : > { %3682 = vmatprep.mubr.msk.f32.mxu1 %vm2142_vm12, %v4207_v25  ;;  %vm2174_vm12 = vcmp.eq.s32.totalorder %v5271_v58, %v5250_v30 }
 0x317   : > { %3683 = vmatmul.mubr.msk.f32.gmra.mrb[44].mxu1 %vm2141_vm13, %v4207_v25  ;;  %vm2173_vm13 = vcmp.eq.s32.totalorder %v5277_v11, %v5250_v30 }
 0x318   : > { %3684 = vmatprep.mubr.msk.f32.mxu1 %vm2146_vm14, %v4207_v25  ;;  %vm2178_vm14 = vcmp.eq.s32.totalorder %v5271_v58, %v5259_v44 }
 0x31b   : > { %3685 = vmatmul.mubr.msk.f32.gmra.mrb[46].mxu1 %vm2145_vm15, %v4207_v25  ;;  %vm2177_vm15 = vcmp.eq.s32.totalorder %v5277_v11, %v5259_v44 }
 0x31c   : > { %3686 = vmatprep.mubr.msk.f32.mxu1 %vm2150_vm0, %v4207_v25 }
 0x31f   : > { %3687 = vmatmul.mubr.msk.f32.gmra.mrb[48].mxu1 %vm2149_vm1, %v4207_v25 }
 0x320   : > { %3688 = vmatprep.mubr.msk.f32.mxu1 %vm2154_vm2, %v4207_v25 }
 0x323   : > { %3689 = vmatmul.mubr.msk.f32.gmra.mrb[50].mxu1 %vm2153_vm3, %v4207_v25 }
 0x324   : > { %3690 = vmatprep.mubr.msk.f32.mxu1 %vm2158_vm4, %v4207_v25 }
 0x327   : > { %3691 = vmatmul.mubr.msk.f32.gmra.mrb[52].mxu1 %vm2157_vm5, %v4207_v25 }
 0x328   : > { %3692 = vmatprep.mubr.msk.f32.mxu1 %vm2162_vm6, %v4207_v25 }
 0x32b   : > { %3693 = vmatmul.mubr.msk.f32.gmra.mrb[54].mxu1 %vm2161_vm7, %v4207_v25 }
 0x32c   : > { %3694 = vmatprep.mubr.msk.f32.mxu1 %vm2166_vm8, %v4207_v25 }
 0x32f   : > { %3695 = vmatmul.mubr.msk.f32.gmra.mrb[56].mxu1 %vm2165_vm9, %v4207_v25 }
 0x330   : > { %3696 = vmatprep.mubr.msk.f32.mxu1 %vm2170_vm10, %v4207_v25 }
 0x333   : > { %3697 = vmatmul.mubr.msk.f32.gmra.mrb[58].mxu1 %vm2169_vm11, %v4207_v25 }
 0x334   : > { %3698 = vmatprep.mubr.msk.f32.mxu1 %vm2174_vm12, %v4207_v25 }
 0x337   : > { %3699 = vmatmul.mubr.msk.f32.gmra.mrb[60].mxu1 %vm2173_vm13, %v4207_v25 }
 0x338   : > { %3700 = vmatprep.mubr.msk.f32.mxu1 %vm2178_vm14, %v4207_v25 }
 0x33b   : > { %3701 = vmatmul.mubr.msk.f32.gmra.mrb[62].mxu1 %vm2177_vm15, %v4207_v25 }
 0x392   : > { %v2739_v25 = vpop.f32.mrb[0].mxu1 }
 0x393   : > { %v5486_v10 = vadd.f32 %v2739_v25, %v5480_v4  ;;  %v2741_v14 = vpop.f32.mrb[1].mxu1 }
 0x395   : > { %2903 = vst [vmem:[%s5582_s27] sm:$0xff] (!%p3702_p8), %v5486_v10 }
 0x396   : > { %v2744_v21 = vpop.f32.mrb[2].mxu1 }
 0x397   : > { %v5489_v28 = vadd.f32 %v2744_v21, %v5480_v4  ;;  %v2746_v36 = vpop.f32.mrb[3].mxu1 }
 0x399   : > { %2904 = vst [vmem:[%s5582_s27 + $0x8] sm:$0xff] (!%p3702_p8), %v5489_v28 }
 0x39a   : > { %v2749_v41 = vpop.f32.mrb[4].mxu1 }
 0x39b   : > { %v5492_v48 = vadd.f32 %v2749_v41, %v5480_v4  ;;  %v2751_v52 = vpop.f32.mrb[5].mxu1 }
 0x39d   : > { %2905 = vst [vmem:[%s5582_s27 + $0x10] sm:$0xff] (!%p3702_p8), %v5492_v48 }
 0x39e   : > { %v2754_v32 = vpop.f32.mrb[6].mxu1 }
 0x39f   : > { %v5495_v56 = vadd.f32 %v2754_v32, %v5480_v4  ;;  %v2756_v60 = vpop.f32.mrb[7].mxu1 }
 0x3a1   : > { %2906 = vst [vmem:[%s5582_s27 + $0x18] sm:$0xff] (!%p3702_p8), %v5495_v56 }
 0x3a2   : > { %v2759_v2 = vpop.f32.mrb[8].mxu1 }
 0x3a3   : > { %v5498_v9 = vadd.f32 %v2759_v2, %v5480_v4  ;;  %v2761_v16 = vpop.f32.mrb[9].mxu1 }
 0x3a5   : > { %2907 = vst [vmem:[%s5582_s27 + $0x20] sm:$0xff] (!%p3702_p8), %v5498_v9 }
 0x3a6   : > { %v2764_v26 = vpop.f32.mrb[10].mxu1 }
 0x3a7   : > { %v5501_v34 = vadd.f32 %v2764_v26, %v5480_v4  ;;  %v2766_v42 = vpop.f32.mrb[11].mxu1 }
 0x3a9   : > { %2908 = vst [vmem:[%s5582_s27 + $0x28] sm:$0xff] (!%p3702_p8), %v5501_v34 }
 0x3aa   : > { %v2769_v46 = vpop.f32.mrb[12].mxu1 }
 0x3ab   : > { %v5504_v55 = vadd.f32 %v2769_v46, %v5480_v4  ;;  %v2771_v61 = vpop.f32.mrb[13].mxu1 }
 0x3ad   : > { %2909 = vst [vmem:[%s5582_s27 + $0x30] sm:$0xff] (!%p3702_p8), %v5504_v55 }
 0x3ae   : > { %v2774_v7 = vpop.f32.mrb[14].mxu1 }
 0x3af   : > { %v5507_v13 = vadd.f32 %v2774_v7, %v5480_v4  ;;  %v2776_v27 = vpop.f32.mrb[15].mxu1 }
 0x3b1   : > { %2910 = vst [vmem:[%s5582_s27 + $0x38] sm:$0xff] (!%p3702_p8), %v5507_v13 }
 0x3b2   : > { %v2779_v31 = vpop.f32.mrb[16].mxu1 }
 0x3b3   : > { %v5510_v45 = vadd.f32 %v2779_v31, %v5480_v4  ;;  %v2781_v51 = vpop.f32.mrb[17].mxu1 }
 0x3b5   : > { %2911 = vst [vmem:[%s5582_s27 + $0x40] sm:$0xff] (!%p3702_p8), %v5510_v45 }
 0x3b6   : > { %v2784_v1 = vpop.f32.mrb[18].mxu1 }
 0x3b7   : > { %v5513_v6 = vadd.f32 %v2784_v1, %v5480_v4  ;;  %v2786_v12 = vpop.f32.mrb[19].mxu1 }
 0x3b9   : > { %2912 = vst [vmem:[%s5582_s27 + $0x48] sm:$0xff] (!%p3702_p8), %v5513_v6 }
 0x3ba   : > { %v2789_v17 = vpop.f32.mrb[20].mxu1 }
 0x3bb   : > { %v5516_v19 = vadd.f32 %v2789_v17, %v5480_v4  ;;  %v2791_v20 = vpop.f32.mrb[21].mxu1 }
 0x3bd   : > { %2913 = vst [vmem:[%s5582_s27 + $0x50] sm:$0xff] (!%p3702_p8), %v5516_v19 }
 0x3be   : > { %v2794_v22 = vpop.f32.mrb[22].mxu1 }
 0x3bf   : > { %v5519_v23 = vadd.f32 %v2794_v22, %v5480_v4  ;;  %v2796_v24 = vpop.f32.mrb[23].mxu1 }
 0x3c1   : > { %2914 = vst [vmem:[%s5582_s27 + $0x58] sm:$0xff] (!%p3702_p8), %v5519_v23 }
 0x3c2   : > { %v2799_v29 = vpop.f32.mrb[24].mxu1 }
 0x3c3   : > { %v5522_v30 = vadd.f32 %v2799_v29, %v5480_v4  ;;  %v2801_v18 = vpop.f32.mrb[25].mxu1 }
 0x3c5   : > { %2915 = vst [vmem:[%s5582_s27 + $0x60] sm:$0xff] (!%p3702_p8), %v5522_v30 }
 0x3c6   : > { %v2804_v35 = vpop.f32.mrb[26].mxu1 }
 0x3c7   : > { %v5525_v15 = vadd.f32 %v2804_v35, %v5480_v4  ;;  %v2806_v39 = vpop.f32.mrb[27].mxu1 }
 0x3c9   : > { %2916 = vst [vmem:[%s5582_s27 + $0x68] sm:$0xff] (!%p3702_p8), %v5525_v15 }
 0x3ca   : > { %v2809_v40 = vpop.f32.mrb[28].mxu1 }
 0x3cb   : > { %v5528_v43 = vadd.f32 %v2809_v40, %v5480_v4  ;;  %v2811_v44 = vpop.f32.mrb[29].mxu1 }
 0x3cd   : > { %2917 = vst [vmem:[%s5582_s27 + $0x70] sm:$0xff] (!%p3702_p8), %v5528_v43 }
 0x3ce   : > { %v2814_v47 = vpop.f32.mrb[30].mxu1 }
 0x3cf   : > { %v5531_v49 = vadd.f32 %v2814_v47, %v5480_v4  ;;  %v2816_v50 = vpop.f32.mrb[31].mxu1 }
 0x3d1   : > { %2918 = vst [vmem:[%s5582_s27 + $0x78] sm:$0xff] (!%p3702_p8), %v5531_v49 }
 0x3d2   : > { %v2819_v53 = vpop.f32.mrb[32].mxu1 }
 0x3d3   : > { %v5534_v54 = vadd.f32 %v2819_v53, %v5480_v4  ;;  %v2821_v57 = vpop.f32.mrb[33].mxu1 }
 0x3d5   : > { %2919 = vst [vmem:[%s5582_s27 + $0x80] sm:$0xff] (!%p3702_p8), %v5534_v54 }
 0x3d6   : > { %v2824_v58 = vpop.f32.mrb[34].mxu1 }
 0x3d7   : > { %v5537_v59 = vadd.f32 %v2824_v58, %v5480_v4  ;;  %v2826_v62 = vpop.f32.mrb[35].mxu1 }
 0x3d9   : > { %2920 = vst [vmem:[%s5582_s27 + $0x88] sm:$0xff] (!%p3702_p8), %v5537_v59 }
 0x3da   : > { %v2829_v3 = vpop.f32.mrb[36].mxu1 }
 0x3db   : > { %v5540_v37 = vadd.f32 %v2829_v3, %v5480_v4  ;;  %v2831_v5 = vpop.f32.mrb[37].mxu1 }
 0x3dd   : > { %2921 = vst [vmem:[%s5582_s27 + $0x90] sm:$0xff] (!%p3702_p8), %v5540_v37 }
 0x3de   : > { %v2834_v8 = vpop.f32.mrb[38].mxu1 }
 0x3df   : > { %v5543_v11 = vadd.f32 %v2834_v8, %v5480_v4  ;;  %v2836_v33 = vpop.f32.mrb[39].mxu1 }
 0x3e1   : > { %2922 = vst [vmem:[%s5582_s27 + $0x98] sm:$0xff] (!%p3702_p8), %v5543_v11 }
 0x3e2   : > { %v2839_v38 = vpop.f32.mrb[40].mxu1 }
 0x3e3   : > { %v5546_v63 = vadd.f32 %v2839_v38, %v5480_v4  ;;  %v2841_v0 = vpop.f32.mrb[41].mxu1 }
 0x3e5   : > { %2923 = vst [vmem:[%s5582_s27 + $0xa0] sm:$0xff] (!%p3702_p8), %v5546_v63 }
 0x3e6   : > { %v2844_v25 = vpop.f32.mrb[42].mxu1 }
 0x3e7   : > { %v5549_v14 = vadd.f32 %v2844_v25, %v5480_v4  ;;  %v2846_v21 = vpop.f32.mrb[43].mxu1 }
 0x3e9   : > { %2924 = vst [vmem:[%s5582_s27 + $0xa8] sm:$0xff] (!%p3702_p8), %v5549_v14 }
 0x3ea   : > { %v2849_v36 = vpop.f32.mrb[44].mxu1 }
 0x3eb   : > { %v5552_v41 = vadd.f32 %v2849_v36, %v5480_v4  ;;  %v2851_v52 = vpop.f32.mrb[45].mxu1 }
 0x3ed   : > { %2925 = vst [vmem:[%s5582_s27 + $0xb0] sm:$0xff] (!%p3702_p8), %v5552_v41 }
 0x3ee   : > { %v2854_v32 = vpop.f32.mrb[46].mxu1 }
 0x3ef   : > { %v5555_v60 = vadd.f32 %v2854_v32, %v5480_v4  ;;  %v2856_v2 = vpop.f32.mrb[47].mxu1 }
 0x3f1   : > { %2926 = vst [vmem:[%s5582_s27 + $0xb8] sm:$0xff] (!%p3702_p8), %v5555_v60 }
 0x3f2   : > { %v2859_v16 = vpop.f32.mrb[48].mxu1 }
 0x3f3   : > { %v5558_v26 = vadd.f32 %v2859_v16, %v5480_v4  ;;  %v2861_v42 = vpop.f32.mrb[49].mxu1 }
 0x3f5   : > { %2927 = vst [vmem:[%s5582_s27 + $0xc0] sm:$0xff] (!%p3702_p8), %v5558_v26 }
 0x3f6   : > { %v2864_v46 = vpop.f32.mrb[50].mxu1 }
 0x3f7   : > { %v5561_v61 = vadd.f32 %v2864_v46, %v5480_v4  ;;  %v2866_v7 = vpop.f32.mrb[51].mxu1 }
 0x3f9   : > { %2928 = vst [vmem:[%s5582_s27 + $0xc8] sm:$0xff] (!%p3702_p8), %v5561_v61 }
 0x3fa   : > { %v2869_v27 = vpop.f32.mrb[52].mxu1 }
 0x3fb   : > { %v5564_v31 = vadd.f32 %v2869_v27, %v5480_v4  ;;  %v2871_v51 = vpop.f32.mrb[53].mxu1 }
 0x3fd   : > { %2929 = vst [vmem:[%s5582_s27 + $0xd0] sm:$0xff] (!%p3702_p8), %v5564_v31 }
 0x3fe   : > { %v2874_v1 = vpop.f32.mrb[54].mxu1 }
 0x3ff   : > { %v5567_v12 = vadd.f32 %v2874_v1, %v5480_v4  ;;  %v2876_v17 = vpop.f32.mrb[55].mxu1 }
 0x401   : > { %2930 = vst [vmem:[%s5582_s27 + $0xd8] sm:$0xff] (!%p3702_p8), %v5567_v12 }
 0x402   : > { %v2879_v20 = vpop.f32.mrb[56].mxu1 }
 0x403   : > { %v5570_v22 = vadd.f32 %v2879_v20, %v5480_v4  ;;  %v2881_v24 = vpop.f32.mrb[57].mxu1 }
 0x405   : > { %2931 = vst [vmem:[%s5582_s27 + $0xe0] sm:$0xff] (!%p3702_p8), %v5570_v22 }
 0x406   : > { %v2884_v29 = vpop.f32.mrb[58].mxu1 }
 0x407   : > { %v5573_v18 = vadd.f32 %v2884_v29, %v5480_v4  ;;  %v2886_v35 = vpop.f32.mrb[59].mxu1 }
 0x409   : > { %2902 = sbr.rel (%p3702_p8) target bundleno = 1042 (0x412), region = 82  ;;  %2932 = vst [vmem:[%s5582_s27 + $0xe8] sm:$0xff] (!%p3702_p8), %v5573_v18 }
 0x40a   : > { %v2889_v39 = vpop.f32.mrb[60].mxu1 }
 0x40b   : > { %v5576_v40 = vadd.f32 %v2889_v39, %v5480_v4  ;;  %v2891_v44 = vpop.f32.mrb[61].mxu1 }
 0x40d   : > { %2933 = vst [vmem:[%s5582_s27 + $0xf0] sm:$0xff] (!%p3702_p8), %v5576_v40 }
 0x40e   : > { %v2894_v47 = vpop.f32.mrb[62].mxu1 }
 0x40f   : > { %v5579_v50 = vadd.f32 %v2894_v47, %v5480_v4  ;;  %v2896_v53 = vpop.f32.mrb[63].mxu1 }
 0x411   : > { %2934 = vst [vmem:[%s5582_s27 + $0xf8] sm:$0xff] %v5579_v50 }
 0x412 PF: > { %s2935_s1 = sld [smem:[#allocation4 + %s4184_s22]] }
 0x418   : > { %p3703_p9 = scmp.ne.s32.totalorder %s2935_s1, 0 }
 0x419   : > { %v2940_v4 = vld [vmem:[%s5582_s27] sm:$0xff] (!%p3703_p9)  ;;  %v2941_v57 = vld [vmem:[%s5582_s27 + $0x8] sm:$0xff] (!%p3703_p9)  ;;  %v2942_v58 = vld [vmem:[%s5582_s27 + $0x10] sm:$0xff] (!%p3703_p9) }
 0x41a   : > { %2939 = sbr.rel (%p3703_p9) target bundleno = 1068 (0x42c), region = 86  ;;  %v2972_v62 = vadd.f32 (!%p3703_p9), %v5486_v10, %v2940_v4  ;;  %v2973_v3 = vadd.f32 (!%p3703_p9), %v5489_v28, %v2941_v57  ;;  %v2974_v5 = vadd.f32 (!%p3703_p9), %v5492_v48, %v2942_v58  ;;  %v2943_v8 = vld [vmem:[%s5582_s27 + $0x18] sm:$0xff] (!%p3703_p9)  ;;  %v2944_v33 = vld [vmem:[%s5582_s27 + $0x20] sm:$0xff] (!%p3703_p9)  ;;  %v2945_v38 = vld [vmem:[%s5582_s27 + $0x28] sm:$0xff] (!%p3703_p9) }
 0x41b   : > { %v2975_v0 = vadd.f32 (!%p3703_p9), %v5495_v56, %v2943_v8  ;;  %v2976_v25 = vadd.f32 (!%p3703_p9), %v5498_v9, %v2944_v33  ;;  %v2977_v21 = vadd.f32 (!%p3703_p9), %v5501_v34, %v2945_v38  ;;  %v2946_v10 = vld [vmem:[%s5582_s27 + $0x30] sm:$0xff] (!%p3703_p9)  ;;  %v2947_v36 = vld [vmem:[%s5582_s27 + $0x38] sm:$0xff] (!%p3703_p9)  ;;  %v2948_v28 = vld [vmem:[%s5582_s27 + $0x40] sm:$0xff] (!%p3703_p9) }
 0x41c   : > { %3004 = vst [vmem:[%s5582_s27] sm:$0xff] (!%p3703_p9), %v2972_v62  ;;  %3005 = vst [vmem:[%s5582_s27 + $0x8] sm:$0xff] (!%p3703_p9), %v2973_v3  ;;  %v2978_v48 = vadd.f32 (!%p3703_p9), %v5504_v55, %v2946_v10  ;;  %v2979_v56 = vadd.f32 (!%p3703_p9), %v5507_v13, %v2947_v36  ;;  %v2980_v9 = vadd.f32 (!%p3703_p9), %v5510_v45, %v2948_v28  ;;  %v2949_v52 = vld [vmem:[%s5582_s27 + $0x48] sm:$0xff] (!%p3703_p9)  ;;  %v2950_v34 = vld [vmem:[%s5582_s27 + $0x50] sm:$0xff] (!%p3703_p9) }
 0x41d   : > { %3006 = vst [vmem:[%s5582_s27 + $0x10] sm:$0xff] (!%p3703_p9), %v2974_v5  ;;  %v2951_v32 = vld [vmem:[%s5582_s27 + $0x58] sm:$0xff] (!%p3703_p9)  ;;  %3007 = vst [vmem:[%s5582_s27 + $0x18] sm:$0xff] (!%p3703_p9), %v2975_v0  ;;  %v2981_v2 = vadd.f32 (!%p3703_p9), %v5513_v6, %v2949_v52  ;;  %v2982_v55 = vadd.f32 (!%p3703_p9), %v5516_v19, %v2950_v34  ;;  %v2952_v16 = vld [vmem:[%s5582_s27 + $0x60] sm:$0xff] (!%p3703_p9) }
 0x41e   : > { %3008 = vst [vmem:[%s5582_s27 + $0x20] sm:$0xff] (!%p3703_p9), %v2976_v25  ;;  %3009 = vst [vmem:[%s5582_s27 + $0x28] sm:$0xff] (!%p3703_p9), %v2977_v21  ;;  %v2983_v13 = vadd.f32 (!%p3703_p9), %v5519_v23, %v2951_v32  ;;  %v2953_v45 = vld [vmem:[%s5582_s27 + $0x68] sm:$0xff] (!%p3703_p9)  ;;  %v2954_v42 = vld [vmem:[%s5582_s27 + $0x70] sm:$0xff] (!%p3703_p9)  ;;  %v2984_v46 = vadd.f32 (!%p3703_p9), %v5522_v30, %v2952_v16 }
 0x41f   : > { %3010 = vst [vmem:[%s5582_s27 + $0x30] sm:$0xff] (!%p3703_p9), %v2978_v48  ;;  %3011 = vst [vmem:[%s5582_s27 + $0x38] sm:$0xff] (!%p3703_p9), %v2979_v56  ;;  %v2985_v6 = vadd.f32 (!%p3703_p9), %v5525_v15, %v2953_v45  ;;  %v2986_v19 = vadd.f32 (!%p3703_p9), %v5528_v43, %v2954_v42  ;;  %v2955_v7 = vld [vmem:[%s5582_s27 + $0x78] sm:$0xff] (!%p3703_p9)  ;;  %v2956_v23 = vld [vmem:[%s5582_s27 + $0x80] sm:$0xff] (!%p3703_p9) }
 0x420   : > { %3012 = vst [vmem:[%s5582_s27 + $0x40] sm:$0xff] (!%p3703_p9), %v2980_v9  ;;  %v2957_v27 = vld [vmem:[%s5582_s27 + $0x88] sm:$0xff] (!%p3703_p9)  ;;  %3013 = vst [vmem:[%s5582_s27 + $0x48] sm:$0xff] (!%p3703_p9), %v2981_v2  ;;  %v2987_v51 = vadd.f32 (!%p3703_p9), %v5531_v49, %v2955_v7  ;;  %v2988_v30 = vadd.f32 (!%p3703_p9), %v5534_v54, %v2956_v23  ;;  %v2958_v1 = vld [vmem:[%s5582_s27 + $0x90] sm:$0xff] (!%p3703_p9) }
 0x421   : > { %3014 = vst [vmem:[%s5582_s27 + $0x50] sm:$0xff] %v2982_v55  ;;  %3015 = vst [vmem:[%s5582_s27 + $0x58] sm:$0xff] %v2983_v13  ;;  %v2989_v15 = vadd.f32 %v5537_v59, %v2957_v27  ;;  %v2959_v43 = vld [vmem:[%s5582_s27 + $0x98] sm:$0xff]  ;;  %v2960_v17 = vld [vmem:[%s5582_s27 + $0xa0] sm:$0xff]  ;;  %v2990_v20 = vadd.f32 %v5540_v37, %v2958_v1 }
 0x422   : > { %3016 = vst [vmem:[%s5582_s27 + $0x60] sm:$0xff] %v2984_v46  ;;  %3017 = vst [vmem:[%s5582_s27 + $0x68] sm:$0xff] %v2985_v6  ;;  %v2991_v49 = vadd.f32 %v5543_v11, %v2959_v43  ;;  %v2992_v54 = vadd.f32 %v5546_v63, %v2960_v17  ;;  %v2961_v24 = vld [vmem:[%s5582_s27 + $0xa8] sm:$0xff]  ;;  %v2962_v59 = vld [vmem:[%s5582_s27 + $0xb0] sm:$0xff] }
 0x423   : > { %3018 = vst [vmem:[%s5582_s27 + $0x70] sm:$0xff] %v2986_v19  ;;  %v2963_v29 = vld [vmem:[%s5582_s27 + $0xb8] sm:$0xff]  ;;  %3019 = vst [vmem:[%s5582_s27 + $0x78] sm:$0xff] %v2987_v51  ;;  %v2993_v35 = vadd.f32 %v5549_v14, %v2961_v24  ;;  %v2994_v37 = vadd.f32 %v5552_v41, %v2962_v59  ;;  %v2964_v39 = vld [vmem:[%s5582_s27 + $0xc0] sm:$0xff] }
 0x424   : > { %3020 = vst [vmem:[%s5582_s27 + $0x80] sm:$0xff] %v2988_v30  ;;  %3021 = vst [vmem:[%s5582_s27 + $0x88] sm:$0xff] %v2989_v15  ;;  %v2995_v11 = vadd.f32 %v5555_v60, %v2963_v29  ;;  %v2965_v63 = vld [vmem:[%s5582_s27 + $0xc8] sm:$0xff]  ;;  %v2966_v44 = vld [vmem:[%s5582_s27 + $0xd0] sm:$0xff]  ;;  %v2996_v47 = vadd.f32 %v5558_v26, %v2964_v39 }
 0x425   : > { %3022 = vst [vmem:[%s5582_s27 + $0x90] sm:$0xff] %v2990_v20  ;;  %3023 = vst [vmem:[%s5582_s27 + $0x98] sm:$0xff] %v2991_v49  ;;  %v2997_v14 = vadd.f32 %v5561_v61, %v2965_v63  ;;  %v2998_v41 = vadd.f32 %v5564_v31, %v2966_v44  ;;  %v2967_v53 = vld [vmem:[%s5582_s27 + $0xd8] sm:$0xff]  ;;  %v2968_v60 = vld [vmem:[%s5582_s27 + $0xe0] sm:$0xff] }
 0x426   : > { %3024 = vst [vmem:[%s5582_s27 + $0xa0] sm:$0xff] %v2992_v54  ;;  %v2969_v4 = vld [vmem:[%s5582_s27 + $0xe8] sm:$0xff]  ;;  %3025 = vst [vmem:[%s5582_s27 + $0xa8] sm:$0xff] %v2993_v35  ;;  %v2999_v57 = vadd.f32 %v5567_v12, %v2967_v53  ;;  %v3000_v26 = vadd.f32 %v5570_v22, %v2968_v60  ;;  %v2970_v61 = vld [vmem:[%s5582_s27 + $0xf0] sm:$0xff] }
 0x427   : > { %3026 = vst [vmem:[%s5582_s27 + $0xb0] sm:$0xff] %v2994_v37  ;;  %3027 = vst [vmem:[%s5582_s27 + $0xb8] sm:$0xff] %v2995_v11  ;;  %v3001_v58 = vadd.f32 %v5573_v18, %v2969_v4  ;;  %v2971_v62 = vld [vmem:[%s5582_s27 + $0xf8] sm:$0xff]  ;;  %v3002_v31 = vadd.f32 %v5576_v40, %v2970_v61 }
 0x428   : > { %3028 = vst [vmem:[%s5582_s27 + $0xc0] sm:$0xff] %v2996_v47  ;;  %3029 = vst [vmem:[%s5582_s27 + $0xc8] sm:$0xff] %v2997_v14  ;;  %v3003_v3 = vadd.f32 %v5579_v50, %v2971_v62 }
 0x429   : > { %3030 = vst [vmem:[%s5582_s27 + $0xd0] sm:$0xff] %v2998_v41  ;;  %3031 = vst [vmem:[%s5582_s27 + $0xd8] sm:$0xff] %v2999_v57 }
 0x42a   : > { %3032 = vst [vmem:[%s5582_s27 + $0xe0] sm:$0xff] %v3000_v26  ;;  %3033 = vst [vmem:[%s5582_s27 + $0xe8] sm:$0xff] %v3001_v58 }
 0x42b   : > { %3034 = vst [vmem:[%s5582_s27 + $0xf0] sm:$0xff] %v3002_v31  ;;  %3035 = vst [vmem:[%s5582_s27 + $0xf8] sm:$0xff] %v3003_v3 }
 0x42c PF: > { %s3951_s28 = scalar_select %p4341_p11, [#allocation3], [#allocation9] }
 0x42d   : > { %s5860_s22 = smov (!%p4341_p11, %s4184_s22), 0  ;;  %s3053_s11 = sshll.u32 %s5582_s27, 4  ;;  %s5752_s11 = int_to_ptr.vmem [resolvable:$true] %s3053_s11 }
 0x42e   : > { %s3044_s10 = sld [smem:[%s3951_s28 + %s5860_s22]]  ;;  %s5762_s1 = scalar_lea.sflag [#allocation8], %s468_s13 }
 0x42f   : > { %s4088_s3 = scalar_lea.vmem %s5752_s11, 4096  ;;  %s4208_s22 = smov [#allocation7]  }
 0x430   : > { %p4089_p10 = scmp.ne.s32.totalorder %s5752_s11, %s4088_s3  ;;  %s4092_s27 = sshll.u32 %s4208_s22, 4  ;;  %s4093_s27 = int_to_ptr.vmem [resolvable:$false] %s4092_s27 }
 0x431   : > { %s4094_s28 = scalar_lea.vmem %s4093_s27, 8192  ;;  %p4095_p1 = scmp.lt.s32.totalorder %s5752_s11, %s4093_s27 }
 0x432   : > { %p4090_p13 = pnand %p4089_p10, %p4341_p11  ;;  %p4096_p2 = scmp.lt.s32.totalorder %s4094_s28, %s4088_s3 }
 0x434   : > { %s3950_s20 = smul.u32 96, %s3044_s10  ;;  %p4091_p0 = pneg %p4090_p13 }
 0x435   : > { %p4097_p3 = por %p4096_p2, %p4095_p1 }
 0x436   : > { %s3050_s12 = sadd.s32 %s4188_s23, %s3950_s20 }
 0x437   : > { %s3707_s9 = sshll.u32 %s3050_s12, 7  ;;  %p4098_p4 = pnand %p4097_p3, %p4091_p0 }
 0x438   : > { %s5758_s17 = scalar_lea.hbm %s5826_s8, %s3707_s9 }
 0x439   : > { %4101 = shalt.err (!%p4098_p4)
}
 0x43a   : > { %s4102_s23 = scalar_lea.hbm %s5758_s17, 4096  ;;  %s4106_s20 = scalar_lea.hbm %s5826_s8, 24576 }
 0x43b   : > { %p4103_p5 = scmp.ne.s32.totalorder %s5758_s17, %s4102_s23  ;;  %p4107_p8 = scmp.lt.u32.totalorder %s5758_s17, %s5826_s8 }
 0x43c   : > { %p4108_p9 = scmp.lt.u32.totalorder %s4106_s20, %s4102_s23  ;;  %p4110_p13 = scmp.lt.u32.totalorder %s4102_s23, %s5758_s17 }
 0x43d   : > { %p4104_p6 = pnand %p4103_p5, %p4341_p11 }
 0x43e   : > { %p4109_p10 = por %p4108_p9, %p4107_p8 }
 0x43f   : > { %p4105_p7 = pneg %p4104_p6 }
 0x440   : > { %p4111_p0 = por %p4110_p13, %p4109_p10 }
 0x442   : > { %p4112_p1 = pnand %p4111_p0, %p4105_p7 }
 0x444   : > { %4115 = shalt.err (!%p4112_p1)
}
 0x445   : > { %s4209_s3 = smov 128   ;;  %s4210_s16 = smov 384  }
 0x446   : > { %s4211_s30 = smov 8  }
 0x447   : > { %3953 = dma.vmem_to_hbm [thread:$0]  (%p4341_p11), %s5752_s11, 4096, %s5758_s17, %s5762_s1, %s4209_s3, %s4210_s16, %s4211_s30  }
 0x448 PF: > { %p3959_p2 = scmp.ge.s32.totalorder %s4200_s26, 2  ;;  %s3068_s22 = sand.u32 1, %s4164_s18  }
 0x449   : > { %s3069_s27 = scalar_lea.sflag [#allocation8], %s3068_s22 }
 0x44a   : > { %p3956_p3 = pnand %p3959_p2, %p4345_p12 }
 0x44c   : > { %4159 = dma.done.wait (!%p3956_p3), %s3069_s27, 4096  }
 0x44d   : > { %4161 = vsyncadd (!%p3956_p3), %s3069_s27, 4294963200  ;;  %s35_s26 = sadd.s32 1, %s4200_s26   ;;  %s5838_s0 = sld [smem:[#allocation12_spill]] }
 0x44e   : > { %p32_p4 = scmp.ge.s32.totalorder %s35_s26, 20   ;;  %s5839_s11 = sld [smem:[#allocation13_spill]] }
 0x44f   : > { %s5840_s18 = smov %s4168_s19  ;;  %s5841_s19 = smov %s4172_s2 }
 0x450   : > { %s5842_s2 = smov %s4354_s29  ;;  %s5843_s20 = smov %s4180_s21 }
 0x451   : > { %s5844_s21 = smov %s4350_s15  ;;  %s5845_s22 = smov %s4192_s24 }
 0x452   : > { %s5846_s23 = smov %s4196_s25  ;;  %34 = sbr.rel (!%p32_p4) target bundleno = 42 (0x2a), region = 138 }
 0x453   : > { %s5847_s24 = smov %s5838_s0 }
 0x454   : > { %s5848_s25 = smov %s5839_s11 }
 0x459   :  { %3074 = vsyncpa [#allocation8], 1 }
 0x45a   :  { %3076 = vsyncpa [#allocation8 + $0x1], 1 }

</bundles_post_ra>
